<compile_context>
chip_gen: v7x
topology: tpu7x:2x2x1
jax: 0.10.0
libtpu: 0.0.40
codegen_flags: <defaults>
</compile_context>

<pallas_src>
import functools

import jax
import jax.numpy as jnp
from jax.experimental import pallas as pl
from jax.experimental.pallas import tpu as pltpu


_BN_EPS = 1e-5
_COMPILER_PARAMS = pltpu.CompilerParams(vmem_limit_bytes=32 * 1024 * 1024)


# ---------------------------------------------------------------------------
# Pallas kernels
# ---------------------------------------------------------------------------
def _conv_bn_relu_kernel(p_ref, w_ref, gb_ref, o_ref):
    """im2col-GEMM with fused training-mode BatchNorm + ReLU.

    p_ref : (M, K)  bf16 patches, M = B*Ho*Wo (whole batch -> exact BN stats)
    w_ref : (K, N)  bf16 conv weights (N = Cout)
    gb_ref: (2, N)  f32 stacked (gamma, beta); conv bias is dropped (cancels
            against the BN mean subtraction)
    o_ref : (M, N)  bf16 activations
    """
    acc = jnp.dot(p_ref[...], w_ref[...], preferred_element_type=jnp.float32)
    inv_m = 1.0 / acc.shape[0]
    mean = jnp.sum(acc, axis=0, keepdims=True) * inv_m
    # Single-pass biased variance: E[x^2] - E[x]^2 (as PyTorch training BN).
    var = jnp.sum(acc * acc, axis=0, keepdims=True) * inv_m - mean * mean
    var = jnp.maximum(var, 0.0)
    scale = gb_ref[0:1, :] * jax.lax.rsqrt(var + _BN_EPS)
    shift = gb_ref[1:2, :] - mean * scale
    o_ref[...] = jnp.maximum(acc * scale + shift, 0.0).astype(o_ref.dtype)


def _tail_kernel(p3_ref, w3_ref, gb3_ref, w1_ref, b1_ref, w2_ref, b2_ref, o_ref):
    """Fused tail: conv3-GEMM + BN + ReLU + flatten + fc1 + ReLU + fc2.

    p3_ref : (16*B, 9*64) bf16 conv3 patches, rows ordered position-major
             (row = p*B + b, p = ho*4 + wo) so per-position row blocks are
             contiguous and no in-kernel transpose/flatten is needed.
    w3_ref : (9*64, 64)    bf16 conv3 weights
    gb3_ref: (2, 64)       f32 stacked (gamma, beta)
    w1_ref : (16, 64, 512) bf16 fc1 weight, pre-permuted so that
             w1_ref[p][c, n] == fc1_w[n, c*16 + p] (PyTorch NCHW flatten order)
    b1_ref : (1, 512)      f32
    w2_ref : (512, 128)    bf16 fc2 weight, zero-padded to 128 lanes
    b2_ref : (1, 128)      f32 zero-padded
    o_ref  : (B, 128)      f32 (caller slices [:, :output_size])
    """
    batch = o_ref.shape[0]
    npos = w1_ref.shape[0]                       # 16 spatial positions (4x4)
    assert p3_ref.shape[0] == npos * batch       # trace-time shape check

    # conv3 as one GEMM, BN + ReLU epilogue in f32.
    acc = jnp.dot(p3_ref[...], w3_ref[...], preferred_element_type=jnp.float32)
    inv_m = 1.0 / acc.shape[0]
    mean = jnp.sum(acc, axis=0, keepdims=True) * inv_m
    var = jnp.sum(acc * acc, axis=0, keepdims=True) * inv_m - mean * mean
    var = jnp.maximum(var, 0.0)
    scale = gb3_ref[0:1, :] * jax.lax.rsqrt(var + _BN_EPS)
    shift = gb3_ref[1:2, :] - mean * scale
    h3 = jnp.maximum(acc * scale + shift, 0.0)   # (16B, 64) f32

    # fc1: the NCHW flatten + (1024, 512) GEMM expressed as a sum of 16
    # per-position (B, 64) @ (64, 512) GEMMs; the hidden activation never
    # leaves VMEM and stays lane-dense (channels on the lane axis).
    h1 = jnp.broadcast_to(b1_ref[...], (batch, 512)).astype(jnp.float32)
    for p in range(npos):
        h3_p = h3[p * batch:(p + 1) * batch, :].astype(jnp.bfloat16)
        h1 = h1 + jnp.dot(h3_p, w1_ref[p], preferred_element_type=jnp.float32)
    h1 = jnp.maximum(h1, 0.0).astype(jnp.bfloat16)

    # fc2 with a lane-dense, zero-padded (B, 128) output store.
    out = jnp.dot(h1, w2_ref[...], preferred_element_type=jnp.float32)
    o_ref[...] = out + b2_ref[...]


# ---------------------------------------------------------------------------
# Glue: im2col + pallas_call wrappers
# ---------------------------------------------------------------------------
def _im2col(x_nhwc, kh, kw, stride):
    """(B*Ho*Wo, kh*kw*C) patches, rows in (b, ho, wo), cols in (kh, kw, c)."""
    B, H, W, C = x_nhwc.shape
    Ho = (H - kh) // stride + 1
    Wo = (W - kw) // stride + 1
    cols = []
    for i in range(kh):
        for j in range(kw):
            cols.append(
                x_nhwc[:, i:i + stride * Ho:stride, j:j + stride * Wo:stride, :]
            )
    p = jnp.stack(cols, axis=3)                       # (B, Ho, Wo, kh*kw, C)
    return p.reshape(B * Ho * Wo, kh * kw * C), B, Ho, Wo


def _im2col_pmajor(x_nhwc, kh, kw, stride):
    """Like _im2col but rows ordered position-major: row = (ho*Wo+wo)*B + b."""
    B, H, W, C = x_nhwc.shape
    Ho = (H - kh) // stride + 1
    Wo = (W - kw) // stride + 1
    cols = []
    for i in range(kh):
        for j in range(kw):
            cols.append(
                x_nhwc[:, i:i + stride * Ho:stride, j:j + stride * Wo:stride, :]
            )
    p = jnp.stack(cols, axis=3)                       # (B, Ho, Wo, kh*kw, C)
    p = jnp.transpose(p, (1, 2, 0, 3, 4))             # (Ho, Wo, B, kh*kw, C)
    return p.reshape(Ho * Wo * B, kh * kw * C), B, Ho, Wo


def _conv_bn_relu(patches, w2d, gb):
    m = patches.shape[0]
    cout = w2d.shape[1]
    return pl.pallas_call(
        _conv_bn_relu_kernel,
        out_shape=jax.ShapeDtypeStruct((m, cout), jnp.bfloat16),
        compiler_params=_COMPILER_PARAMS,
    )(patches, w2d, gb)


# ---------------------------------------------------------------------------
# DQN forward
# ---------------------------------------------------------------------------
def dqn_forward(kp, x_nchw, *, output_size):
    x = jnp.transpose(x_nchw, (0, 2, 3, 1)).astype(jnp.bfloat16)  # NCHW -> NHWC

    # conv1 (k=8, s=4) + BN + ReLU
    p1, B, H1, W1 = _im2col(x, 8, 8, 4)
    a1 = _conv_bn_relu(p1, kp["w1"], kp["gb1"]).reshape(B, H1, W1, 32)

    # conv2 (k=4, s=2) + BN + ReLU
    p2, _, H2, W2 = _im2col(a1, 4, 4, 2)
    a2 = _conv_bn_relu(p2, kp["w2"], kp["gb2"]).reshape(B, H2, W2, 64)

    # fused tail: conv3 (k=3, s=1) + BN + ReLU + flatten + fc1 + ReLU + fc2
    p3, _, _, _ = _im2col_pmajor(a2, 3, 3, 1)
    out = pl.pallas_call(
        _tail_kernel,
        out_shape=jax.ShapeDtypeStruct((B, 128), jnp.float32),
        compiler_params=_COMPILER_PARAMS,
    )(p3, kp["w3"], kp["gb3"], kp["w1r"], kp["b1"], kp["w2p"], kp["b2p"])
    return out[:, :output_size]


# ---------------------------------------------------------------------------
# Parameter handling
# ---------------------------------------------------------------------------
def prepare_params(p, output_size):
    """One-time conversion of PyTorch-layout f32 params to kernel layout."""
    def conv_w(w):
        cout, cin, kh, kw = w.shape
        # (Cout, Cin, KH, KW) -> (KH*KW*Cin, Cout), matching im2col (kh,kw,c).
        return (jnp.transpose(w, (2, 3, 1, 0))
                .reshape(kh * kw * cin, cout).astype(jnp.bfloat16))

    kp = {}
    # Conv biases (p["b1"..]) are intentionally unused: cancelled by BN mean.
    kp["w1"] = conv_w(p["w1"]); kp["gb1"] = jnp.stack([p["g1"], p["be1"]])
    kp["w2"] = conv_w(p["w2"]); kp["gb2"] = jnp.stack([p["g2"], p["be2"]])
    kp["w3"] = conv_w(p["w3"]); kp["gb3"] = jnp.stack([p["g3"], p["be3"]])

    # fc1: (512, 1024) with columns in NCHW (c, h, w) order
    #   -> (p=(h,w), c, 512) so the kernel consumes the lane-dense NHWC flatten.
    w1r = p["fc1_w"].reshape(512, 64, 4, 4)              # [n, c, h, w]
    w1r = jnp.transpose(w1r, (2, 3, 1, 0)).reshape(16, 64, 512)
    kp["w1r"] = w1r.astype(jnp.bfloat16)
    kp["b1"] = p["fc1_b"].reshape(1, 512).astype(jnp.float32)

    # fc2: (out, 512) -> (512, 128) zero-padded (lane-dense final store).
    w2p = jnp.zeros((512, 128), jnp.float32)
    w2p = w2p.at[:, :output_size].set(jnp.transpose(p["fc2_w"]))
    kp["w2p"] = w2p.astype(jnp.bfloat16)
    b2p = jnp.zeros((1, 128), jnp.float32).at[0, :output_size].set(p["fc2_b"])
    kp["b2p"] = b2p
    return kp


def init_params(key, input_size, output_size):
    """Deterministic PyTorch-style init (shapes from DQN.__init__)."""
    ks = jax.random.split(key, 12)

    def u(k, shape, fan_in):
        bound = 1.0 / jnp.sqrt(jnp.float32(fan_in))
        return jax.random.uniform(k, shape, jnp.float32, -bound, bound)

    p = {}
    # conv1: Conv2d(input_size, 32, k=8, s=4) + BN(32)
    p["w1"] = u(ks[0], (32, input_size, 8, 8), input_size * 8 * 8)
    p["b1"] = u(ks[1], (32,), input_size * 8 * 8)
    p["g1"] = jnp.ones((32,), jnp.float32)
    p["be1"] = jnp.zeros((32,), jnp.float32)
    # conv2: Conv2d(32, 64, k=4, s=2) + BN(64)
    p["w2"] = u(ks[2], (64, 32, 4, 4), 32 * 4 * 4)
    p["b2"] = u(ks[3], (64,), 32 * 4 * 4)
    p["g2"] = jnp.ones((64,), jnp.float32)
    p["be2"] = jnp.zeros((64,), jnp.float32)
    # conv3: Conv2d(64, 64, k=3, s=1) + BN(64)
    p["w3"] = u(ks[4], (64, 64, 3, 3), 64 * 3 * 3)
    p["b3"] = u(ks[5], (64,), 64 * 3 * 3)
    p["g3"] = jnp.ones((64,), jnp.float32)
    p["be3"] = jnp.zeros((64,), jnp.float32)
    # classifier: Linear(64*4*4, 512), Linear(512, output_size)
    p["fc1_w"] = u(ks[6], (512, 64 * 4 * 4), 64 * 4 * 4)
    p["fc1_b"] = u(ks[7], (512,), 64 * 4 * 4)
    p["fc2_w"] = u(ks[8], (output_size, 512), 512)
    p["fc2_b"] = u(ks[9], (output_size,), 512)
    return p


# ---------------------------------------------------------------------------
if __name__ == "__main__":
    input_size = 4     # input channels (e.g. stacked frames)
    output_size = 6    # number of actions
    batch = 2

    key = jax.random.PRNGKey(0)
    k_params, k_x = jax.random.split(key)
    params = init_params(k_params, input_size, output_size)
    kparams = prepare_params(params, output_size)   # one-time layout/dtype prep

    # Spatial size 60x60 so that the conv stack yields 64 x 4 x 4 features.
    x = jax.random.normal(k_x, (batch, input_size, 60, 60), dtype=jnp.float32)

    fwd = jax.jit(functools.partial(dqn_forward, output_size=output_size))
    out = fwd(kparams, x)
    jax.block_until_ready(out)

    assert out.shape == (batch, output_size), out.shape
    assert out.dtype == jnp.float32
    print("KERNEL_OK")
</pallas_src>

<mosaic_0001>
module attributes {stable_mosaic.version = 11 : i64} {
  func.func @_conv_bn_relu_kernel(%arg0: memref<392x256xbf16, #tpu.memory_space<vmem>>, %arg1: memref<256x32xbf16, #tpu.memory_space<vmem>>, %arg2: memref<2x32xf32, #tpu.memory_space<vmem>>, %arg3: memref<392x32xbf16, #tpu.memory_space<vmem>>) attributes {dimension_semantics = [], scalar_prefetch = 0 : i64, scratch_operands = 0 : i64, tpu.core_type = #tpu.core_type<tc>} {
    %c0 = arith.constant 0 : index
    %c0_0 = arith.constant 0 : index
    %0 = vector.load %arg0[%c0, %c0_0] : memref<392x256xbf16, #tpu.memory_space<vmem>>, vector<392x256xbf16>
    %c0_1 = arith.constant 0 : index
    %c0_2 = arith.constant 0 : index
    %1 = vector.load %arg1[%c0_1, %c0_2] : memref<256x32xbf16, #tpu.memory_space<vmem>>, vector<256x32xbf16>
    %cst = arith.constant dense<0.000000e+00> : vector<392x32xf32>
    %2 = tpu.matmul %0, %1, %cst {dimension_numbers = #tpu.dot_dimension_numbers<[1], [0], [0], [1], [0, 0, 1, 1], [], []>} : vector<392x256xbf16>, vector<256x32xbf16>, vector<392x32xf32> -> vector<392x32xf32>
    %cst_3 = arith.constant dense<0.000000e+00> : vector<32xf32>
    %3 = vector.multi_reduction <add>, %2, %cst_3 [0] : vector<392x32xf32> to vector<32xf32>
    %4 = vector.shape_cast %3 : vector<32xf32> to vector<1x32xf32>
    %cst_4 = arith.constant 0.00255102036 : f32
    %5 = vector.broadcast %cst_4 : f32 to vector<1x32xf32>
    %6 = arith.mulf %4, %5 : vector<1x32xf32>
    %7 = arith.mulf %2, %2 : vector<392x32xf32>
    %cst_5 = arith.constant dense<0.000000e+00> : vector<32xf32>
    %8 = vector.multi_reduction <add>, %7, %cst_5 [0] : vector<392x32xf32> to vector<32xf32>
    %9 = vector.shape_cast %8 : vector<32xf32> to vector<1x32xf32>
    %cst_6 = arith.constant 0.00255102036 : f32
    %10 = vector.broadcast %cst_6 : f32 to vector<1x32xf32>
    %11 = arith.mulf %9, %10 : vector<1x32xf32>
    %12 = arith.mulf %6, %6 : vector<1x32xf32>
    %13 = arith.subf %11, %12 : vector<1x32xf32>
    %cst_7 = arith.constant 0.000000e+00 : f32
    %14 = vector.broadcast %cst_7 : f32 to vector<1x32xf32>
    %15 = arith.maximumf %13, %14 : vector<1x32xf32>
    %c0_8 = arith.constant 0 : index
    %c0_9 = arith.constant 0 : index
    %16 = vector.load %arg2[%c0_8, %c0_9] : memref<2x32xf32, #tpu.memory_space<vmem>>, vector<1x32xf32>
    %cst_10 = arith.constant 9.99999974E-6 : f32
    %17 = vector.broadcast %cst_10 : f32 to vector<1x32xf32>
    %18 = arith.addf %15, %17 : vector<1x32xf32>
    %19 = math.rsqrt %18 : vector<1x32xf32>
    %20 = arith.mulf %16, %19 : vector<1x32xf32>
    %c1 = arith.constant 1 : index
    %c0_11 = arith.constant 0 : index
    %21 = vector.load %arg2[%c1, %c0_11] : memref<2x32xf32, #tpu.memory_space<vmem>>, vector<1x32xf32>
    %22 = arith.mulf %6, %20 : vector<1x32xf32>
    %23 = arith.subf %21, %22 : vector<1x32xf32>
    %24 = vector.broadcast %20 : vector<1x32xf32> to vector<392x32xf32>
    %25 = arith.mulf %2, %24 : vector<392x32xf32>
    %26 = vector.broadcast %23 : vector<1x32xf32> to vector<392x32xf32>
    %27 = arith.addf %25, %26 : vector<392x32xf32>
    %cst_12 = arith.constant 0.000000e+00 : f32
    %28 = vector.broadcast %cst_12 : f32 to vector<392x32xf32>
    %29 = arith.maximumf %27, %28 : vector<392x32xf32>
    %30 = arith.truncf %29 : vector<392x32xf32> to vector<392x32xbf16>
    %c0_13 = arith.constant 0 : index
    %c0_14 = arith.constant 0 : index
    %31 = vector.load %arg3[%c0_13, %c0_14] : memref<392x32xbf16, #tpu.memory_space<vmem>>, vector<392x32xbf16>
    tpu.vector_store %arg3[%c0_13, %c0_14], %30 {strides = array<i32>} : memref<392x32xbf16, #tpu.memory_space<vmem>>, vector<392x32xbf16>,
    return
  }
}

module attributes {stable_mosaic.version = 11 : i64} {
  func.func @_conv_bn_relu_kernel(%arg0: memref<72x512xbf16, #tpu.memory_space<vmem>>, %arg1: memref<512x64xbf16, #tpu.memory_space<vmem>>, %arg2: memref<2x64xf32, #tpu.memory_space<vmem>>, %arg3: memref<72x64xbf16, #tpu.memory_space<vmem>>) attributes {dimension_semantics = [], scalar_prefetch = 0 : i64, scratch_operands = 0 : i64, tpu.core_type = #tpu.core_type<tc>} {
    %c0 = arith.constant 0 : index
    %c0_0 = arith.constant 0 : index
    %0 = vector.load %arg0[%c0, %c0_0] : memref<72x512xbf16, #tpu.memory_space<vmem>>, vector<72x512xbf16>
    %c0_1 = arith.constant 0 : index
    %c0_2 = arith.constant 0 : index
    %1 = vector.load %arg1[%c0_1, %c0_2] : memref<512x64xbf16, #tpu.memory_space<vmem>>, vector<512x64xbf16>
    %cst = arith.constant dense<0.000000e+00> : vector<72x64xf32>
    %2 = tpu.matmul %0, %1, %cst {dimension_numbers = #tpu.dot_dimension_numbers<[1], [0], [0], [1], [0, 0, 1, 1], [], []>} : vector<72x512xbf16>, vector<512x64xbf16>, vector<72x64xf32> -> vector<72x64xf32>
    %cst_3 = arith.constant dense<0.000000e+00> : vector<64xf32>
    %3 = vector.multi_reduction <add>, %2, %cst_3 [0] : vector<72x64xf32> to vector<64xf32>
    %4 = vector.shape_cast %3 : vector<64xf32> to vector<1x64xf32>
    %cst_4 = arith.constant 0.013888889 : f32
    %5 = vector.broadcast %cst_4 : f32 to vector<1x64xf32>
    %6 = arith.mulf %4, %5 : vector<1x64xf32>
    %7 = arith.mulf %2, %2 : vector<72x64xf32>
    %cst_5 = arith.constant dense<0.000000e+00> : vector<64xf32>
    %8 = vector.multi_reduction <add>, %7, %cst_5 [0] : vector<72x64xf32> to vector<64xf32>
    %9 = vector.shape_cast %8 : vector<64xf32> to vector<1x64xf32>
    %cst_6 = arith.constant 0.013888889 : f32
    %10 = vector.broadcast %cst_6 : f32 to vector<1x64xf32>
    %11 = arith.mulf %9, %10 : vector<1x64xf32>
    %12 = arith.mulf %6, %6 : vector<1x64xf32>
    %13 = arith.subf %11, %12 : vector<1x64xf32>
    %cst_7 = arith.constant 0.000000e+00 : f32
    %14 = vector.broadcast %cst_7 : f32 to vector<1x64xf32>
    %15 = arith.maximumf %13, %14 : vector<1x64xf32>
    %c0_8 = arith.constant 0 : index
    %c0_9 = arith.constant 0 : index
    %16 = vector.load %arg2[%c0_8, %c0_9] : memref<2x64xf32, #tpu.memory_space<vmem>>, vector<1x64xf32>
    %cst_10 = arith.constant 9.99999974E-6 : f32
    %17 = vector.broadcast %cst_10 : f32 to vector<1x64xf32>
    %18 = arith.addf %15, %17 : vector<1x64xf32>
    %19 = math.rsqrt %18 : vector<1x64xf32>
    %20 = arith.mulf %16, %19 : vector<1x64xf32>
    %c1 = arith.constant 1 : index
    %c0_11 = arith.constant 0 : index
    %21 = vector.load %arg2[%c1, %c0_11] : memref<2x64xf32, #tpu.memory_space<vmem>>, vector<1x64xf32>
    %22 = arith.mulf %6, %20 : vector<1x64xf32>
    %23 = arith.subf %21, %22 : vector<1x64xf32>
    %24 = vector.broadcast %20 : vector<1x64xf32> to vector<72x64xf32>
    %25 = arith.mulf %2, %24 : vector<72x64xf32>
    %26 = vector.broadcast %23 : vector<1x64xf32> to vector<72x64xf32>
    %27 = arith.addf %25, %26 : vector<72x64xf32>
    %cst_12 = arith.constant 0.000000e+00 : f32
    %28 = vector.broadcast %cst_12 : f32 to vector<72x64xf32>
    %29 = arith.maximumf %27, %28 : vector<72x64xf32>
    %30 = arith.truncf %29 : vector<72x64xf32> to vector<72x64xbf16>
    %c0_13 = arith.constant 0 : index
    %c0_14 = arith.constant 0 : index
    %31 = vector.load %arg3[%c0_13, %c0_14] : memref<72x64xbf16, #tpu.memory_space<vmem>>, vector<72x64xbf16>
    tpu.vector_store %arg3[%c0_13, %c0_14], %30 {strides = array<i32>} : memref<72x64xbf16, #tpu.memory_space<vmem>>, vector<72x64xbf16>,
    return
  }
}

module attributes {stable_mosaic.version = 11 : i64} {
  func.func @_tail_kernel(%arg0: memref<32x576xbf16, #tpu.memory_space<vmem>>, %arg1: memref<576x64xbf16, #tpu.memory_space<vmem>>, %arg2: memref<2x64xf32, #tpu.memory_space<vmem>>, %arg3: memref<16x64x512xbf16, #tpu.memory_space<vmem>>, %arg4: memref<1x512xf32, #tpu.memory_space<vmem>>, %arg5: memref<512x128xbf16, #tpu.memory_space<vmem>>, %arg6: memref<1x128xf32, #tpu.memory_space<vmem>>, %arg7: memref<2x128xf32, #tpu.memory_space<vmem>>) attributes {dimension_semantics = [], scalar_prefetch = 0 : i64, scratch_operands = 0 : i64, tpu.core_type = #tpu.core_type<tc>} {
    %c0 = arith.constant 0 : index
    %c0_0 = arith.constant 0 : index
    %0 = vector.load %arg0[%c0, %c0_0] : memref<32x576xbf16, #tpu.memory_space<vmem>>, vector<32x576xbf16>
    %c0_1 = arith.constant 0 : index
    %c0_2 = arith.constant 0 : index
    %1 = vector.load %arg1[%c0_1, %c0_2] : memref<576x64xbf16, #tpu.memory_space<vmem>>, vector<576x64xbf16>
    %cst = arith.constant dense<0.000000e+00> : vector<32x64xf32>
    %2 = tpu.matmul %0, %1, %cst {dimension_numbers = #tpu.dot_dimension_numbers<[1], [0], [0], [1], [0, 0, 1, 1], [], []>} : vector<32x576xbf16>, vector<576x64xbf16>, vector<32x64xf32> -> vector<32x64xf32>
    %cst_3 = arith.constant dense<0.000000e+00> : vector<64xf32>
    %3 = vector.multi_reduction <add>, %2, %cst_3 [0] : vector<32x64xf32> to vector<64xf32>
    %4 = vector.shape_cast %3 : vector<64xf32> to vector<1x64xf32>
    %cst_4 = arith.constant 3.125000e-02 : f32
    %5 = vector.broadcast %cst_4 : f32 to vector<1x64xf32>
    %6 = arith.mulf %4, %5 : vector<1x64xf32>
    %7 = arith.mulf %2, %2 : vector<32x64xf32>
    %cst_5 = arith.constant dense<0.000000e+00> : vector<64xf32>
    %8 = vector.multi_reduction <add>, %7, %cst_5 [0] : vector<32x64xf32> to vector<64xf32>
    %9 = vector.shape_cast %8 : vector<64xf32> to vector<1x64xf32>
    %cst_6 = arith.constant 3.125000e-02 : f32
    %10 = vector.broadcast %cst_6 : f32 to vector<1x64xf32>
    %11 = arith.mulf %9, %10 : vector<1x64xf32>
    %12 = arith.mulf %6, %6 : vector<1x64xf32>
    %13 = arith.subf %11, %12 : vector<1x64xf32>
    %cst_7 = arith.constant 0.000000e+00 : f32
    %14 = vector.broadcast %cst_7 : f32 to vector<1x64xf32>
    %15 = arith.maximumf %13, %14 : vector<1x64xf32>
    %c0_8 = arith.constant 0 : index
    %c0_9 = arith.constant 0 : index
    %16 = vector.load %arg2[%c0_8, %c0_9] : memref<2x64xf32, #tpu.memory_space<vmem>>, vector<1x64xf32>
    %cst_10 = arith.constant 9.99999974E-6 : f32
    %17 = vector.broadcast %cst_10 : f32 to vector<1x64xf32>
    %18 = arith.addf %15, %17 : vector<1x64xf32>
    %19 = math.rsqrt %18 : vector<1x64xf32>
    %20 = arith.mulf %16, %19 : vector<1x64xf32>
    %c1 = arith.constant 1 : index
    %c0_11 = arith.constant 0 : index
    %21 = vector.load %arg2[%c1, %c0_11] : memref<2x64xf32, #tpu.memory_space<vmem>>, vector<1x64xf32>
    %22 = arith.mulf %6, %20 : vector<1x64xf32>
    %23 = arith.subf %21, %22 : vector<1x64xf32>
    %24 = vector.broadcast %20 : vector<1x64xf32> to vector<32x64xf32>
    %25 = arith.mulf %2, %24 : vector<32x64xf32>
    %26 = vector.broadcast %23 : vector<1x64xf32> to vector<32x64xf32>
    %27 = arith.addf %25, %26 : vector<32x64xf32>
    %cst_12 = arith.constant 0.000000e+00 : f32
    %28 = vector.broadcast %cst_12 : f32 to vector<32x64xf32>
    %29 = arith.maximumf %27, %28 : vector<32x64xf32>
    %c0_13 = arith.constant 0 : index
    %c0_14 = arith.constant 0 : index
    %30 = vector.load %arg4[%c0_13, %c0_14] : memref<1x512xf32, #tpu.memory_space<vmem>>, vector<1x512xf32>
    %31 = vector.shape_cast %30 : vector<1x512xf32> to vector<1x512xf32>
    %32 = vector.broadcast %31 : vector<1x512xf32> to vector<2x512xf32>
    %33 = vector.extract_strided_slice %29 {offsets = [0, 0], sizes = [2, 64], strides = [1, 1]} : vector<32x64xf32> to vector<2x64xf32>
    %34 = arith.truncf %33 : vector<2x64xf32> to vector<2x64xbf16>
    %c0_15 = arith.constant 0 : index
    %c0_16 = arith.constant 0 : index
    %c0_17 = arith.constant 0 : index
    %35 = vector.load %arg3[%c0_15, %c0_16, %c0_17] : memref<16x64x512xbf16, #tpu.memory_space<vmem>>, vector<1x64x512xbf16>
    %36 = vector.shape_cast %35 : vector<1x64x512xbf16> to vector<64x512xbf16>
    %cst_18 = arith.constant dense<0.000000e+00> : vector<2x512xf32>
    %37 = tpu.matmul %34, %36, %cst_18 {dimension_numbers = #tpu.dot_dimension_numbers<[1], [0], [0], [1], [0, 0, 1, 1], [], []>} : vector<2x64xbf16>, vector<64x512xbf16>, vector<2x512xf32> -> vector<2x512xf32>
    %38 = arith.addf %32, %37 : vector<2x512xf32>
    %39 = vector.extract_strided_slice %29 {offsets = [2, 0], sizes = [2, 64], strides = [1, 1]} : vector<32x64xf32> to vector<2x64xf32>
    %40 = arith.truncf %39 : vector<2x64xf32> to vector<2x64xbf16>
    %c1_19 = arith.constant 1 : index
    %c0_20 = arith.constant 0 : index
    %c0_21 = arith.constant 0 : index
    %41 = vector.load %arg3[%c1_19, %c0_20, %c0_21] : memref<16x64x512xbf16, #tpu.memory_space<vmem>>, vector<1x64x512xbf16>
    %42 = vector.shape_cast %41 : vector<1x64x512xbf16> to vector<64x512xbf16>
    %cst_22 = arith.constant dense<0.000000e+00> : vector<2x512xf32>
    %43 = tpu.matmul %40, %42, %cst_22 {dimension_numbers = #tpu.dot_dimension_numbers<[1], [0], [0], [1], [0, 0, 1, 1], [], []>} : vector<2x64xbf16>, vector<64x512xbf16>, vector<2x512xf32> -> vector<2x512xf32>
    %44 = arith.addf %38, %43 : vector<2x512xf32>
    %45 = vector.extract_strided_slice %29 {offsets = [4, 0], sizes = [2, 64], strides = [1, 1]} : vector<32x64xf32> to vector<2x64xf32>
    %46 = arith.truncf %45 : vector<2x64xf32> to vector<2x64xbf16>
    %c2 = arith.constant 2 : index
    %c0_23 = arith.constant 0 : index
    %c0_24 = arith.constant 0 : index
    %47 = vector.load %arg3[%c2, %c0_23, %c0_24] : memref<16x64x512xbf16, #tpu.memory_space<vmem>>, vector<1x64x512xbf16>
    %48 = vector.shape_cast %47 : vector<1x64x512xbf16> to vector<64x512xbf16>
    %cst_25 = arith.constant dense<0.000000e+00> : vector<2x512xf32>
    %49 = tpu.matmul %46, %48, %cst_25 {dimension_numbers = #tpu.dot_dimension_numbers<[1], [0], [0], [1], [0, 0, 1, 1], [], []>} : vector<2x64xbf16>, vector<64x512xbf16>, vector<2x512xf32> -> vector<2x512xf32>
    %50 = arith.addf %44, %49 : vector<2x512xf32>
    %51 = vector.extract_strided_slice %29 {offsets = [6, 0], sizes = [2, 64], strides = [1, 1]} : vector<32x64xf32> to vector<2x64xf32>
    %52 = arith.truncf %51 : vector<2x64xf32> to vector<2x64xbf16>
    %c3 = arith.constant 3 : index
    %c0_26 = arith.constant 0 : index
    %c0_27 = arith.constant 0 : index
    %53 = vector.load %arg3[%c3, %c0_26, %c0_27] : memref<16x64x512xbf16, #tpu.memory_space<vmem>>, vector<1x64x512xbf16>
    %54 = vector.shape_cast %53 : vector<1x64x512xbf16> to vector<64x512xbf16>
    %cst_28 = arith.constant dense<0.000000e+00> : vector<2x512xf32>
    %55 = tpu.matmul %52, %54, %cst_28 {dimension_numbers = #tpu.dot_dimension_numbers<[1], [0], [0], [1], [0, 0, 1, 1], [], []>} : vector<2x64xbf16>, vector<64x512xbf16>, vector<2x512xf32> -> vector<2x512xf32>
    %56 = arith.addf %50, %55 : vector<2x512xf32>
    %57 = vector.extract_strided_slice %29 {offsets = [8, 0], sizes = [2, 64], strides = [1, 1]} : vector<32x64xf32> to vector<2x64xf32>
    %58 = arith.truncf %57 : vector<2x64xf32> to vector<2x64xbf16>
    %c4 = arith.constant 4 : index
    %c0_29 = arith.constant 0 : index
    %c0_30 = arith.constant 0 : index
    %59 = vector.load %arg3[%c4, %c0_29, %c0_30] : memref<16x64x512xbf16, #tpu.memory_space<vmem>>, vector<1x64x512xbf16>
    %60 = vector.shape_cast %59 : vector<1x64x512xbf16> to vector<64x512xbf16>
    %cst_31 = arith.constant dense<0.000000e+00> : vector<2x512xf32>
    %61 = tpu.matmul %58, %60, %cst_31 {dimension_numbers = #tpu.dot_dimension_numbers<[1], [0], [0], [1], [0, 0, 1, 1], [], []>} : vector<2x64xbf16>, vector<64x512xbf16>, vector<2x512xf32> -> vector<2x512xf32>
    %62 = arith.addf %56, %61 : vector<2x512xf32>
    %63 = vector.extract_strided_slice %29 {offsets = [10, 0], sizes = [2, 64], strides = [1, 1]} : vector<32x64xf32> to vector<2x64xf32>
    %64 = arith.truncf %63 : vector<2x64xf32> to vector<2x64xbf16>
    %c5 = arith.constant 5 : index
    %c0_32 = arith.constant 0 : index
    %c0_33 = arith.constant 0 : index
    %65 = vector.load %arg3[%c5, %c0_32, %c0_33] : memref<16x64x512xbf16, #tpu.memory_space<vmem>>, vector<1x64x512xbf16>
    %66 = vector.shape_cast %65 : vector<1x64x512xbf16> to vector<64x512xbf16>
    %cst_34 = arith.constant dense<0.000000e+00> : vector<2x512xf32>
    %67 = tpu.matmul %64, %66, %cst_34 {dimension_numbers = #tpu.dot_dimension_numbers<[1], [0], [0], [1], [0, 0, 1, 1], [], []>} : vector<2x64xbf16>, vector<64x512xbf16>, vector<2x512xf32> -> vector<2x512xf32>
    %68 = arith.addf %62, %67 : vector<2x512xf32>
    %69 = vector.extract_strided_slice %29 {offsets = [12, 0], sizes = [2, 64], strides = [1, 1]} : vector<32x64xf32> to vector<2x64xf32>
    %70 = arith.truncf %69 : vector<2x64xf32> to vector<2x64xbf16>
    %c6 = arith.constant 6 : index
    %c0_35 = arith.constant 0 : index
    %c0_36 = arith.constant 0 : index
    %71 = vector.load %arg3[%c6, %c0_35, %c0_36] : memref<16x64x512xbf16, #tpu.memory_space<vmem>>, vector<1x64x512xbf16>
    %72 = vector.shape_cast %71 : vector<1x64x512xbf16> to vector<64x512xbf16>
    %cst_37 = arith.constant dense<0.000000e+00> : vector<2x512xf32>
    %73 = tpu.matmul %70, %72, %cst_37 {dimension_numbers = #tpu.dot_dimension_numbers<[1], [0], [0], [1], [0, 0, 1, 1], [], []>} : vector<2x64xbf16>, vector<64x512xbf16>, vector<2x512xf32> -> vector<2x512xf32>
    %74 = arith.addf %68, %73 : vector<2x512xf32>
    %75 = vector.extract_strided_slice %29 {offsets = [14, 0], sizes = [2, 64], strides = [1, 1]} : vector<32x64xf32> to vector<2x64xf32>
    %76 = arith.truncf %75 : vector<2x64xf32> to vector<2x64xbf16>
    %c7 = arith.constant 7 : index
    %c0_38 = arith.constant 0 : index
    %c0_39 = arith.constant 0 : index
    %77 = vector.load %arg3[%c7, %c0_38, %c0_39] : memref<16x64x512xbf16, #tpu.memory_space<vmem>>, vector<1x64x512xbf16>
    %78 = vector.shape_cast %77 : vector<1x64x512xbf16> to vector<64x512xbf16>
    %cst_40 = arith.constant dense<0.000000e+00> : vector<2x512xf32>
    %79 = tpu.matmul %76, %78, %cst_40 {dimension_numbers = #tpu.dot_dimension_numbers<[1], [0], [0], [1], [0, 0, 1, 1], [], []>} : vector<2x64xbf16>, vector<64x512xbf16>, vector<2x512xf32> -> vector<2x512xf32>
    %80 = arith.addf %74, %79 : vector<2x512xf32>
    %81 = vector.extract_strided_slice %29 {offsets = [16, 0], sizes = [2, 64], strides = [1, 1]} : vector<32x64xf32> to vector<2x64xf32>
    %82 = arith.truncf %81 : vector<2x64xf32> to vector<2x64xbf16>
    %c8 = arith.constant 8 : index
    %c0_41 = arith.constant 0 : index
    %c0_42 = arith.constant 0 : index
    %83 = vector.load %arg3[%c8, %c0_41, %c0_42] : memref<16x64x512xbf16, #tpu.memory_space<vmem>>, vector<1x64x512xbf16>
    %84 = vector.shape_cast %83 : vector<1x64x512xbf16> to vector<64x512xbf16>
    %cst_43 = arith.constant dense<0.000000e+00> : vector<2x512xf32>
    %85 = tpu.matmul %82, %84, %cst_43 {dimension_numbers = #tpu.dot_dimension_numbers<[1], [0], [0], [1], [0, 0, 1, 1], [], []>} : vector<2x64xbf16>, vector<64x512xbf16>, vector<2x512xf32> -> vector<2x512xf32>
    %86 = arith.addf %80, %85 : vector<2x512xf32>
    %87 = vector.extract_strided_slice %29 {offsets = [18, 0], sizes = [2, 64], strides = [1, 1]} : vector<32x64xf32> to vector<2x64xf32>
    %88 = arith.truncf %87 : vector<2x64xf32> to vector<2x64xbf16>
    %c9 = arith.constant 9 : index
    %c0_44 = arith.constant 0 : index
    %c0_45 = arith.constant 0 : index
    %89 = vector.load %arg3[%c9, %c0_44, %c0_45] : memref<16x64x512xbf16, #tpu.memory_space<vmem>>, vector<1x64x512xbf16>
    %90 = vector.shape_cast %89 : vector<1x64x512xbf16> to vector<64x512xbf16>
    %cst_46 = arith.constant dense<0.000000e+00> : vector<2x512xf32>
    %91 = tpu.matmul %88, %90, %cst_46 {dimension_numbers = #tpu.dot_dimension_numbers<[1], [0], [0], [1], [0, 0, 1, 1], [], []>} : vector<2x64xbf16>, vector<64x512xbf16>, vector<2x512xf32> -> vector<2x512xf32>
    %92 = arith.addf %86, %91 : vector<2x512xf32>
    %93 = vector.extract_strided_slice %29 {offsets = [20, 0], sizes = [2, 64], strides = [1, 1]} : vector<32x64xf32> to vector<2x64xf32>
    %94 = arith.truncf %93 : vector<2x64xf32> to vector<2x64xbf16>
    %c10 = arith.constant 10 : index
    %c0_47 = arith.constant 0 : index
    %c0_48 = arith.constant 0 : index
    %95 = vector.load %arg3[%c10, %c0_47, %c0_48] : memref<16x64x512xbf16, #tpu.memory_space<vmem>>, vector<1x64x512xbf16>
    %96 = vector.shape_cast %95 : vector<1x64x512xbf16> to vector<64x512xbf16>
    %cst_49 = arith.constant dense<0.000000e+00> : vector<2x512xf32>
    %97 = tpu.matmul %94, %96, %cst_49 {dimension_numbers = #tpu.dot_dimension_numbers<[1], [0], [0], [1], [0, 0, 1, 1], [], []>} : vector<2x64xbf16>, vector<64x512xbf16>, vector<2x512xf32> -> vector<2x512xf32>
    %98 = arith.addf %92, %97 : vector<2x512xf32>
    %99 = vector.extract_strided_slice %29 {offsets = [22, 0], sizes = [2, 64], strides = [1, 1]} : vector<32x64xf32> to vector<2x64xf32>
    %100 = arith.truncf %99 : vector<2x64xf32> to vector<2x64xbf16>
    %c11 = arith.constant 11 : index
    %c0_50 = arith.constant 0 : index
    %c0_51 = arith.constant 0 : index
    %101 = vector.load %arg3[%c11, %c0_50, %c0_51] : memref<16x64x512xbf16, #tpu.memory_space<vmem>>, vector<1x64x512xbf16>
    %102 = vector.shape_cast %101 : vector<1x64x512xbf16> to vector<64x512xbf16>
    %cst_52 = arith.constant dense<0.000000e+00> : vector<2x512xf32>
    %103 = tpu.matmul %100, %102, %cst_52 {dimension_numbers = #tpu.dot_dimension_numbers<[1], [0], [0], [1], [0, 0, 1, 1], [], []>} : vector<2x64xbf16>, vector<64x512xbf16>, vector<2x512xf32> -> vector<2x512xf32>
    %104 = arith.addf %98, %103 : vector<2x512xf32>
    %105 = vector.extract_strided_slice %29 {offsets = [24, 0], sizes = [2, 64], strides = [1, 1]} : vector<32x64xf32> to vector<2x64xf32>
    %106 = arith.truncf %105 : vector<2x64xf32> to vector<2x64xbf16>
    %c12 = arith.constant 12 : index
    %c0_53 = arith.constant 0 : index
    %c0_54 = arith.constant 0 : index
    %107 = vector.load %arg3[%c12, %c0_53, %c0_54] : memref<16x64x512xbf16, #tpu.memory_space<vmem>>, vector<1x64x512xbf16>
    %108 = vector.shape_cast %107 : vector<1x64x512xbf16> to vector<64x512xbf16>
    %cst_55 = arith.constant dense<0.000000e+00> : vector<2x512xf32>
    %109 = tpu.matmul %106, %108, %cst_55 {dimension_numbers = #tpu.dot_dimension_numbers<[1], [0], [0], [1], [0, 0, 1, 1], [], []>} : vector<2x64xbf16>, vector<64x512xbf16>, vector<2x512xf32> -> vector<2x512xf32>
    %110 = arith.addf %104, %109 : vector<2x512xf32>
    %111 = vector.extract_strided_slice %29 {offsets = [26, 0], sizes = [2, 64], strides = [1, 1]} : vector<32x64xf32> to vector<2x64xf32>
    %112 = arith.truncf %111 : vector<2x64xf32> to vector<2x64xbf16>
    %c13 = arith.constant 13 : index
    %c0_56 = arith.constant 0 : index
    %c0_57 = arith.constant 0 : index
    %113 = vector.load %arg3[%c13, %c0_56, %c0_57] : memref<16x64x512xbf16, #tpu.memory_space<vmem>>, vector<1x64x512xbf16>
    %114 = vector.shape_cast %113 : vector<1x64x512xbf16> to vector<64x512xbf16>
    %cst_58 = arith.constant dense<0.000000e+00> : vector<2x512xf32>
    %115 = tpu.matmul %112, %114, %cst_58 {dimension_numbers = #tpu.dot_dimension_numbers<[1], [0], [0], [1], [0, 0, 1, 1], [], []>} : vector<2x64xbf16>, vector<64x512xbf16>, vector<2x512xf32> -> vector<2x512xf32>
    %116 = arith.addf %110, %115 : vector<2x512xf32>
    %117 = vector.extract_strided_slice %29 {offsets = [28, 0], sizes = [2, 64], strides = [1, 1]} : vector<32x64xf32> to vector<2x64xf32>
    %118 = arith.truncf %117 : vector<2x64xf32> to vector<2x64xbf16>
    %c14 = arith.constant 14 : index
    %c0_59 = arith.constant 0 : index
    %c0_60 = arith.constant 0 : index
    %119 = vector.load %arg3[%c14, %c0_59, %c0_60] : memref<16x64x512xbf16, #tpu.memory_space<vmem>>, vector<1x64x512xbf16>
    %120 = vector.shape_cast %119 : vector<1x64x512xbf16> to vector<64x512xbf16>
    %cst_61 = arith.constant dense<0.000000e+00> : vector<2x512xf32>
    %121 = tpu.matmul %118, %120, %cst_61 {dimension_numbers = #tpu.dot_dimension_numbers<[1], [0], [0], [1], [0, 0, 1, 1], [], []>} : vector<2x64xbf16>, vector<64x512xbf16>, vector<2x512xf32> -> vector<2x512xf32>
    %122 = arith.addf %116, %121 : vector<2x512xf32>
    %123 = vector.extract_strided_slice %29 {offsets = [30, 0], sizes = [2, 64], strides = [1, 1]} : vector<32x64xf32> to vector<2x64xf32>
    %124 = arith.truncf %123 : vector<2x64xf32> to vector<2x64xbf16>
    %c15 = arith.constant 15 : index
    %c0_62 = arith.constant 0 : index
    %c0_63 = arith.constant 0 : index
    %125 = vector.load %arg3[%c15, %c0_62, %c0_63] : memref<16x64x512xbf16, #tpu.memory_space<vmem>>, vector<1x64x512xbf16>
    %126 = vector.shape_cast %125 : vector<1x64x512xbf16> to vector<64x512xbf16>
    %cst_64 = arith.constant dense<0.000000e+00> : vector<2x512xf32>
    %127 = tpu.matmul %124, %126, %cst_64 {dimension_numbers = #tpu.dot_dimension_numbers<[1], [0], [0], [1], [0, 0, 1, 1], [], []>} : vector<2x64xbf16>, vector<64x512xbf16>, vector<2x512xf32> -> vector<2x512xf32>
    %128 = arith.addf %122, %127 : vector<2x512xf32>
    %cst_65 = arith.constant 0.000000e+00 : f32
    %129 = vector.broadcast %cst_65 : f32 to vector<2x512xf32>
    %130 = arith.maximumf %128, %129 : vector<2x512xf32>
    %131 = arith.truncf %130 : vector<2x512xf32> to vector<2x512xbf16>
    %c0_66 = arith.constant 0 : index
    %c0_67 = arith.constant 0 : index
    %132 = vector.load %arg5[%c0_66, %c0_67] : memref<512x128xbf16, #tpu.memory_space<vmem>>, vector<512x128xbf16>
    %cst_68 = arith.constant dense<0.000000e+00> : vector<2x128xf32>
    %133 = tpu.matmul %131, %132, %cst_68 {dimension_numbers = #tpu.dot_dimension_numbers<[1], [0], [0], [1], [0, 0, 1, 1], [], []>} : vector<2x512xbf16>, vector<512x128xbf16>, vector<2x128xf32> -> vector<2x128xf32>
    %c0_69 = arith.constant 0 : index
    %c0_70 = arith.constant 0 : index
    %134 = vector.load %arg6[%c0_69, %c0_70] : memref<1x128xf32, #tpu.memory_space<vmem>>, vector<1x128xf32>
    %135 = vector.broadcast %134 : vector<1x128xf32> to vector<2x128xf32>
    %136 = arith.addf %133, %135 : vector<2x128xf32>
    %c0_71 = arith.constant 0 : index
    %c0_72 = arith.constant 0 : index
    %137 = vector.load %arg7[%c0_71, %c0_72] : memref<2x128xf32, #tpu.memory_space<vmem>>, vector<2x128xf32>
    tpu.vector_store %arg7[%c0_71, %c0_72], %136 {strides = array<i32>} : memref<2x128xf32, #tpu.memory_space<vmem>>, vector<2x128xf32>,
    return
  }
}

</mosaic_0001>

<bundles_post_ra>
// kernel: dqn_forward.3
= control target key start
LH: loop header
LB: loop body
LE: loop exit
PB: predicated region body
PF: predicated region fallthrough
CT: control target
= control target key end

     0   :  { %v1634_v0 = vmov 0   ;;  %vm671_vm0 = vcmask 261120   ;;  %vm1291_vm1 = vcmask 257024   ;;  %s2704_s1 = inlined_call_operand.vmem [shape: bf16[256,32], index: 1, kind: input, shape index: {}]   ;;  %s2705_s0 = inlined_call_operand.vmem [shape: bf16[392,256], index: 0, kind: input, shape index: {}]   ;;  %s2706_s2 = inlined_call_operand.vmem [shape: f32[2,32], index: 2, kind: input, shape index: {}]   ;;  %s2707_s3 = inlined_call_operand.vmem [shape: bf16[392,32], index: 3, kind: output, shape index: {}]  }
   0x1   :  { %439 = vmatprep.subr.bf16.mxu0 %v1634_v0  ;;  %v1542_v1 = vld [vmem:[%s2704_s1] sm:$0xff]   ;;  %1509 = vmatprep.subr.bf16.mxu1 %v1634_v0  ;;  %v1543_v2 = vld [vmem:[%s2704_s1 + $0x8] sm:$0xff]   ;;  %v1544_v3 = vld [vmem:[%s2704_s1 + $0x10] sm:$0xff]  }
   0x2   :  { %440 = vmatpush1.bf16.msra.mxu0 %v1542_v1  ;;  %1525 = vmatpush1.bf16.msra.mxu1 %v1542_v1  ;;  %v1545_v4 = vld [vmem:[%s2704_s1 + $0x18] sm:$0xff]   ;;  %v1546_v5 = vld [vmem:[%s2704_s1 + $0x20] sm:$0xff]   ;;  %v1547_v7 = vld [vmem:[%s2704_s1 + $0x28] sm:$0xff]  }
   0x3   :  { %441 = vmatprep.subr.bf16.mxu0 %v1634_v0  ;;  %1510 = vmatprep.subr.bf16.mxu1 %v1634_v0  ;;  %v1560_v6 = vld [vmem:[%s2705_s0 + $0x4] ss:$8 sps:$4 sm:$0xff]   ;;  %v1548_v8 = vld [vmem:[%s2704_s1 + $0x30] sm:$0xff]   ;;  %v1549_v9 = vld [vmem:[%s2704_s1 + $0x38] sm:$0xff]  }
   0x4   :  { %471 = vmatprep.mubr.bf16.mxu0 %v1560_v6  ;;  %v1581_v10 = vld [vmem:[%s2705_s0 + $0xd4] ss:$8 sps:$4 sm:$0xff]   ;;  %v1550_v11 = vld [vmem:[%s2704_s1 + $0x40] sm:$0xff]   ;;  %v1551_v12 = vld [vmem:[%s2704_s1 + $0x48] sm:$0xff]  }
   0x5   :  { %575 = vmatprep.mubr.bf16.mxu1 %v1581_v10  ;;  %v1552_v13 = vld [vmem:[%s2704_s1 + $0x50] sm:$0xff]   ;;  %v1553_v14 = vld [vmem:[%s2704_s1 + $0x58] sm:$0xff]   ;;  %v1554_v15 = vld [vmem:[%s2704_s1 + $0x60] sm:$0xff]  }
   0x6   :  { %442 = vmatpush1.bf16.msra.mxu0 %v1543_v2  ;;  %1526 = vmatpush1.bf16.msra.mxu1 %v1543_v2  ;;  %v1555_v16 = vld [vmem:[%s2704_s1 + $0x68] sm:$0xff]   ;;  %v1556_v17 = vld [vmem:[%s2704_s1 + $0x70] sm:$0xff]   ;;  %v1557_v18 = vld [vmem:[%s2704_s1 + $0x78] sm:$0xff]  }
   0x7   :  { %443 = vmatprep.subr.bf16.mxu0 %v1634_v0  ;;  %1511 = vmatprep.subr.bf16.mxu1 %v1634_v0  ;;  %v1558_v19 = vld [vmem:[%s2705_s0] ss:$8 sps:$4 sm:$0xff]   ;;  %v1579_v20 = vld [vmem:[%s2705_s0 + $0xd0] ss:$8 sps:$4 sm:$0xff]   ;;  %v1561_v21 = vld [vmem:[%s2705_s0 + $0x14] ss:$8 sps:$4 sm:$0xff]  }
   0x8   :  { %v1585_v22 = vld [vmem:[%s2705_s0 + $0xe4] ss:$8 sps:$4 sm:$0xff]   ;;  %v1563_v23 = vld [vmem:[%s2705_s0 + $0x10] ss:$8 sps:$4 sm:$0xff]   ;;  %v1587_v24 = vld [vmem:[%s2705_s0 + $0xe0] ss:$8 sps:$4 sm:$0xff]  }
   0x9   :  { %v1564_v25 = vld [vmem:[%s2705_s0 + $0x24] ss:$8 sps:$4 sm:$0xff]   ;;  %v1591_v26 = vld [vmem:[%s2705_s0 + $0xf4] ss:$8 sps:$4 sm:$0xff]   ;;  %v1566_v27 = vld [vmem:[%s2705_s0 + $0x20] ss:$8 sps:$4 sm:$0xff]  }
   0xa   :  { %444 = vmatpush1.bf16.msra.mxu0 %v1544_v3  ;;  %1527 = vmatpush1.bf16.msra.mxu1 %v1544_v3  ;;  %v1593_v28 = vld [vmem:[%s2705_s0 + $0xf0] ss:$8 sps:$4 sm:$0xff]   ;;  %v1567_v29 = vld [vmem:[%s2705_s0 + $0x34] ss:$8 sps:$4 sm:$0xff]   ;;  %v1597_v30 = vld [vmem:[%s2705_s0 + $0x104] ss:$8 sps:$4 sm:$0xff]  }
   0xb   :  { %445 = vmatprep.subr.bf16.mxu0 %v1634_v0  ;;  %1512 = vmatprep.subr.bf16.mxu1 %v1634_v0  ;;  %v1569_v31 = vld [vmem:[%s2705_s0 + $0x30] ss:$8 sps:$4 sm:$0xff]   ;;  %v1599_v32 = vld [vmem:[%s2705_s0 + $0x100] ss:$8 sps:$4 sm:$0xff]   ;;  %v1570_v33 = vld [vmem:[%s2705_s0 + $0x44] ss:$8 sps:$4 sm:$0xff]  }
   0xc   :  { %v1603_v34 = vld [vmem:[%s2705_s0 + $0x114] ss:$8 sps:$4 sm:$0xff]   ;;  %v1572_v35 = vld [vmem:[%s2705_s0 + $0x40] ss:$8 sps:$4 sm:$0xff]   ;;  %v1605_v36 = vld [vmem:[%s2705_s0 + $0x110] ss:$8 sps:$4 sm:$0xff]  }
   0xd   :  { %v1573_v37 = vld [vmem:[%s2705_s0 + $0x54] ss:$8 sps:$4 sm:$0xff]   ;;  %v1609_v38 = vld [vmem:[%s2705_s0 + $0x124] ss:$8 sps:$4 sm:$0xff]   ;;  %v1575_v39 = vld [vmem:[%s2705_s0 + $0x50] ss:$8 sps:$4 sm:$0xff]  }
   0xe   :  { %446 = vmatpush1.bf16.msra.mxu0 %v1545_v4  ;;  %1528 = vmatpush1.bf16.msra.mxu1 %v1545_v4  ;;  %v1611_v40 = vld [vmem:[%s2705_s0 + $0x120] ss:$8 sps:$4 sm:$0xff]   ;;  %v1576_v41 = vld [vmem:[%s2705_s0 + $0x64] ss:$8 sps:$4 sm:$0xff]   ;;  %v1615_v42 = vld [vmem:[%s2705_s0 + $0x134] ss:$8 sps:$4 sm:$0xff]  }
   0xf   :  { %447 = vmatprep.subr.bf16.mxu0 %v1634_v0  ;;  %1513 = vmatprep.subr.bf16.mxu1 %v1634_v0  ;;  %v1578_v43 = vld [vmem:[%s2705_s0 + $0x60] ss:$8 sps:$4 sm:$0xff]   ;;  %v1617_v44 = vld [vmem:[%s2705_s0 + $0x130] ss:$8 sps:$4 sm:$0xff]   ;;  %v1582_v45 = vld [vmem:[%s2705_s0 + $0x74] ss:$8 sps:$4 sm:$0xff]  }
  0x10   :  { %v1618_v46 = vld [vmem:[%s2705_s0 + $0x144] ss:$8 sps:$4 sm:$0xff]   ;;  %v1584_v47 = vld [vmem:[%s2705_s0 + $0x70] ss:$8 sps:$4 sm:$0xff]   ;;  %v1620_v48 = vld [vmem:[%s2705_s0 + $0x140] ss:$8 sps:$4 sm:$0xff]  }
  0x11   :  { %v1588_v49 = vld [vmem:[%s2705_s0 + $0x84] ss:$8 sps:$4 sm:$0xff]   ;;  %v1621_v50 = vld [vmem:[%s2705_s0 + $0x154] ss:$8 sps:$4 sm:$0xff]   ;;  %v1590_v51 = vld [vmem:[%s2705_s0 + $0x80] ss:$8 sps:$4 sm:$0xff]  }
  0x12   :  { %448 = vmatpush1.bf16.msra.mxu0 %v1546_v5  ;;  %1529 = vmatpush1.bf16.msra.mxu1 %v1546_v5  ;;  %v1623_v52 = vld [vmem:[%s2705_s0 + $0x150] ss:$8 sps:$4 sm:$0xff]   ;;  %v1594_v53 = vld [vmem:[%s2705_s0 + $0x94] ss:$8 sps:$4 sm:$0xff]   ;;  %v1624_v54 = vld [vmem:[%s2705_s0 + $0x164] ss:$8 sps:$4 sm:$0xff]  }
  0x13   :  { %449 = vmatprep.subr.bf16.mxu0 %v1634_v0  ;;  %1514 = vmatprep.subr.bf16.mxu1 %v1634_v0  ;;  %v1596_v55 = vld [vmem:[%s2705_s0 + $0x90] ss:$8 sps:$4 sm:$0xff]   ;;  %v1626_v56 = vld [vmem:[%s2705_s0 + $0x160] ss:$8 sps:$4 sm:$0xff]   ;;  %v1600_v57 = vld [vmem:[%s2705_s0 + $0xa4] ss:$8 sps:$4 sm:$0xff]  }
  0x14   :  { %v1627_v58 = vld [vmem:[%s2705_s0 + $0x174] ss:$8 sps:$4 sm:$0xff]   ;;  %v63_v59 = vld [vmem:[%s2705_s0 + $0x180] sm:$0xff]  ;;  %v1629_v61 = vld [vmem:[%s2705_s0 + $0x170] ss:$8 sps:$4 sm:$0xff]  }
  0x15   :  { %v1602_v60 = vld [vmem:[%s2705_s0 + $0xa0] ss:$8 sps:$4 sm:$0xff]   ;;  %v1606_v62 = vld [vmem:[%s2705_s0 + $0xb4] ss:$8 sps:$4 sm:$0xff]   ;;  %v1394_v63 = vcombine.high %v63_v59, %v63_v59  ;;  %v1393_v1 = vcombine.low %v63_v59, %v63_v59  ;;  %v1612_v2 = vld [vmem:[%s2705_s0 + $0xc4] ss:$8 sps:$4 sm:$0xff]  }
  0x16   :  { %450 = vmatpush1.bf16.msra.mxu0 %v1547_v7  ;;  %1530 = vmatpush1.bf16.msra.mxu1 %v1547_v7  ;;  %v1614_v3 = vld [vmem:[%s2705_s0 + $0xc0] ss:$8 sps:$4 sm:$0xff]  }
  0x17   :  { %451 = vmatprep.subr.bf16.mxu0 %v1634_v0  ;;  %1515 = vmatprep.subr.bf16.mxu1 %v1634_v0 }
  0x1a   :  { %452 = vmatpush1.bf16.msra.mxu0 %v1548_v8  ;;  %1531 = vmatpush1.bf16.msra.mxu1 %v1548_v8 }
  0x1b   :  { %453 = vmatprep.subr.bf16.mxu0 %v1634_v0  ;;  %1516 = vmatprep.subr.bf16.mxu1 %v1634_v0 }
  0x1e   :  { %454 = vmatpush1.bf16.msra.mxu0 %v1549_v9  ;;  %1532 = vmatpush1.bf16.msra.mxu1 %v1549_v9 }
  0x1f   :  { %455 = vmatprep.subr.bf16.mxu0 %v1634_v0  ;;  %1517 = vmatprep.subr.bf16.mxu1 %v1634_v0 }
  0x22   :  { %456 = vmatpush1.bf16.msra.mxu0 %v1550_v11  ;;  %1533 = vmatpush1.bf16.msra.mxu1 %v1550_v11 }
  0x23   :  { %457 = vmatprep.subr.bf16.mxu0 %v1634_v0  ;;  %1518 = vmatprep.subr.bf16.mxu1 %v1634_v0 }
  0x26   :  { %458 = vmatpush1.bf16.msra.mxu0 %v1551_v12  ;;  %1534 = vmatpush1.bf16.msra.mxu1 %v1551_v12 }
  0x27   :  { %459 = vmatprep.subr.bf16.mxu0 %v1634_v0  ;;  %1519 = vmatprep.subr.bf16.mxu1 %v1634_v0 }
  0x2a   :  { %460 = vmatpush1.bf16.msra.mxu0 %v1552_v13  ;;  %1535 = vmatpush1.bf16.msra.mxu1 %v1552_v13 }
  0x2b   :  { %461 = vmatprep.subr.bf16.mxu0 %v1634_v0  ;;  %1520 = vmatprep.subr.bf16.mxu1 %v1634_v0 }
  0x2e   :  { %462 = vmatpush1.bf16.msra.mxu0 %v1553_v14  ;;  %1536 = vmatpush1.bf16.msra.mxu1 %v1553_v14 }
  0x2f   :  { %463 = vmatprep.subr.bf16.mxu0 %v1634_v0  ;;  %1521 = vmatprep.subr.bf16.mxu1 %v1634_v0 }
  0x32   :  { %464 = vmatpush1.bf16.msra.mxu0 %v1554_v15  ;;  %1537 = vmatpush1.bf16.msra.mxu1 %v1554_v15 }
  0x33   :  { %465 = vmatprep.subr.bf16.mxu0 %v1634_v0  ;;  %1522 = vmatprep.subr.bf16.mxu1 %v1634_v0 }
  0x36   :  { %466 = vmatpush1.bf16.msra.mxu0 %v1555_v16  ;;  %1538 = vmatpush1.bf16.msra.mxu1 %v1555_v16 }
  0x37   :  { %467 = vmatprep.subr.bf16.mxu0 %v1634_v0  ;;  %1523 = vmatprep.subr.bf16.mxu1 %v1634_v0 }
  0x3a   :  { %468 = vmatpush1.bf16.msra.mxu0 %v1556_v17  ;;  %1539 = vmatpush1.bf16.msra.mxu1 %v1556_v17 }
  0x3b   :  { %469 = vmatprep.subr.bf16.mxu0 %v1634_v0  ;;  %1524 = vmatprep.subr.bf16.mxu1 %v1634_v0  ;;  %v1608_v0 = vld [vmem:[%s2705_s0 + $0xb0] ss:$8 sps:$4 sm:$0xff]  }
  0x3e   :  { %470 = vmatpush1.bf16.msra.mxu0 %v1557_v18  ;;  %1540 = vmatpush1.bf16.msra.mxu1 %v1557_v18 }
  0x41   :  { %472 = vmatmul.mubr.bf16.vlgmr.msra.gmra.mrb[0].mxu0 %v1558_v19  ;;  %576 = vmatmul.mubr.bf16.vlgmr.msra.gmra.mrb[0].mxu1 %v1579_v20 }
  0x42   :  { %479 = vmatprep.mubr.bf16.mxu0 %v1561_v21  ;;  %583 = vmatprep.mubr.bf16.mxu1 %v1585_v22 }
  0x49   :  { %480 = vmatmul.mubr.bf16.gmra.mrb[4].mxu0 %v1563_v23  ;;  %584 = vmatmul.mubr.bf16.gmra.mrb[4].mxu1 %v1587_v24 }
  0x4a   :  { %487 = vmatprep.mubr.bf16.mxu0 %v1564_v25  ;;  %591 = vmatprep.mubr.bf16.mxu1 %v1591_v26 }
  0x51   :  { %488 = vmatmul.mubr.bf16.gmra.mrb[8].mxu0 %v1566_v27  ;;  %592 = vmatmul.mubr.bf16.gmra.mrb[8].mxu1 %v1593_v28 }
  0x52   :  { %495 = vmatprep.mubr.bf16.mxu0 %v1567_v29  ;;  %599 = vmatprep.mubr.bf16.mxu1 %v1597_v30 }
  0x59   :  { %496 = vmatmul.mubr.bf16.gmra.mrb[12].mxu0 %v1569_v31  ;;  %600 = vmatmul.mubr.bf16.gmra.mrb[12].mxu1 %v1599_v32 }
  0x5a   :  { %503 = vmatprep.mubr.bf16.mxu0 %v1570_v33  ;;  %607 = vmatprep.mubr.bf16.mxu1 %v1603_v34 }
  0x61   :  { %504 = vmatmul.mubr.bf16.gmra.mrb[16].mxu0 %v1572_v35  ;;  %608 = vmatmul.mubr.bf16.gmra.mrb[16].mxu1 %v1605_v36 }
  0x62   :  { %511 = vmatprep.mubr.bf16.mxu0 %v1573_v37  ;;  %615 = vmatprep.mubr.bf16.mxu1 %v1609_v38 }
  0x69   :  { %512 = vmatmul.mubr.bf16.gmra.mrb[20].mxu0 %v1575_v39  ;;  %616 = vmatmul.mubr.bf16.gmra.mrb[20].mxu1 %v1611_v40 }
  0x6a   :  { %519 = vmatprep.mubr.bf16.mxu0 %v1576_v41  ;;  %623 = vmatprep.mubr.bf16.mxu1 %v1615_v42 }
  0x71   :  { %520 = vmatmul.mubr.bf16.gmra.mrb[24].mxu0 %v1578_v43  ;;  %624 = vmatmul.mubr.bf16.gmra.mrb[24].mxu1 %v1617_v44 }
  0x72   :  { %527 = vmatprep.mubr.bf16.mxu0 %v1582_v45  ;;  %631 = vmatprep.mubr.bf16.mxu1 %v1618_v46 }
  0x79   :  { %528 = vmatmul.mubr.bf16.gmra.mrb[28].mxu0 %v1584_v47  ;;  %632 = vmatmul.mubr.bf16.gmra.mrb[28].mxu1 %v1620_v48 }
  0x7a   :  { %535 = vmatprep.mubr.bf16.mxu0 %v1588_v49  ;;  %639 = vmatprep.mubr.bf16.mxu1 %v1621_v50 }
  0x81   :  { %536 = vmatmul.mubr.bf16.gmra.mrb[32].mxu0 %v1590_v51  ;;  %640 = vmatmul.mubr.bf16.gmra.mrb[32].mxu1 %v1623_v52 }
  0x82   :  { %543 = vmatprep.mubr.bf16.mxu0 %v1594_v53  ;;  %647 = vmatprep.mubr.bf16.mxu1 %v1624_v54 }
  0x89   :  { %544 = vmatmul.mubr.bf16.gmra.mrb[36].mxu0 %v1596_v55  ;;  %648 = vmatmul.mubr.bf16.gmra.mrb[36].mxu1 %v1626_v56 }
  0x8a   :  { %551 = vmatprep.mubr.bf16.mxu0 %v1600_v57  ;;  %655 = vmatprep.mubr.bf16.mxu1 %v1627_v58 }
  0x91   :  { %552 = vmatmul.mubr.bf16.gmra.mrb[40].mxu0 %v1602_v60  ;;  %656 = vmatmul.mubr.bf16.gmra.mrb[40].mxu1 %v1629_v61 }
  0x92   :  { %559 = vmatprep.mubr.bf16.mxu0 %v1606_v62  ;;  %663 = vmatprep.mubr.bf16.mxu1 %v1394_v63 }
  0x99   :  { %560 = vmatmul.mubr.bf16.gmra.mrb[44].mxu0 %v1608_v0  ;;  %664 = vmatmul.mubr.bf16.gmra.mrb[44].mxu1 %v1393_v1 }
  0x9a   :  { %567 = vmatprep.mubr.bf16.mxu0 %v1612_v2 }
  0xa1   :  { %568 = vmatmul.mubr.bf16.gmra.mrb[48].mxu0 %v1614_v3 }
 0x114   :  { %v1882_v4 = vpop.f32.mrb[0].mxu0  ;;  %v1884_v5 = vpop.f32.mrb[0].mxu1 }
 0x115   :  { %v776_v6 = vmul.f32 %v1882_v4, %v1882_v4  ;;  %v475_v7 = vpop.f32.mrb[1].mxu0  ;;  %v579_v8 = vpop.f32.mrb[1].mxu1  ;;  %v672_v11 = vsel %vm671_vm0, %v1882_v4, 0.0 }
 0x116   :  { %v1888_v9 = vpop.f32.mrb[2].mxu0  ;;  %v1890_v10 = vpop.f32.mrb[2].mxu1 }
 0x117   :  { %v673_v12 = vsel %vm671_vm0, %v1888_v9, 0.0  ;;  %v777_v13 = vmul.f32 %v1888_v9, %v1888_v9  ;;  %v478_v14 = vpop.f32.mrb[3].mxu0  ;;  %v582_v15 = vpop.f32.mrb[3].mxu1  ;;  %v825_v17 = vsel %vm671_vm0, %v776_v6, 0.0 }
 0x118   :  { %v674_v16 = vadd.f32 %v673_v12, %v672_v11 }
 0x119   :  { %v826_v18 = vsel %vm671_vm0, %v777_v13, 0.0 }
 0x11a   :  { %v827_v19 = vadd.f32 %v826_v18, %v825_v17 }
 0x11c   :  { %v1900_v20 = vpop.f32.mrb[4].mxu0  ;;  %v1902_v21 = vpop.f32.mrb[4].mxu1 }
 0x11d   :  { %v675_v22 = vsel %vm671_vm0, %v1900_v20, 0.0  ;;  %v778_v23 = vmul.f32 %v1900_v20, %v1900_v20  ;;  %v483_v24 = vpop.f32.mrb[5].mxu0  ;;  %v587_v25 = vpop.f32.mrb[5].mxu1 }
 0x11e   :  { %v676_v26 = vadd.f32 %v675_v22, %v674_v16  ;;  %v1908_v27 = vpop.f32.mrb[6].mxu0  ;;  %v1910_v28 = vpop.f32.mrb[6].mxu1 }
 0x11f   :  { %v828_v29 = vsel %vm671_vm0, %v778_v23, 0.0  ;;  %v677_v30 = vsel %vm671_vm0, %v1908_v27, 0.0  ;;  %v779_v31 = vmul.f32 %v1908_v27, %v1908_v27  ;;  %v486_v32 = vpop.f32.mrb[7].mxu0  ;;  %v590_v33 = vpop.f32.mrb[7].mxu1 }
 0x120   :  { %v829_v34 = vadd.f32 %v828_v29, %v827_v19  ;;  %v678_v35 = vadd.f32 %v677_v30, %v676_v26 }
 0x121   :  { %v830_v36 = vsel %vm671_vm0, %v779_v31, 0.0 }
 0x122   :  { %v831_v37 = vadd.f32 %v830_v36, %v829_v34 }
 0x124   :  { %v1918_v38 = vpop.f32.mrb[8].mxu0  ;;  %v1920_v39 = vpop.f32.mrb[8].mxu1 }
 0x125   :  { %v679_v40 = vsel %vm671_vm0, %v1918_v38, 0.0  ;;  %v780_v41 = vmul.f32 %v1918_v38, %v1918_v38  ;;  %v491_v42 = vpop.f32.mrb[9].mxu0  ;;  %v595_v43 = vpop.f32.mrb[9].mxu1 }
 0x126   :  { %v680_v44 = vadd.f32 %v679_v40, %v678_v35  ;;  %v1926_v45 = vpop.f32.mrb[10].mxu0  ;;  %v1928_v46 = vpop.f32.mrb[10].mxu1 }
 0x127   :  { %v832_v47 = vsel %vm671_vm0, %v780_v41, 0.0  ;;  %v681_v48 = vsel %vm671_vm0, %v1926_v45, 0.0  ;;  %v781_v49 = vmul.f32 %v1926_v45, %v1926_v45  ;;  %v494_v50 = vpop.f32.mrb[11].mxu0  ;;  %v598_v51 = vpop.f32.mrb[11].mxu1 }
 0x128   :  { %v833_v52 = vadd.f32 %v832_v47, %v831_v37  ;;  %v682_v53 = vadd.f32 %v681_v48, %v680_v44 }
 0x129   :  { %v834_v54 = vsel %vm671_vm0, %v781_v49, 0.0 }
 0x12a   :  { %v835_v55 = vadd.f32 %v834_v54, %v833_v52 }
 0x12c   :  { %v1936_v56 = vpop.f32.mrb[12].mxu0  ;;  %v1938_v57 = vpop.f32.mrb[12].mxu1 }
 0x12d   :  { %v683_v58 = vsel %vm671_vm0, %v1936_v56, 0.0  ;;  %v782_v59 = vmul.f32 %v1936_v56, %v1936_v56  ;;  %v499_v60 = vpop.f32.mrb[13].mxu0  ;;  %v603_v61 = vpop.f32.mrb[13].mxu1 }
 0x12e   :  { %v684_v62 = vadd.f32 %v683_v58, %v682_v53  ;;  %v1944_v63 = vpop.f32.mrb[14].mxu0  ;;  %v1946_v0 = vpop.f32.mrb[14].mxu1 }
 0x12f   :  { %v836_v1 = vsel %vm671_vm0, %v782_v59, 0.0  ;;  %v685_v2 = vsel %vm671_vm0, %v1944_v63, 0.0  ;;  %v783_v3 = vmul.f32 %v1944_v63, %v1944_v63  ;;  %v502_v6 = vpop.f32.mrb[15].mxu0  ;;  %v606_v7 = vpop.f32.mrb[15].mxu1 }
 0x130   :  { %v837_v8 = vadd.f32 %v836_v1, %v835_v55  ;;  %v686_v11 = vadd.f32 %v685_v2, %v684_v62 }
 0x131   :  { %v838_v12 = vsel %vm671_vm0, %v783_v3, 0.0 }
 0x132   :  { %v839_v13 = vadd.f32 %v838_v12, %v837_v8 }
 0x134   :  { %v1954_v14 = vpop.f32.mrb[16].mxu0  ;;  %v1956_v15 = vpop.f32.mrb[16].mxu1 }
 0x135   :  { %v687_v16 = vsel %vm671_vm0, %v1954_v14, 0.0  ;;  %v784_v17 = vmul.f32 %v1954_v14, %v1954_v14  ;;  %v507_v18 = vpop.f32.mrb[17].mxu0  ;;  %v611_v19 = vpop.f32.mrb[17].mxu1 }
 0x136   :  { %v688_v22 = vadd.f32 %v687_v16, %v686_v11  ;;  %v1962_v23 = vpop.f32.mrb[18].mxu0  ;;  %v1964_v24 = vpop.f32.mrb[18].mxu1 }
 0x137   :  { %v840_v25 = vsel %vm671_vm0, %v784_v17, 0.0  ;;  %v689_v26 = vsel %vm671_vm0, %v1962_v23, 0.0  ;;  %v785_v29 = vmul.f32 %v1962_v23, %v1962_v23  ;;  %v510_v30 = vpop.f32.mrb[19].mxu0  ;;  %v614_v31 = vpop.f32.mrb[19].mxu1 }
 0x138   :  { %v841_v32 = vadd.f32 %v840_v25, %v839_v13  ;;  %v690_v33 = vadd.f32 %v689_v26, %v688_v22 }
 0x139   :  { %v842_v34 = vsel %vm671_vm0, %v785_v29, 0.0 }
 0x13a   :  { %v843_v35 = vadd.f32 %v842_v34, %v841_v32 }
 0x13c   :  { %v1972_v36 = vpop.f32.mrb[20].mxu0  ;;  %v1974_v37 = vpop.f32.mrb[20].mxu1 }
 0x13d   :  { %v691_v40 = vsel %vm671_vm0, %v1972_v36, 0.0  ;;  %v786_v41 = vmul.f32 %v1972_v36, %v1972_v36  ;;  %v515_v42 = vpop.f32.mrb[21].mxu0  ;;  %v619_v43 = vpop.f32.mrb[21].mxu1 }
 0x13e   :  { %v692_v44 = vadd.f32 %v691_v40, %v690_v33  ;;  %v1980_v47 = vpop.f32.mrb[22].mxu0  ;;  %v1982_v48 = vpop.f32.mrb[22].mxu1 }
 0x13f   :  { %v844_v49 = vsel %vm671_vm0, %v786_v41, 0.0  ;;  %v693_v50 = vsel %vm671_vm0, %v1980_v47, 0.0  ;;  %v787_v51 = vmul.f32 %v1980_v47, %v1980_v47  ;;  %v518_v52 = vpop.f32.mrb[23].mxu0  ;;  %v622_v53 = vpop.f32.mrb[23].mxu1 }
 0x140   :  { %v845_v54 = vadd.f32 %v844_v49, %v843_v35  ;;  %v694_v55 = vadd.f32 %v693_v50, %v692_v44 }
 0x141   :  { %v846_v58 = vsel %vm671_vm0, %v787_v51, 0.0 }
 0x142   :  { %v847_v59 = vadd.f32 %v846_v58, %v845_v54 }
 0x144   :  { %v1990_v60 = vpop.f32.mrb[24].mxu0  ;;  %v1992_v61 = vpop.f32.mrb[24].mxu1 }
 0x145   :  { %v695_v62 = vsel %vm671_vm0, %v1990_v60, 0.0  ;;  %v788_v1 = vmul.f32 %v1990_v60, %v1990_v60  ;;  %v523_v2 = vpop.f32.mrb[25].mxu0  ;;  %v627_v3 = vpop.f32.mrb[25].mxu1 }
 0x146   :  { %v696_v6 = vadd.f32 %v695_v62, %v694_v55  ;;  %v1998_v7 = vpop.f32.mrb[26].mxu0  ;;  %v2000_v8 = vpop.f32.mrb[26].mxu1 }
 0x147   :  { %v848_v11 = vsel %vm671_vm0, %v788_v1, 0.0  ;;  %v697_v12 = vsel %vm671_vm0, %v1998_v7, 0.0  ;;  %v789_v13 = vmul.f32 %v1998_v7, %v1998_v7  ;;  %v526_v16 = vpop.f32.mrb[27].mxu0  ;;  %v630_v17 = vpop.f32.mrb[27].mxu1 }
 0x148   :  { %v849_v18 = vadd.f32 %v848_v11, %v847_v59  ;;  %v698_v19 = vadd.f32 %v697_v12, %v696_v6 }
 0x149   :  { %v850_v22 = vsel %vm671_vm0, %v789_v13, 0.0 }
 0x14a   :  { %v851_v25 = vadd.f32 %v850_v22, %v849_v18 }
 0x14c   :  { %v2008_v26 = vpop.f32.mrb[28].mxu0  ;;  %v2010_v29 = vpop.f32.mrb[28].mxu1 }
 0x14d   :  { %2718 = vst [vmem:[#allocation2_spill] sm:$0xff] %v2010_v29  ;;  %v699_v30 = vsel %vm671_vm0, %v2008_v26, 0.0  ;;  %v790_v31 = vmul.f32 %v2008_v26, %v2008_v26  ;;  %v531_v32 = vpop.f32.mrb[29].mxu0  ;;  %v635_v33 = vpop.f32.mrb[29].mxu1 }
 0x14e   :  { %v700_v34 = vadd.f32 %v699_v30, %v698_v19  ;;  %v2016_v35 = vpop.f32.mrb[30].mxu0  ;;  %v2018_v40 = vpop.f32.mrb[30].mxu1 }
 0x14f   :  { %2719 = vst [vmem:[#allocation3_spill] sm:$0xff] %v2018_v40  ;;  %v852_v41 = vsel %vm671_vm0, %v790_v31, 0.0  ;;  %v701_v42 = vsel %vm671_vm0, %v2016_v35, 0.0  ;;  %v791_v43 = vmul.f32 %v2016_v35, %v2016_v35  ;;  %v534_v44 = vpop.f32.mrb[31].mxu0  ;;  %v638_v49 = vpop.f32.mrb[31].mxu1 }
 0x150   :  { %v853_v50 = vadd.f32 %v852_v41, %v851_v25  ;;  %v702_v51 = vadd.f32 %v701_v42, %v700_v34 }
 0x151   :  { %v854_v52 = vsel %vm671_vm0, %v791_v43, 0.0 }
 0x152   :  { %v855_v53 = vadd.f32 %v854_v52, %v853_v50 }
 0x154   :  { %v2026_v54 = vpop.f32.mrb[32].mxu0  ;;  %v2028_v55 = vpop.f32.mrb[32].mxu1 }
 0x155   :  { %2720 = vst [vmem:[#allocation4_spill] sm:$0xff] %v2028_v55  ;;  %v703_v58 = vsel %vm671_vm0, %v2026_v54, 0.0  ;;  %v792_v59 = vmul.f32 %v2026_v54, %v2026_v54  ;;  %v539_v62 = vpop.f32.mrb[33].mxu0  ;;  %v643_v1 = vpop.f32.mrb[33].mxu1 }
 0x156   :  { %v704_v2 = vadd.f32 %v703_v58, %v702_v51  ;;  %v2034_v3 = vpop.f32.mrb[34].mxu0  ;;  %v2036_v6 = vpop.f32.mrb[34].mxu1 }
 0x157   :  { %2721 = vst [vmem:[#allocation5_spill] sm:$0xff] %v2036_v6  ;;  %v856_v11 = vsel %vm671_vm0, %v792_v59, 0.0  ;;  %v705_v12 = vsel %vm671_vm0, %v2034_v3, 0.0  ;;  %v793_v13 = vmul.f32 %v2034_v3, %v2034_v3  ;;  %v542_v16 = vpop.f32.mrb[35].mxu0  ;;  %v646_v17 = vpop.f32.mrb[35].mxu1 }
 0x158   :  { %v857_v18 = vadd.f32 %v856_v11, %v855_v53  ;;  %v706_v19 = vadd.f32 %v705_v12, %v704_v2 }
 0x159   :  { %v858_v22 = vsel %vm671_vm0, %v793_v13, 0.0 }
 0x15a   :  { %v859_v25 = vadd.f32 %v858_v22, %v857_v18 }
 0x15c   :  { %v2044_v30 = vpop.f32.mrb[36].mxu0  ;;  %v2046_v31 = vpop.f32.mrb[36].mxu1 }
 0x15d   :  { %2722 = vst [vmem:[#allocation6_spill] sm:$0xff] %v2046_v31  ;;  %v707_v32 = vsel %vm671_vm0, %v2044_v30, 0.0  ;;  %v794_v33 = vmul.f32 %v2044_v30, %v2044_v30  ;;  %v547_v34 = vpop.f32.mrb[37].mxu0  ;;  %v651_v41 = vpop.f32.mrb[37].mxu1 }
 0x15e   :  { %v708_v42 = vadd.f32 %v707_v32, %v706_v19  ;;  %v2052_v43 = vpop.f32.mrb[38].mxu0  ;;  %v2054_v44 = vpop.f32.mrb[38].mxu1 }
 0x15f   :  { %2723 = vst [vmem:[#allocation7_spill] sm:$0xff] %v2054_v44  ;;  %v860_v49 = vsel %vm671_vm0, %v794_v33, 0.0  ;;  %v709_v50 = vsel %vm671_vm0, %v2052_v43, 0.0  ;;  %v795_v51 = vmul.f32 %v2052_v43, %v2052_v43  ;;  %v550_v52 = vpop.f32.mrb[39].mxu0  ;;  %v654_v53 = vpop.f32.mrb[39].mxu1 }
 0x160   :  { %v861_v58 = vadd.f32 %v860_v49, %v859_v25  ;;  %v710_v59 = vadd.f32 %v709_v50, %v708_v42 }
 0x161   :  { %v862_v62 = vsel %vm671_vm0, %v795_v51, 0.0 }
 0x162   :  { %v863_v1 = vadd.f32 %v862_v62, %v861_v58 }
 0x164   :  { %v2062_v2 = vpop.f32.mrb[40].mxu0  ;;  %v2064_v11 = vpop.f32.mrb[40].mxu1 }
 0x165   :  { %2724 = vst [vmem:[#allocation8_spill] sm:$0xff] %v2064_v11  ;;  %v711_v12 = vsel %vm671_vm0, %v2062_v2, 0.0  ;;  %v796_v13 = vmul.f32 %v2062_v2, %v2062_v2  ;;  %v555_v16 = vpop.f32.mrb[41].mxu0  ;;  %v659_v17 = vpop.f32.mrb[41].mxu1 }
 0x166   :  { %v712_v18 = vadd.f32 %v711_v12, %v710_v59  ;;  %v2070_v19 = vpop.f32.mrb[42].mxu0  ;;  %v2072_v22 = vpop.f32.mrb[42].mxu1 }
 0x167   :  { %2725 = vst [vmem:[#allocation9_spill] sm:$0xff] %v2072_v22  ;;  %v864_v25 = vsel %vm671_vm0, %v796_v13, 0.0  ;;  %v713_v32 = vsel %vm671_vm0, %v2070_v19, 0.0  ;;  %v797_v33 = vmul.f32 %v2070_v19, %v2070_v19  ;;  %v558_v34 = vpop.f32.mrb[43].mxu0  ;;  %v662_v41 = vpop.f32.mrb[43].mxu1 }
 0x168   :  { %v865_v42 = vadd.f32 %v864_v25, %v863_v1  ;;  %v714_v49 = vadd.f32 %v713_v32, %v712_v18 }
 0x169   :  { %v866_v50 = vsel %vm671_vm0, %v797_v33, 0.0 }
 0x16a   :  { %v867_v51 = vadd.f32 %v866_v50, %v865_v42 }
 0x16c   :  { %v2080_v52 = vpop.f32.mrb[44].mxu0  ;;  %v2082_v53 = vpop.f32.mrb[44].mxu1 }
 0x16d   :  { %2726 = vst [vmem:[#allocation10_spill] sm:$0xff] %v2082_v53  ;;  %v715_v58 = vsel %vm671_vm0, %v2080_v52, 0.0  ;;  %v798_v59 = vmul.f32 %v2080_v52, %v2080_v52  ;;  %v563_v62 = vpop.f32.mrb[45].mxu0  ;;  %v667_v12 = vpop.f32.mrb[45].mxu1 }
 0x16e   :  { %v716_v13 = vadd.f32 %v715_v58, %v714_v49  ;;  %v2088_v16 = vpop.f32.mrb[46].mxu0  ;;  %v668_v1 = vpop.f32.mrb[46].mxu1 }
 0x16f   :  { %v868_v17 = vsel %vm671_vm0, %v798_v59, 0.0  ;;  %v717_v18 = vsel %vm671_vm0, %v2088_v16, 0.0  ;;  %v799_v25 = vmul.f32 %v2088_v16, %v2088_v16  ;;  %v566_v32 = vpop.f32.mrb[47].mxu0  ;;  %v669_v33 = vpop.f32.mrb[47].mxu1 }
 0x170   :  { %v869_v34 = vadd.f32 %v868_v17, %v867_v51  ;;  %v718_v41 = vadd.f32 %v717_v18, %v716_v13  ;;  %v802_v32 = vmul.f32 %v1884_v5, %v1884_v5 }
 0x171   :  { %v870_v42 = vsel %vm671_vm0, %v799_v25, 0.0 }
 0x172   :  { %v871_v50 = vadd.f32 %v870_v42, %v869_v34  ;;  %v723_v34 = vsel %vm671_vm0, %v1884_v5, 0.0 }
 0x174   :  { %v2096_v62 = vpop.f32.mrb[48].mxu0 }
 0x175   :  { %2727 = vst [vmem:[#allocation11_spill] sm:$0xff] %v2096_v62  ;;  %v719_v49 = vsel %vm671_vm0, %v2096_v62, 0.0  ;;  %v800_v58 = vmul.f32 %v2096_v62, %v2096_v62  ;;  %v571_v59 = vpop.f32.mrb[49].mxu0  ;;  %v725_v62 = vsel %vm671_vm0, %v1890_v10, 0.0 }
 0x176   :  { %v720_v12 = vadd.f32 %v719_v49, %v718_v41  ;;  %v2102_v1 = vpop.f32.mrb[50].mxu0  ;;  %v803_v41 = vmul.f32 %v1890_v10, %v1890_v10 }
 0x177   :  { %v872_v51 = vsel %vm671_vm0, %v800_v58, 0.0  ;;  %v721_v13 = vsel %vm671_vm0, %v2102_v1, 0.0  ;;  %v801_v17 = vmul.f32 %v2102_v1, %v2102_v1  ;;  %v574_v18 = vpop.f32.mrb[51].mxu0  ;;  %v876_v58 = vsel %vm671_vm0, %v802_v32, 0.0 }
 0x178   :  { %v873_v25 = vadd.f32 %v872_v51, %v871_v50  ;;  %v722_v33 = vadd.f32 %v721_v13, %v720_v12  ;;  %v804_v18 = vmul.f32 %v1902_v21, %v1902_v21  ;;  %v878_v51 = vsel %vm671_vm0, %v803_v41, 0.0 }
 0x179   :  { %v874_v42 = vsel %vm671_vm0, %v801_v17, 0.0  ;;  %v727_v13 = vsel %vm671_vm0, %v1902_v21, 0.0  ;;  %v805_v17 = vmul.f32 %v1910_v28, %v1910_v28 }
 0x17a   :  { %v724_v49 = vadd.f32 %v723_v34, %v722_v33  ;;  %v875_v59 = vadd.f32 %v874_v42, %v873_v25  ;;  %v880_v32 = vsel %vm671_vm0, %v804_v18, 0.0  ;;  %v729_v34 = vsel %vm671_vm0, %v1910_v28, 0.0 }
 0x17b   :  { %v806_v42 = vmul.f32 %v1920_v39, %v1920_v39  ;;  %v882_v41 = vsel %vm671_vm0, %v805_v17, 0.0 }
 0x17c   :  { %v726_v50 = vadd.f32 %v725_v62, %v724_v49  ;;  %v877_v12 = vadd.f32 %v876_v58, %v875_v59  ;;  %v731_v59 = vsel %vm671_vm0, %v1920_v39, 0.0  ;;  %v807_v58 = vmul.f32 %v1928_v46, %v1928_v46 }
 0x17d   :  { %v884_v18 = vsel %vm671_vm0, %v806_v42, 0.0 }
 0x17e   :  { %v728_v33 = vadd.f32 %v727_v13, %v726_v50  ;;  %v879_v25 = vadd.f32 %v878_v51, %v877_v12  ;;  %v733_v51 = vsel %vm671_vm0, %v1928_v46, 0.0  ;;  %v808_v13 = vmul.f32 %v1938_v57, %v1938_v57 }
 0x17f   :  { %v886_v17 = vsel %vm671_vm0, %v807_v58, 0.0 }
 0x180   :  { %v730_v62 = vadd.f32 %v729_v34, %v728_v33  ;;  %v881_v49 = vadd.f32 %v880_v32, %v879_v25  ;;  %v735_v32 = vsel %vm671_vm0, %v1938_v57, 0.0  ;;  %v809_v34 = vmul.f32 %v1946_v0, %v1946_v0 }
 0x181   :  { %v888_v42 = vsel %vm671_vm0, %v808_v13, 0.0 }
 0x182   :  { %v732_v50 = vadd.f32 %v731_v59, %v730_v62  ;;  %v883_v12 = vadd.f32 %v882_v41, %v881_v49  ;;  %v737_v41 = vsel %vm671_vm0, %v1946_v0, 0.0  ;;  %v810_v59 = vmul.f32 %v1956_v15, %v1956_v15 }
 0x183   :  { %v890_v58 = vsel %vm671_vm0, %v809_v34, 0.0 }
 0x184   :  { %v734_v33 = vadd.f32 %v733_v51, %v732_v50  ;;  %v885_v25 = vadd.f32 %v884_v18, %v883_v12  ;;  %v739_v18 = vsel %vm671_vm0, %v1956_v15, 0.0  ;;  %v811_v51 = vmul.f32 %v1964_v24, %v1964_v24 }
 0x185   :  { %v892_v13 = vsel %vm671_vm0, %v810_v59, 0.0 }
 0x186   :  { %v887_v62 = vadd.f32 %v886_v17, %v885_v25  ;;  %v736_v49 = vadd.f32 %v735_v32, %v734_v33  ;;  %v741_v17 = vsel %vm671_vm0, %v1964_v24, 0.0  ;;  %v812_v32 = vmul.f32 %v1974_v37, %v1974_v37 }
 0x187   :  { %v894_v34 = vsel %vm671_vm0, %v811_v51, 0.0 }
 0x188   :  { %v738_v50 = vadd.f32 %v737_v41, %v736_v49  ;;  %v889_v12 = vadd.f32 %v888_v42, %v887_v62  ;;  %v743_v42 = vsel %vm671_vm0, %v1974_v37, 0.0  ;;  %v813_v41 = vmul.f32 %v1982_v48, %v1982_v48 }
 0x189   :  { %v896_v59 = vsel %vm671_vm0, %v812_v32, 0.0 }
 0x18a   :  { %v740_v25 = vadd.f32 %v739_v18, %v738_v50  ;;  %v891_v33 = vadd.f32 %v890_v58, %v889_v12  ;;  %v745_v58 = vsel %vm671_vm0, %v1982_v48, 0.0  ;;  %v814_v18 = vmul.f32 %v1992_v61, %v1992_v61 }
 0x18b   :  { %v898_v51 = vsel %vm671_vm0, %v813_v41, 0.0 }
 0x18c   :  { %v742_v49 = vadd.f32 %v741_v17, %v740_v25  ;;  %v893_v62 = vadd.f32 %v892_v13, %v891_v33  ;;  %v747_v13 = vsel %vm671_vm0, %v1992_v61, 0.0  ;;  %v815_v17 = vmul.f32 %v2000_v8, %v2000_v8 }
 0x18d   :  { %v900_v32 = vsel %vm671_vm0, %v814_v18, 0.0 }
 0x18e   :  { %v744_v50 = vadd.f32 %v743_v42, %v742_v49  ;;  %v895_v12 = vadd.f32 %v894_v34, %v893_v62  ;;  %v749_v34 = vsel %vm671_vm0, %v2000_v8, 0.0  ;;  %v816_v42 = vmul.f32 %v2010_v29, %v2010_v29 }
 0x18f   :  { %v902_v41 = vsel %vm671_vm0, %v815_v17, 0.0 }
 0x190   :  { %v746_v25 = vadd.f32 %v745_v58, %v744_v50  ;;  %v897_v33 = vadd.f32 %v896_v59, %v895_v12  ;;  %v751_v59 = vsel %vm671_vm0, %v2010_v29, 0.0  ;;  %v817_v58 = vmul.f32 %v2018_v40, %v2018_v40 }
 0x191   :  { %v904_v18 = vsel %vm671_vm0, %v816_v42, 0.0 }
 0x192   :  { %v748_v49 = vadd.f32 %v747_v13, %v746_v25  ;;  %v899_v62 = vadd.f32 %v898_v51, %v897_v33  ;;  %v753_v51 = vsel %vm671_vm0, %v2018_v40, 0.0  ;;  %v818_v13 = vmul.f32 %v2028_v55, %v2028_v55 }
 0x193   :  { %v906_v17 = vsel %vm671_vm0, %v817_v58, 0.0 }
 0x194   :  { %v901_v50 = vadd.f32 %v900_v32, %v899_v62  ;;  %v750_v12 = vadd.f32 %v749_v34, %v748_v49  ;;  %v755_v32 = vsel %vm671_vm0, %v2028_v55, 0.0  ;;  %v819_v34 = vmul.f32 %v2036_v6, %v2036_v6 }
 0x195   :  { %v908_v42 = vsel %vm671_vm0, %v818_v13, 0.0 }
 0x196   :  { %v903_v25 = vadd.f32 %v902_v41, %v901_v50  ;;  %v752_v33 = vadd.f32 %v751_v59, %v750_v12  ;;  %v757_v41 = vsel %vm671_vm0, %v2036_v6, 0.0  ;;  %v820_v59 = vmul.f32 %v2046_v31, %v2046_v31 }
 0x197   :  { %v910_v58 = vsel %vm671_vm0, %v819_v34, 0.0 }
 0x198   :  { %v905_v62 = vadd.f32 %v904_v18, %v903_v25  ;;  %v754_v49 = vadd.f32 %v753_v51, %v752_v33  ;;  %v759_v18 = vsel %vm671_vm0, %v2046_v31, 0.0  ;;  %v821_v51 = vmul.f32 %v2054_v44, %v2054_v44 }
 0x199   :  { %v912_v13 = vsel %vm671_vm0, %v820_v59, 0.0 }
 0x19a   :  { %v907_v50 = vadd.f32 %v906_v17, %v905_v62  ;;  %v756_v12 = vadd.f32 %v755_v32, %v754_v49  ;;  %v761_v17 = vsel %vm671_vm0, %v2054_v44, 0.0  ;;  %v822_v32 = vmul.f32 %v2064_v11, %v2064_v11 }
 0x19b   :  { %v914_v34 = vsel %vm671_vm0, %v821_v51, 0.0 }
 0x19c   :  { %v909_v25 = vadd.f32 %v908_v42, %v907_v50  ;;  %v758_v33 = vadd.f32 %v757_v41, %v756_v12  ;;  %v763_v42 = vsel %vm671_vm0, %v2064_v11, 0.0  ;;  %v823_v41 = vmul.f32 %v2072_v22, %v2072_v22 }
 0x19e   :  { %v911_v62 = vadd.f32 %v910_v58, %v909_v25  ;;  %v760_v49 = vadd.f32 %v759_v18, %v758_v33  ;;  %v824_v25 = vmul.f32 %v2082_v53, %v2082_v53  ;;  %v916_v58 = vsel %vm671_vm0, %v822_v32, 0.0 }
 0x19f   :  { %v765_v18 = vsel %vm671_vm0, %v2072_v22, 0.0 }
 0x1a0   :  { %v913_v50 = vadd.f32 %v912_v13, %v911_v62  ;;  %v762_v12 = vadd.f32 %v761_v17, %v760_v49  ;;  %v767_v62 = vsel %vm671_vm0, %v2082_v53, 0.0  ;;  %v918_v13 = vsel %vm671_vm0, %v823_v41, 0.0 }
 0x1a1   :  { %v920_v17 = vsel %vm671_vm0, %v824_v25, 0.0 }
 0x1a2   :  { %v915_v59 = vadd.f32 %v914_v34, %v913_v50  ;;  %v764_v33 = vadd.f32 %v763_v42, %v762_v12 }
 0x1a4   :  { %v917_v51 = vadd.f32 %v916_v58, %v915_v59  ;;  %v766_v49 = vadd.f32 %v765_v18, %v764_v33 }
 0x1a6   :  { %v919_v11 = vadd.f32 %v918_v13, %v917_v51  ;;  %v768_v44 = vadd.f32 %v767_v62, %v766_v49  ;;  %v939_v62 = vlaneseq }
 0x1a8   :  { %v769_v31 = vrot.slane %v768_v44, 4  ;;  %v921_v6 = vadd.f32 %v920_v17, %v919_v11  ;;  %v940_v11 = vshrl.u32 %v939_v62, 7  ;;  %v2732_v62 = vld [vmem:[#allocation5_spill] sm:$0xff] }
 0x1aa   :  { %v770_v50 = vadd.f32 %v769_v31, %v768_v44  ;;  %v922_v12 = vrot.slane %v921_v6, 4  ;;  %v941_v31 = vsub.s32 0, %v940_v11  ;;  %v2733_v11 = vld [vmem:[#allocation6_spill] sm:$0xff] }
 0x1ac   :  { %v771_v34 = vrot.slane %v770_v50, 2  ;;  %v923_v32 = vadd.f32 %v922_v12, %v921_v6  ;;  %v932_v6 = vld [vmem:[%s2706_s2] sm:$0x1] }
 0x1ae   :  { %v772_v42 = vadd.f32 %v771_v34, %v770_v50  ;;  %v924_v55 = vrot.slane %v923_v32, 2 }
 0x1b0   :  { %v773_v22 = vrot.slane %v772_v42, 1  ;;  %v925_v40 = vadd.f32 %v924_v55, %v923_v32 }
 0x1b2   :  { %v774_v29 = vadd.f32 %v773_v22, %v772_v42  ;;  %v926_v53 = vrot.slane %v925_v40, 1 }
 0x1b4   :  { %v775_v59 = vmul.f32 0.0025510204, %v774_v29  ;;  %v927_v33 = vadd.f32 %v926_v53, %v925_v40  ;;  %v936_v29 = vld [vmem:[%s2706_s2 + $0x1] sm:$0x1] }
 0x1b6   :  { %v928_v58 = vmul.f32 0.0025510204, %v927_v33  ;;  %v929_v41 = vmul.f32 %v775_v59, %v775_v59 }
 0x1b8   :  { %v930_v18 = vsub.f32 %v928_v58, %v929_v41  ;;  %v2728_v58 = vld [vmem:[#allocation11_spill] sm:$0xff] }
 0x1ba   :  { %v931_v25 = vmax.f32 %v930_v18, 0.0  ;;  %v2729_v18 = vld [vmem:[#allocation2_spill] sm:$0xff] }
 0x1bc   :  { %v933_v51 = vadd.f32 1e-05, %v931_v25  ;;  %v2730_v25 = vld [vmem:[#allocation3_spill] sm:$0xff] }
 0x1be   :  { %1632 = vrsqrt.f32 %v933_v51  ;;  %v2731_v51 = vld [vmem:[#allocation4_spill] sm:$0xff] }
 0x1c8   :  { %v1633_v44 = vpop.eup %1632 }
 0x1c9   :  { %v935_v49 = vmul.f32 %v1633_v44, %v932_v6  ;;  %v2734_v6 = vld [vmem:[#allocation7_spill] sm:$0xff]  ;;  %v2735_v44 = vld [vmem:[#allocation8_spill] sm:$0xff] }
 0x1cb   :  { %v937_v40 = vmul.f32 %v935_v49, %v775_v59  ;;  %v942_v55 = vrot.slane %v935_v49, %v941_v31  ;;  %v2736_v49 = vld [vmem:[#allocation9_spill] sm:$0xff] }
 0x1cd   :  { %v938_v22 = vsub.f32 %v936_v29, %v937_v40  ;;  %v943_v53 = vmul.f32 %v942_v55, %v1882_v4  ;;  %v944_v13 = vmul.f32 %v942_v55, %v1888_v9  ;;  %v945_v17 = vmul.f32 %v942_v55, %v1900_v20  ;;  %v2737_v29 = vld [vmem:[#allocation10_spill] sm:$0xff] }
 0x1ce   :  { %v946_v50 = vmul.f32 %v942_v55, %v1908_v27  ;;  %v947_v12 = vmul.f32 %v942_v55, %v1918_v38  ;;  %v948_v34 = vmul.f32 %v942_v55, %v1926_v45  ;;  %v949_v32 = vmul.f32 %v942_v55, %v1936_v56 }
 0x1cf   :  { %v950_v42 = vmul.f32 %v942_v55, %v1944_v63  ;;  %v951_v59 = vmul.f32 %v942_v55, %v1954_v14  ;;  %v952_v33 = vmul.f32 %v942_v55, %v1962_v23  ;;  %v953_v4 = vmul.f32 %v942_v55, %v1972_v36 }
 0x1d0   :  { %v954_v9 = vmul.f32 %v942_v55, %v1980_v47  ;;  %v955_v20 = vmul.f32 %v942_v55, %v1990_v60  ;;  %v956_v27 = vmul.f32 %v942_v55, %v1998_v7  ;;  %v957_v38 = vmul.f32 %v942_v55, %v2008_v26 }
 0x1d1   :  { %v958_v45 = vmul.f32 %v942_v55, %v2016_v35  ;;  %v959_v56 = vmul.f32 %v942_v55, %v2026_v54  ;;  %v960_v63 = vmul.f32 %v942_v55, %v2034_v3  ;;  %v961_v14 = vmul.f32 %v942_v55, %v2044_v30 }
 0x1d2   :  { %v962_v23 = vmul.f32 %v942_v55, %v2052_v43  ;;  %v963_v36 = vmul.f32 %v942_v55, %v2062_v2  ;;  %v964_v47 = vmul.f32 %v942_v55, %v2070_v19  ;;  %v965_v60 = vmul.f32 %v942_v55, %v2080_v52 }
 0x1d3   :  { %v966_v7 = vmul.f32 %v942_v55, %v2088_v16  ;;  %v967_v26 = vmul.f32 %v942_v55, %v2728_v58  ;;  %v968_v35 = vmul.f32 %v942_v55, %v2102_v1  ;;  %v969_v54 = vmul.f32 %v942_v55, %v1884_v5 }
 0x1d4   :  { %v970_v3 = vmul.f32 %v942_v55, %v1890_v10  ;;  %v971_v30 = vmul.f32 %v942_v55, %v1902_v21  ;;  %v972_v43 = vmul.f32 %v942_v55, %v1910_v28  ;;  %v973_v2 = vmul.f32 %v942_v55, %v1920_v39 }
 0x1d5   :  { %v974_v19 = vmul.f32 %v942_v55, %v1928_v46  ;;  %v975_v52 = vmul.f32 %v942_v55, %v1938_v57  ;;  %v976_v16 = vmul.f32 %v942_v55, %v1946_v0  ;;  %v977_v41 = vmul.f32 %v942_v55, %v1956_v15 }
 0x1d6   :  { %v978_v1 = vmul.f32 %v942_v55, %v1964_v24  ;;  %v979_v5 = vmul.f32 %v942_v55, %v1974_v37  ;;  %v980_v10 = vmul.f32 %v942_v55, %v1982_v48  ;;  %v981_v21 = vmul.f32 %v942_v55, %v1992_v61 }
 0x1d7   :  { %v982_v28 = vmul.f32 %v942_v55, %v2000_v8  ;;  %v983_v39 = vmul.f32 %v942_v55, %v2729_v18  ;;  %v984_v46 = vmul.f32 %v942_v55, %v2730_v25  ;;  %v985_v57 = vmul.f32 %v942_v55, %v2731_v51 }
 0x1d8   :  { %v986_v0 = vmul.f32 %v942_v55, %v2732_v62  ;;  %v987_v15 = vmul.f32 %v942_v55, %v2733_v11  ;;  %v988_v24 = vmul.f32 %v942_v55, %v2734_v6  ;;  %v989_v37 = vmul.f32 %v942_v55, %v2735_v44 }
 0x1d9   :  { %v990_v48 = vmul.f32 %v942_v55, %v2736_v49  ;;  %v991_v61 = vmul.f32 %v942_v55, %v2737_v29  ;;  %v995_v40 = vrot.slane %v938_v22, %v941_v31 }
 0x1db   :  { %v2280_v8 = vadd.f32 %v995_v40, %v943_v53  ;;  %v2282_v58 = vadd.f32 %v995_v40, %v944_v13  ;;  %v2284_v18 = vadd.f32 %v995_v40, %v945_v17  ;;  %v2286_v25 = vadd.f32 %v995_v40, %v946_v50 }
 0x1dc   :  { %v2288_v51 = vadd.f32 %v995_v40, %v947_v12  ;;  %v2290_v62 = vadd.f32 %v995_v40, %v948_v34  ;;  %v2292_v11 = vadd.f32 %v995_v40, %v949_v32  ;;  %v2294_v6 = vadd.f32 %v995_v40, %v950_v42 }
 0x1dd   :  { %v2296_v44 = vadd.f32 %v995_v40, %v951_v59  ;;  %v2298_v55 = vadd.f32 %v995_v40, %v952_v33  ;;  %v2300_v31 = vadd.f32 %v995_v40, %v953_v4  ;;  %v2302_v22 = vadd.f32 %v995_v40, %v954_v9 }
 0x1de   :  { %v2304_v53 = vadd.f32 %v995_v40, %v955_v20  ;;  %v2306_v13 = vadd.f32 %v995_v40, %v956_v27  ;;  %v2308_v17 = vadd.f32 %v995_v40, %v957_v38  ;;  %v2310_v50 = vadd.f32 %v995_v40, %v958_v45 }
 0x1df   :  { %v2312_v12 = vadd.f32 %v995_v40, %v959_v56  ;;  %v2314_v34 = vadd.f32 %v995_v40, %v960_v63  ;;  %v2316_v32 = vadd.f32 %v995_v40, %v961_v14  ;;  %v2318_v42 = vadd.f32 %v995_v40, %v962_v23 }
 0x1e0   :  { %v2320_v59 = vadd.f32 %v995_v40, %v963_v36  ;;  %v2322_v33 = vadd.f32 %v995_v40, %v964_v47  ;;  %v2324_v4 = vadd.f32 %v995_v40, %v965_v60  ;;  %v2326_v9 = vadd.f32 %v995_v40, %v966_v7 }
 0x1e1   :  { %v2328_v20 = vadd.f32 %v995_v40, %v967_v26  ;;  %v2330_v27 = vadd.f32 %v995_v40, %v968_v35  ;;  %v2332_v38 = vadd.f32 %v995_v40, %v969_v54  ;;  %v2334_v45 = vadd.f32 %v995_v40, %v970_v3 }
 0x1e2   :  { %v2336_v56 = vadd.f32 %v995_v40, %v971_v30  ;;  %v2338_v63 = vadd.f32 %v995_v40, %v972_v43  ;;  %v2340_v14 = vadd.f32 %v995_v40, %v973_v2  ;;  %v2342_v23 = vadd.f32 %v995_v40, %v974_v19 }
 0x1e3   :  { %v2344_v36 = vadd.f32 %v995_v40, %v975_v52  ;;  %v2346_v47 = vadd.f32 %v995_v40, %v976_v16  ;;  %v2348_v60 = vadd.f32 %v995_v40, %v977_v41  ;;  %v2350_v7 = vadd.f32 %v995_v40, %v978_v1 }
 0x1e4   :  { %v2352_v26 = vadd.f32 %v995_v40, %v979_v5  ;;  %v2354_v35 = vadd.f32 %v995_v40, %v980_v10  ;;  %v2356_v54 = vadd.f32 %v995_v40, %v981_v21  ;;  %v2358_v3 = vadd.f32 %v995_v40, %v982_v28 }
 0x1e5   :  { %v2360_v30 = vadd.f32 %v995_v40, %v983_v39  ;;  %v2362_v43 = vadd.f32 %v995_v40, %v984_v46  ;;  %v2364_v2 = vadd.f32 %v995_v40, %v985_v57  ;;  %v2366_v19 = vadd.f32 %v995_v40, %v986_v0 }
 0x1e6   :  { %v2368_v52 = vadd.f32 %v995_v40, %v987_v15  ;;  %v2370_v16 = vadd.f32 %v995_v40, %v988_v24  ;;  %v2372_v41 = vadd.f32 %v995_v40, %v989_v37  ;;  %v2374_v1 = vadd.f32 %v995_v40, %v990_v48 }
 0x1e7   :  { %v2376_v5 = vadd.f32 %v995_v40, %v991_v61  ;;  %v1045_v10 = vmax.f32 %v2280_v8, 0.0  ;;  %v1046_v21 = vmax.f32 %v2282_v58, 0.0  ;;  %v1047_v28 = vmax.f32 %v2284_v18, 0.0 }
 0x1e8   :  { %v1048_v39 = vmax.f32 %v2286_v25, 0.0  ;;  %v1049_v46 = vmax.f32 %v2288_v51, 0.0  ;;  %v1050_v57 = vmax.f32 %v2290_v62, 0.0  ;;  %v1051_v0 = vmax.f32 %v2292_v11, 0.0 }
 0x1e9   :  { %v1052_v15 = vmax.f32 %v2294_v6, 0.0  ;;  %v1053_v24 = vmax.f32 %v2296_v44, 0.0  ;;  %v1054_v37 = vmax.f32 %v2298_v55, 0.0  ;;  %v1055_v49 = vmax.f32 %v2300_v31, 0.0 }
 0x1ea   :  { %v1056_v48 = vmax.f32 %v2302_v22, 0.0  ;;  %v1057_v29 = vmax.f32 %v2304_v53, 0.0  ;;  %v1058_v61 = vmax.f32 %v2306_v13, 0.0  ;;  %v1059_v40 = vmax.f32 %v2308_v17, 0.0 }
 0x1eb   :  { %v1060_v8 = vmax.f32 %v2310_v50, 0.0  ;;  %v1061_v58 = vmax.f32 %v2312_v12, 0.0  ;;  %v1062_v18 = vmax.f32 %v2314_v34, 0.0  ;;  %v1063_v25 = vmax.f32 %v2316_v32, 0.0 }
 0x1ec   :  { %v1064_v51 = vmax.f32 %v2318_v42, 0.0  ;;  %v1065_v62 = vmax.f32 %v2320_v59, 0.0  ;;  %v1066_v11 = vmax.f32 %v2322_v33, 0.0  ;;  %v1089_v42 = vmax.f32 %v2368_v52, 0.0 }
 0x1ed   :  { %v1090_v59 = vmax.f32 %v2370_v16, 0.0  ;;  %v1091_v33 = vmax.f32 %v2372_v41, 0.0  ;;  %v1092_v53 = vmax.f32 %v2374_v1, 0.0  ;;  %v1093_v13 = vmax.f32 %v2376_v5, 0.0 }
 0x1ee   :  { %v1460_v22 = vpack.c.bf16 %v1045_v10, %v1045_v10  ;;  %v1461_v17 = vpack.c.bf16 %v1046_v21, %v1046_v21  ;;  %v1462_v31 = vpack.c.bf16 %v1047_v28, %v1047_v28  ;;  %v1463_v50 = vpack.c.bf16 %v1048_v39, %v1048_v39 }
 0x1ef   :  { %v1464_v55 = vpack.c.bf16 %v1049_v46, %v1049_v46  ;;  %v1465_v12 = vpack.c.bf16 %v1050_v57, %v1050_v57  ;;  %v1466_v44 = vpack.c.bf16 %v1051_v0, %v1051_v0  ;;  %v1467_v34 = vpack.c.bf16 %v1052_v15, %v1052_v15 }
 0x1f0   :  { %v1468_v6 = vpack.c.bf16 %v1053_v24, %v1053_v24  ;;  %v1469_v32 = vpack.c.bf16 %v1054_v37, %v1054_v37  ;;  %1292 = vst.msk [vmem:[%s2707_s3] sm:$0xf] %vm1291_vm1, %v1460_v22  ;;  %1293 = vst.msk [vmem:[%s2707_s3 + $0x4] sm:$0xf] %vm1291_vm1, %v1461_v17  ;;  %v1470_v10 = vpack.c.bf16 %v1055_v49, %v1055_v49  ;;  %v2749_v22 = vmax.f32 %v2346_v47, 0.0 }
 0x1f1   :  { %v1471_v21 = vpack.c.bf16 %v1056_v48, %v1056_v48  ;;  %v1472_v28 = vpack.c.bf16 %v1057_v29, %v1057_v29  ;;  %v1473_v39 = vpack.c.bf16 %v1058_v61, %v1058_v61  ;;  %1294 = vst.msk [vmem:[%s2707_s3 + $0x8] sm:$0xf] %vm1291_vm1, %v1462_v31  ;;  %1295 = vst.msk [vmem:[%s2707_s3 + $0xc] sm:$0xf] %vm1291_vm1, %v1463_v50  ;;  %v2738_v29 = vmax.f32 %v2324_v4, 0.0 }
 0x1f2   :  { %1296 = vst.msk [vmem:[%s2707_s3 + $0x10] sm:$0xf] %vm1291_vm1, %v1464_v55  ;;  %1297 = vst.msk [vmem:[%s2707_s3 + $0x14] sm:$0xf] %vm1291_vm1, %v1465_v12  ;;  %v1474_v46 = vpack.c.bf16 %v1059_v40, %v1059_v40  ;;  %v1475_v57 = vpack.c.bf16 %v1060_v8, %v1060_v8  ;;  %v1476_v0 = vpack.c.bf16 %v1061_v58, %v1061_v58  ;;  %v2739_v40 = vmax.f32 %v2326_v9, 0.0 }
 0x1f3   :  { %v1477_v15 = vpack.c.bf16 %v1062_v18, %v1062_v18  ;;  %1298 = vst.msk [vmem:[%s2707_s3 + $0x18] sm:$0xf] %vm1291_vm1, %v1466_v44  ;;  %1299 = vst.msk [vmem:[%s2707_s3 + $0x1c] sm:$0xf] %vm1291_vm1, %v1467_v34  ;;  %v1478_v24 = vpack.c.bf16 %v1063_v25, %v1063_v25  ;;  %v1479_v37 = vpack.c.bf16 %v1064_v51, %v1064_v51  ;;  %v2740_v58 = vmax.f32 %v2328_v20, 0.0 }
 0x1f4   :  { %1300 = vst.msk [vmem:[%s2707_s3 + $0x20] sm:$0xf] %vm1291_vm1, %v1468_v6  ;;  %1301 = vst.msk [vmem:[%s2707_s3 + $0x24] sm:$0xf] %vm1291_vm1, %v1469_v32  ;;  %v1480_v49 = vpack.c.bf16 %v1065_v62, %v1065_v62  ;;  %v1481_v48 = vpack.c.bf16 %v1066_v11, %v1066_v11  ;;  %v1482_v61 = vpack.c.bf16 %v2738_v29, %v2738_v29  ;;  %v2741_v25 = vmax.f32 %v2330_v27, 0.0 }
 0x1f5   :  { %1302 = vst.msk [vmem:[%s2707_s3 + $0x28] sm:$0xf] %vm1291_vm1, %v1470_v10  ;;  %1303 = vst.msk [vmem:[%s2707_s3 + $0x2c] sm:$0xf] %vm1291_vm1, %v1471_v21  ;;  %v1483_v8 = vpack.c.bf16 %v2739_v40, %v2739_v40  ;;  %v1484_v18 = vpack.c.bf16 %v2740_v58, %v2740_v58  ;;  %v2742_v4 = vmax.f32 %v2332_v38, 0.0  ;;  %v2743_v20 = vmax.f32 %v2334_v45, 0.0 }
 0x1f6   :  { %1304 = vst.msk [vmem:[%s2707_s3 + $0x30] sm:$0xf] %vm1291_vm1, %v1472_v28  ;;  %1305 = vst.msk [vmem:[%s2707_s3 + $0x34] sm:$0xf] %vm1291_vm1, %v1473_v39  ;;  %v1485_v51 = vpack.c.bf16 %v2741_v25, %v2741_v25  ;;  %v2744_v62 = vmax.f32 %v2336_v56, 0.0  ;;  %v2745_v6 = vmax.f32 %v2338_v63, 0.0  ;;  %v1493_v17 = vpack.c.bf16 %v2749_v22, %v2749_v22 }
 0x1f7   :  { %1306 = vst.msk [vmem:[%s2707_s3 + $0x38] sm:$0xf] %vm1291_vm1, %v1474_v46  ;;  %1307 = vst.msk [vmem:[%s2707_s3 + $0x3c] sm:$0xf] %vm1291_vm1, %v1475_v57  ;;  %v1486_v9 = vpack.c.bf16 %v2742_v4, %v2742_v4  ;;  %v1487_v27 = vpack.c.bf16 %v2743_v20, %v2743_v20  ;;  %v2746_v38 = vmax.f32 %v2340_v14, 0.0  ;;  %v2747_v56 = vmax.f32 %v2342_v23, 0.0 }
 0x1f8   :  { %1308 = vst.msk [vmem:[%s2707_s3 + $0x40] sm:$0xf] %vm1291_vm1, %v1476_v0  ;;  %1309 = vst.msk [vmem:[%s2707_s3 + $0x44] sm:$0xf] %vm1291_vm1, %v1477_v15  ;;  %v1488_v11 = vpack.c.bf16 %v2744_v62, %v2744_v62  ;;  %v1489_v44 = vpack.c.bf16 %v2745_v6, %v2745_v6  ;;  %v2748_v55 = vmax.f32 %v2344_v36, 0.0  ;;  %v2750_v14 = vmax.f32 %v2348_v60, 0.0 }
 0x1f9   :  { %1310 = vst.msk [vmem:[%s2707_s3 + $0x48] sm:$0xf] %vm1291_vm1, %v1478_v24  ;;  %1311 = vst.msk [vmem:[%s2707_s3 + $0x4c] sm:$0xf] %vm1291_vm1, %v1479_v37  ;;  %v1490_v45 = vpack.c.bf16 %v2746_v38, %v2746_v38  ;;  %v1491_v63 = vpack.c.bf16 %v2747_v56, %v2747_v56  ;;  %v2751_v36 = vmax.f32 %v2350_v7, 0.0  ;;  %v2752_v50 = vmax.f32 %v2352_v26, 0.0 }
 0x1fa   :  { %1312 = vst.msk [vmem:[%s2707_s3 + $0x50] sm:$0xf] %vm1291_vm1, %v1480_v49  ;;  %1313 = vst.msk [vmem:[%s2707_s3 + $0x54] sm:$0xf] %vm1291_vm1, %v1481_v48  ;;  %v1492_v31 = vpack.c.bf16 %v2748_v55, %v2748_v55  ;;  %v1494_v23 = vpack.c.bf16 %v2750_v14, %v2750_v14  ;;  %v2753_v34 = vmax.f32 %v2354_v35, 0.0  ;;  %v2754_v60 = vmax.f32 %v2356_v54, 0.0 }
 0x1fb   :  { %1314 = vst.msk [vmem:[%s2707_s3 + $0x58] sm:$0xf] %vm1291_vm1, %v1482_v61  ;;  %1315 = vst.msk [vmem:[%s2707_s3 + $0x5c] sm:$0xf] %vm1291_vm1, %v1483_v8  ;;  %v1495_v47 = vpack.c.bf16 %v2751_v36, %v2751_v36  ;;  %v1496_v12 = vpack.c.bf16 %v2752_v50, %v2752_v50  ;;  %v2755_v26 = vmax.f32 %v2358_v3, 0.0  ;;  %v2756_v10 = vmax.f32 %v2360_v30, 0.0 }
 0x1fc   :  { %1316 = vst.msk [vmem:[%s2707_s3 + $0x60] sm:$0xf] %vm1291_vm1, %v1484_v18  ;;  %1317 = vst.msk [vmem:[%s2707_s3 + $0x64] sm:$0xf] %vm1291_vm1, %v1485_v51  ;;  %v1497_v32 = vpack.c.bf16 %v2753_v34, %v2753_v34  ;;  %v1498_v7 = vpack.c.bf16 %v2754_v60, %v2754_v60  ;;  %v2757_v28 = vmax.f32 %v2362_v43, 0.0  ;;  %v2758_v54 = vmax.f32 %v2364_v2, 0.0 }
 0x1fd   :  { %1318 = vst.msk [vmem:[%s2707_s3 + $0x68] sm:$0xf] %vm1291_vm1, %v1486_v9  ;;  %1319 = vst.msk [vmem:[%s2707_s3 + $0x6c] sm:$0xf] %vm1291_vm1, %v1487_v27  ;;  %v1499_v35 = vpack.c.bf16 %v2755_v26, %v2755_v26  ;;  %v1500_v21 = vpack.c.bf16 %v2756_v10, %v2756_v10  ;;  %v2759_v30 = vmax.f32 %v2366_v19, 0.0  ;;  %v1504_v46 = vpack.c.bf16 %v1089_v42, %v1089_v42 }
 0x1fe   :  { %1320 = vst.msk [vmem:[%s2707_s3 + $0x70] sm:$0xf] %vm1291_vm1, %v1488_v11  ;;  %1321 = vst.msk [vmem:[%s2707_s3 + $0x74] sm:$0xf] %vm1291_vm1, %v1489_v44  ;;  %v1501_v39 = vpack.c.bf16 %v2757_v28, %v2757_v28  ;;  %v1502_v3 = vpack.c.bf16 %v2758_v54, %v2758_v54  ;;  %v1505_v57 = vpack.c.bf16 %v1090_v59, %v1090_v59 }
 0x1ff   :  { %1322 = vst.msk [vmem:[%s2707_s3 + $0x78] sm:$0xf] %vm1291_vm1, %v1490_v45  ;;  %1323 = vst.msk [vmem:[%s2707_s3 + $0x7c] sm:$0xf] %vm1291_vm1, %v1491_v63  ;;  %v1503_v43 = vpack.c.bf16 %v2759_v30, %v2759_v30  ;;  %v1506_v2 = vpack.c.bf16 %v1091_v33, %v1091_v33  ;;  %v1507_v19 = vpack.c.bf16 %v1092_v53, %v1092_v53 }
 0x200   :  { %1324 = vst.msk [vmem:[%s2707_s3 + $0x80] sm:$0xf] %vm1291_vm1, %v1492_v31  ;;  %1325 = vst.msk [vmem:[%s2707_s3 + $0x84] sm:$0xf] %vm1291_vm1, %v1493_v17  ;;  %v1508_v52 = vpack.c.bf16 %v1093_v13, %v1093_v13 }
 0x201   :  { %1326 = vst.msk [vmem:[%s2707_s3 + $0x88] sm:$0xf] %vm1291_vm1, %v1494_v23  ;;  %1327 = vst.msk [vmem:[%s2707_s3 + $0x8c] sm:$0xf] %vm1291_vm1, %v1495_v47 }
 0x202   :  { %1328 = vst.msk [vmem:[%s2707_s3 + $0x90] sm:$0xf] %vm1291_vm1, %v1496_v12  ;;  %1329 = vst.msk [vmem:[%s2707_s3 + $0x94] sm:$0xf] %vm1291_vm1, %v1497_v32 }
 0x203   :  { %1330 = vst.msk [vmem:[%s2707_s3 + $0x98] sm:$0xf] %vm1291_vm1, %v1498_v7  ;;  %1331 = vst.msk [vmem:[%s2707_s3 + $0x9c] sm:$0xf] %vm1291_vm1, %v1499_v35 }
 0x204   :  { %1332 = vst.msk [vmem:[%s2707_s3 + $0xa0] sm:$0xf] %vm1291_vm1, %v1500_v21  ;;  %1333 = vst.msk [vmem:[%s2707_s3 + $0xa4] sm:$0xf] %vm1291_vm1, %v1501_v39 }
 0x205   :  { %1334 = vst.msk [vmem:[%s2707_s3 + $0xa8] sm:$0xf] %vm1291_vm1, %v1502_v3  ;;  %1335 = vst.msk [vmem:[%s2707_s3 + $0xac] sm:$0xf] %vm1291_vm1, %v1503_v43 }
 0x206   :  { %1336 = vst.msk [vmem:[%s2707_s3 + $0xb0] sm:$0xf] %vm1291_vm1, %v1504_v46  ;;  %1337 = vst.msk [vmem:[%s2707_s3 + $0xb4] sm:$0xf] %vm1291_vm1, %v1505_v57 }
 0x207   :  { %1338 = vst.msk [vmem:[%s2707_s3 + $0xb8] sm:$0xf] %vm1291_vm1, %v1506_v2  ;;  %1339 = vst.msk [vmem:[%s2707_s3 + $0xbc] sm:$0xf] %vm1291_vm1, %v1507_v19 }
 0x208   :  { %1340 = vst.msk [vmem:[%s2707_s3 + $0xc0] sm:$0xf] %vm1291_vm1, %v1508_v52 }

// kernel: dqn_forward.4
= control target key start
LH: loop header
LB: loop body
LE: loop exit
PB: predicated region body
PF: predicated region fallthrough
CT: control target
= control target key end

     0   :  { %vm527_vm0 = vcmask 523264   ;;  %vm667_vm1 = vcmask 519168   ;;  %s1177_s1 = inlined_call_operand.vmem [shape: bf16[512,64], index: 1, kind: input, shape index: {}]   ;;  %s1178_s0 = inlined_call_operand.vmem [shape: bf16[72,512], index: 0, kind: input, shape index: {}]   ;;  %s1179_s2 = inlined_call_operand.vmem [shape: f32[2,64], index: 2, kind: input, shape index: {}]   ;;  %s1180_s3 = inlined_call_operand.vmem [shape: bf16[72,64], index: 3, kind: output, shape index: {}]  }
   0x1   :  { %v843_v0 = vld [vmem:[%s1177_s1 + $0x40] sm:$0xff]   ;;  %v847_v4 = vld [vmem:[%s1177_s1 + $0x48] sm:$0xff]   ;;  %v851_v8 = vld [vmem:[%s1177_s1 + $0x50] sm:$0xff]  }
   0x2   :  { %v844_v1 = vld [vmem:[%s1177_s1 + $0xc0] sm:$0xff]   ;;  %751 = vmatprep.subr.bf16.mxu0 %v843_v0  ;;  %v848_v5 = vld [vmem:[%s1177_s1 + $0xc8] sm:$0xff]   ;;  %v852_v9 = vld [vmem:[%s1177_s1 + $0xd0] sm:$0xff]  }
   0x3   :  { %v845_v2 = vld [vmem:[%s1177_s1] sm:$0xff]   ;;  %797 = vmatprep.subr.bf16.mxu1 %v844_v1  ;;  %v849_v6 = vld [vmem:[%s1177_s1 + $0x8] sm:$0xff]   ;;  %v853_v10 = vld [vmem:[%s1177_s1 + $0x10] sm:$0xff]  }
   0x4   :  { %v846_v3 = vld [vmem:[%s1177_s1 + $0x80] sm:$0xff]   ;;  %752 = vmatpush3.bf16.msra.mxu0 %v845_v2  ;;  %v850_v7 = vld [vmem:[%s1177_s1 + $0x88] sm:$0xff]   ;;  %v854_v11 = vld [vmem:[%s1177_s1 + $0x90] sm:$0xff]  }
   0x5   :  { %798 = vmatpush3.bf16.msra.mxu1 %v846_v3  ;;  %753 = vmatprep.subr.bf16.mxu0 %v847_v4  ;;  %v855_v12 = vld [vmem:[%s1177_s1 + $0x58] sm:$0xff]   ;;  %v859_v16 = vld [vmem:[%s1177_s1 + $0x60] sm:$0xff]   ;;  %v863_v20 = vld [vmem:[%s1177_s1 + $0x68] sm:$0xff]  }
   0x6   :  { %799 = vmatprep.subr.bf16.mxu1 %v848_v5  ;;  %v856_v13 = vld [vmem:[%s1177_s1 + $0xd8] sm:$0xff]   ;;  %v860_v17 = vld [vmem:[%s1177_s1 + $0xe0] sm:$0xff]   ;;  %v864_v21 = vld [vmem:[%s1177_s1 + $0xe8] sm:$0xff]  }
   0x7   :  { %v857_v14 = vld [vmem:[%s1177_s1 + $0x18] sm:$0xff]   ;;  %v861_v18 = vld [vmem:[%s1177_s1 + $0x20] sm:$0xff]   ;;  %v865_v22 = vld [vmem:[%s1177_s1 + $0x28] sm:$0xff]  }
   0x8   :  { %754 = vmatpush3.bf16.msra.mxu0 %v849_v6  ;;  %v858_v15 = vld [vmem:[%s1177_s1 + $0x98] sm:$0xff]   ;;  %v862_v19 = vld [vmem:[%s1177_s1 + $0xa0] sm:$0xff]   ;;  %v866_v23 = vld [vmem:[%s1177_s1 + $0xa8] sm:$0xff]  }
   0x9   :  { %800 = vmatpush3.bf16.msra.mxu1 %v850_v7  ;;  %755 = vmatprep.subr.bf16.mxu0 %v851_v8  ;;  %v867_v24 = vld [vmem:[%s1177_s1 + $0x70] sm:$0xff]   ;;  %v871_v28 = vld [vmem:[%s1177_s1 + $0x78] sm:$0xff]   ;;  %v31_v46 = vld [vmem:[%s1178_s0 + $0x80] sm:$0xff] }
   0xa   :  { %801 = vmatprep.subr.bf16.mxu1 %v852_v9  ;;  %v868_v25 = vld [vmem:[%s1177_s1 + $0xf0] sm:$0xff]   ;;  %v872_v29 = vld [vmem:[%s1177_s1 + $0xf8] sm:$0xff]   ;;  %v32_v47 = vld [vmem:[%s1178_s0 + $0x88] sm:$0xff]  ;;  %v698_v50 = vcombine.high %v31_v46, %v31_v46  ;;  %v697_v52 = vcombine.low %v31_v46, %v31_v46 }
   0xb   :  { %v869_v26 = vld [vmem:[%s1177_s1 + $0x30] sm:$0xff]   ;;  %v873_v30 = vld [vmem:[%s1177_s1 + $0x38] sm:$0xff]   ;;  %v700_v51 = vcombine.high %v32_v47, %v32_v47  ;;  %v699_v53 = vcombine.low %v32_v47, %v32_v47 }
   0xc   :  { %756 = vmatpush3.bf16.msra.mxu0 %v853_v10  ;;  %v870_v27 = vld [vmem:[%s1177_s1 + $0xb0] sm:$0xff]   ;;  %v874_v31 = vld [vmem:[%s1177_s1 + $0xb8] sm:$0xff]  }
   0xd   :  { %802 = vmatpush3.bf16.msra.mxu1 %v854_v11  ;;  %757 = vmatprep.subr.bf16.mxu0 %v855_v12  ;;  %v875_v32 = vld [vmem:[%s1178_s0] ss:$16 sps:$4 sm:$0xff]   ;;  %v877_v33 = vld [vmem:[%s1178_s0 + $0x4] ss:$16 sps:$4 sm:$0xff]   ;;  %v878_v34 = vld [vmem:[%s1178_s0 + $0x8] ss:$16 sps:$4 sm:$0xff]  }
   0xe   :  { %803 = vmatprep.subr.bf16.mxu1 %v856_v13  ;;  %v880_v35 = vld [vmem:[%s1178_s0 + $0xc] ss:$16 sps:$4 sm:$0xff]   ;;  %415 = vmatprep.mubr.bf16.mxu0 %v877_v33  ;;  %v881_v36 = vld [vmem:[%s1178_s0 + $0x24] ss:$16 sps:$4 sm:$0xff]   ;;  %v885_v38 = vld [vmem:[%s1178_s0 + $0x20] ss:$16 sps:$4 sm:$0xff]  }
   0xf   :  { %487 = vmatprep.mubr.bf16.mxu1 %v880_v35  ;;  %v883_v37 = vld [vmem:[%s1178_s0 + $0x2c] ss:$16 sps:$4 sm:$0xff]   ;;  %v886_v39 = vld [vmem:[%s1178_s0 + $0x28] ss:$16 sps:$4 sm:$0xff]   ;;  %v887_v40 = vld [vmem:[%s1178_s0 + $0x44] ss:$16 sps:$4 sm:$0xff]  }
  0x10   :  { %758 = vmatpush3.bf16.msra.mxu0 %v857_v14  ;;  %v889_v41 = vld [vmem:[%s1178_s0 + $0x4c] ss:$16 sps:$4 sm:$0xff]   ;;  %v891_v42 = vld [vmem:[%s1178_s0 + $0x40] ss:$16 sps:$4 sm:$0xff]   ;;  %v892_v43 = vld [vmem:[%s1178_s0 + $0x48] ss:$16 sps:$4 sm:$0xff]  }
  0x11   :  { %804 = vmatpush3.bf16.msra.mxu1 %v858_v15  ;;  %759 = vmatprep.subr.bf16.mxu0 %v859_v16  ;;  %v893_v44 = vld [vmem:[%s1178_s0 + $0x64] ss:$16 sps:$4 sm:$0xff]   ;;  %v895_v45 = vld [vmem:[%s1178_s0 + $0x6c] ss:$16 sps:$4 sm:$0xff]   ;;  %v897_v48 = vld [vmem:[%s1178_s0 + $0x60] ss:$16 sps:$4 sm:$0xff]  }
  0x12   :  { %805 = vmatprep.subr.bf16.mxu1 %v860_v17  ;;  %v898_v49 = vld [vmem:[%s1178_s0 + $0x68] ss:$16 sps:$4 sm:$0xff]  }
  0x14   :  { %760 = vmatpush3.bf16.msra.mxu0 %v861_v18 }
  0x15   :  { %806 = vmatpush3.bf16.msra.mxu1 %v862_v19  ;;  %761 = vmatprep.subr.bf16.mxu0 %v863_v20 }
  0x16   :  { %807 = vmatprep.subr.bf16.mxu1 %v864_v21 }
  0x18   :  { %762 = vmatpush3.bf16.msra.mxu0 %v865_v22 }
  0x19   :  { %808 = vmatpush3.bf16.msra.mxu1 %v866_v23  ;;  %763 = vmatprep.subr.bf16.mxu0 %v867_v24 }
  0x1a   :  { %809 = vmatprep.subr.bf16.mxu1 %v868_v25 }
  0x1c   :  { %764 = vmatpush3.bf16.msra.mxu0 %v869_v26 }
  0x1d   :  { %810 = vmatpush3.bf16.msra.mxu1 %v870_v27  ;;  %765 = vmatprep.subr.bf16.mxu0 %v871_v28 }
  0x1e   :  { %811 = vmatprep.subr.bf16.mxu1 %v872_v29 }
  0x20   :  { %766 = vmatpush3.bf16.msra.mxu0 %v873_v30 }
  0x21   :  { %812 = vmatpush3.bf16.msra.mxu1 %v874_v31 }
  0x23   :  { %416 = vmatmul.mubr.bf16.vlgmr.msra.gmra.mrb[0].mxu0 %v875_v32 }
  0x24   :  { %488 = vmatmul.mubr.bf16.vlgmr.msra.gmra.mrb[0].mxu1 %v878_v34  ;;  %423 = vmatprep.mubr.bf16.mxu0 %v881_v36 }
  0x25   :  { %495 = vmatprep.mubr.bf16.mxu1 %v883_v37 }
  0x2b   :  { %424 = vmatmul.mubr.bf16.gmra.mrb[4].mxu0 %v885_v38 }
  0x2c   :  { %496 = vmatmul.mubr.bf16.gmra.mrb[4].mxu1 %v886_v39  ;;  %431 = vmatprep.mubr.bf16.mxu0 %v887_v40 }
  0x2d   :  { %503 = vmatprep.mubr.bf16.mxu1 %v889_v41 }
  0x33   :  { %432 = vmatmul.mubr.bf16.gmra.mrb[8].mxu0 %v891_v42 }
  0x34   :  { %504 = vmatmul.mubr.bf16.gmra.mrb[8].mxu1 %v892_v43  ;;  %439 = vmatprep.mubr.bf16.mxu0 %v893_v44 }
  0x35   :  { %511 = vmatprep.mubr.bf16.mxu1 %v895_v45 }
  0x3b   :  { %440 = vmatmul.mubr.bf16.gmra.mrb[12].mxu0 %v897_v48 }
  0x3c   :  { %512 = vmatmul.mubr.bf16.gmra.mrb[12].mxu1 %v898_v49  ;;  %447 = vmatprep.mubr.bf16.mxu0 %v698_v50 }
  0x3d   :  { %519 = vmatprep.mubr.bf16.mxu1 %v700_v51 }
  0x43   :  { %448 = vmatmul.mubr.bf16.gmra.mrb[16].mxu0 %v697_v52 }
  0x44   :  { %520 = vmatmul.mubr.bf16.gmra.mrb[16].mxu1 %v699_v53 }
  0xf6   :  { %v767_v54 = vpop.f32.mrb[0].mxu0 }
  0xf7   :  { %v813_v55 = vpop.f32.mrb[0].mxu1  ;;  %v768_v56 = vpop.f32.mrb[1].mxu0 }
  0xf8   :  { %v769_v57 = vadd.f32 %v768_v56, %v767_v54  ;;  %v814_v58 = vpop.f32.mrb[1].mxu1  ;;  %v770_v59 = vpop.f32.mrb[2].mxu0 }
  0xf9   :  { %v815_v60 = vadd.f32 %v814_v58, %v813_v55  ;;  %v816_v61 = vpop.f32.mrb[2].mxu1  ;;  %v771_v62 = vpop.f32.mrb[3].mxu0 }
  0xfa   :  { %v772_v63 = vadd.f32 %v771_v62, %v770_v59  ;;  %v817_v0 = vpop.f32.mrb[3].mxu1 }
  0xfb   :  { %v1075_v1 = vadd.f32 %v815_v60, %v769_v57  ;;  %v818_v2 = vadd.f32 %v817_v0, %v816_v61 }
  0xfd   :  { %v552_v3 = vmul.f32 %v1075_v1, %v1075_v1  ;;  %v1079_v4 = vadd.f32 %v818_v2, %v772_v63  ;;  %v528_v6 = vsel %vm527_vm0, %v1075_v1, 0.0 }
  0xfe   :  { %v773_v5 = vpop.f32.mrb[4].mxu0 }
  0xff   :  { %v529_v7 = vsel %vm527_vm0, %v1079_v4, 0.0  ;;  %v553_v8 = vmul.f32 %v1079_v4, %v1079_v4  ;;  %v819_v9 = vpop.f32.mrb[4].mxu1  ;;  %v774_v10 = vpop.f32.mrb[5].mxu0  ;;  %v561_v15 = vsel %vm527_vm0, %v552_v3, 0.0 }
 0x100   :  { %v530_v11 = vadd.f32 %v529_v7, %v528_v6  ;;  %v775_v12 = vadd.f32 %v774_v10, %v773_v5  ;;  %v820_v13 = vpop.f32.mrb[5].mxu1  ;;  %v776_v14 = vpop.f32.mrb[6].mxu0 }
 0x101   :  { %v562_v16 = vsel %vm527_vm0, %v553_v8, 0.0  ;;  %v821_v17 = vadd.f32 %v820_v13, %v819_v9  ;;  %v822_v18 = vpop.f32.mrb[6].mxu1  ;;  %v777_v19 = vpop.f32.mrb[7].mxu0 }
 0x102   :  { %v563_v20 = vadd.f32 %v562_v16, %v561_v15  ;;  %v778_v21 = vadd.f32 %v777_v19, %v776_v14  ;;  %v823_v22 = vpop.f32.mrb[7].mxu1 }
 0x103   :  { %v1089_v23 = vadd.f32 %v821_v17, %v775_v12  ;;  %v824_v24 = vadd.f32 %v823_v22, %v822_v18 }
 0x105   :  { %v531_v25 = vsel %vm527_vm0, %v1089_v23, 0.0  ;;  %v554_v26 = vmul.f32 %v1089_v23, %v1089_v23  ;;  %v1095_v27 = vadd.f32 %v824_v24, %v778_v21 }
 0x106   :  { %v532_v28 = vadd.f32 %v531_v25, %v530_v11  ;;  %v779_v29 = vpop.f32.mrb[8].mxu0 }
 0x107   :  { %v564_v30 = vsel %vm527_vm0, %v554_v26, 0.0  ;;  %v533_v31 = vsel %vm527_vm0, %v1095_v27, 0.0  ;;  %v555_v32 = vmul.f32 %v1095_v27, %v1095_v27  ;;  %v825_v33 = vpop.f32.mrb[8].mxu1  ;;  %v780_v34 = vpop.f32.mrb[9].mxu0 }
 0x108   :  { %v565_v35 = vadd.f32 %v564_v30, %v563_v20  ;;  %v534_v36 = vadd.f32 %v533_v31, %v532_v28  ;;  %v781_v37 = vadd.f32 %v780_v34, %v779_v29  ;;  %v826_v38 = vpop.f32.mrb[9].mxu1  ;;  %v782_v39 = vpop.f32.mrb[10].mxu0 }
 0x109   :  { %v566_v40 = vsel %vm527_vm0, %v555_v32, 0.0  ;;  %v827_v41 = vadd.f32 %v826_v38, %v825_v33  ;;  %v828_v42 = vpop.f32.mrb[10].mxu1  ;;  %v783_v43 = vpop.f32.mrb[11].mxu0 }
 0x10a   :  { %v567_v44 = vadd.f32 %v566_v40, %v565_v35  ;;  %v784_v45 = vadd.f32 %v783_v43, %v782_v39  ;;  %v829_v46 = vpop.f32.mrb[11].mxu1 }
 0x10b   :  { %v1103_v47 = vadd.f32 %v827_v41, %v781_v37  ;;  %v830_v48 = vadd.f32 %v829_v46, %v828_v42 }
 0x10d   :  { %v535_v49 = vsel %vm527_vm0, %v1103_v47, 0.0  ;;  %v556_v50 = vmul.f32 %v1103_v47, %v1103_v47  ;;  %v1109_v51 = vadd.f32 %v830_v48, %v784_v45 }
 0x10e   :  { %v536_v52 = vadd.f32 %v535_v49, %v534_v36  ;;  %v785_v53 = vpop.f32.mrb[12].mxu0 }
 0x10f   :  { %v568_v54 = vsel %vm527_vm0, %v556_v50, 0.0  ;;  %v537_v55 = vsel %vm527_vm0, %v1109_v51, 0.0  ;;  %v557_v56 = vmul.f32 %v1109_v51, %v1109_v51  ;;  %v831_v57 = vpop.f32.mrb[12].mxu1  ;;  %v786_v58 = vpop.f32.mrb[13].mxu0 }
 0x110   :  { %v569_v59 = vadd.f32 %v568_v54, %v567_v44  ;;  %v538_v60 = vadd.f32 %v537_v55, %v536_v52  ;;  %v787_v61 = vadd.f32 %v786_v58, %v785_v53  ;;  %v832_v62 = vpop.f32.mrb[13].mxu1  ;;  %v788_v63 = vpop.f32.mrb[14].mxu0 }
 0x111   :  { %v570_v0 = vsel %vm527_vm0, %v557_v56, 0.0  ;;  %v833_v2 = vadd.f32 %v832_v62, %v831_v57  ;;  %v834_v3 = vpop.f32.mrb[14].mxu1  ;;  %v789_v5 = vpop.f32.mrb[15].mxu0  ;;  %v588_v62 = vld [vmem:[%s1179_s2] sm:$0x1] }
 0x112   :  { %v571_v6 = vadd.f32 %v570_v0, %v569_v59  ;;  %v790_v7 = vadd.f32 %v789_v5, %v788_v63  ;;  %v835_v8 = vpop.f32.mrb[15].mxu1 }
 0x113   :  { %v1117_v9 = vadd.f32 %v833_v2, %v787_v61  ;;  %v836_v10 = vadd.f32 %v835_v8, %v834_v3  ;;  %v592_v3 = vld [vmem:[%s1179_s2 + $0x1] sm:$0x1] }
 0x115   :  { %v539_v11 = vsel %vm527_vm0, %v1117_v9, 0.0  ;;  %v558_v12 = vmul.f32 %v1117_v9, %v1117_v9  ;;  %v517_v13 = vadd.f32 %v836_v10, %v790_v7 }
 0x116   :  { %v540_v14 = vadd.f32 %v539_v11, %v538_v60  ;;  %v791_v15 = vpop.f32.mrb[16].mxu0  ;;  %v595_v60 = vlaneseq }
 0x117   :  { %v572_v16 = vsel %vm527_vm0, %v558_v12, 0.0  ;;  %v541_v17 = vsel %vm527_vm0, %v517_v13, 0.0  ;;  %v559_v18 = vmul.f32 %v517_v13, %v517_v13  ;;  %v837_v19 = vpop.f32.mrb[16].mxu1  ;;  %v792_v20 = vpop.f32.mrb[17].mxu0 }
 0x118   :  { %v573_v21 = vadd.f32 %v572_v16, %v571_v6  ;;  %v542_v22 = vadd.f32 %v541_v17, %v540_v14  ;;  %v793_v24 = vadd.f32 %v792_v20, %v791_v15  ;;  %v838_v25 = vpop.f32.mrb[17].mxu1  ;;  %v794_v26 = vpop.f32.mrb[18].mxu0  ;;  %v596_v61 = vshrl.u32 %v595_v60, 7 }
 0x119   :  { %v574_v28 = vsel %vm527_vm0, %v559_v18, 0.0  ;;  %v839_v29 = vadd.f32 %v838_v25, %v837_v19  ;;  %v840_v30 = vpop.f32.mrb[18].mxu1  ;;  %v795_v31 = vpop.f32.mrb[19].mxu0 }
 0x11a   :  { %v575_v32 = vadd.f32 %v574_v28, %v573_v21  ;;  %v841_v33 = vpop.f32.mrb[19].mxu1  ;;  %v597_v63 = vsub.s32 0, %v596_v61 }
 0x11b   :  { %v522_v34 = vadd.f32 %v839_v29, %v793_v24 }
 0x11d   :  { %v543_v35 = vsel %vm527_vm0, %v522_v34, 0.0  ;;  %v560_v36 = vmul.f32 %v522_v34, %v522_v34 }
 0x11e   :  { %v544_v37 = vadd.f32 %v543_v35, %v542_v22 }
 0x11f   :  { %v576_v38 = vsel %vm527_vm0, %v560_v36, 0.0 }
 0x120   :  { %v545_v39 = vrot.slane %v544_v37, 4  ;;  %v577_v40 = vadd.f32 %v576_v38, %v575_v32 }
 0x122   :  { %v546_v41 = vadd.f32 %v545_v39, %v544_v37  ;;  %v578_v42 = vrot.slane %v577_v40, 4 }
 0x124   :  { %v547_v43 = vrot.slane %v546_v41, 2  ;;  %v579_v44 = vadd.f32 %v578_v42, %v577_v40 }
 0x126   :  { %v548_v45 = vadd.f32 %v547_v43, %v546_v41  ;;  %v580_v46 = vrot.slane %v579_v44, 2 }
 0x128   :  { %v549_v48 = vrot.slane %v548_v45, 1  ;;  %v581_v49 = vadd.f32 %v580_v46, %v579_v44 }
 0x12a   :  { %v550_v50 = vadd.f32 %v549_v48, %v548_v45  ;;  %v582_v52 = vrot.slane %v581_v49, 1 }
 0x12c   :  { %v551_v53 = vmul.f32 0.013888889, %v550_v50  ;;  %v583_v54 = vadd.f32 %v582_v52, %v581_v49 }
 0x12e   :  { %v584_v55 = vmul.f32 0.013888889, %v583_v54  ;;  %v585_v56 = vmul.f32 %v551_v53, %v551_v53 }
 0x130   :  { %v586_v57 = vsub.f32 %v584_v55, %v585_v56 }
 0x132   :  { %v587_v58 = vmax.f32 %v586_v57, 0.0 }
 0x134   :  { %v589_v59 = vadd.f32 1e-05, %v587_v58 }
 0x136   :  { %903 = vrsqrt.f32 %v589_v59 }
 0x140   :  { %v904_v0 = vpop.eup %903 }
 0x141   :  { %v591_v2 = vmul.f32 %v904_v0, %v588_v62 }
 0x143   :  { %v593_v5 = vmul.f32 %v591_v2, %v551_v53  ;;  %v598_v6 = vrot.slane %v591_v2, %v597_v63 }
 0x145   :  { %v594_v7 = vsub.f32 %v592_v3, %v593_v5  ;;  %v599_v8 = vmul.f32 %v598_v6, %v1075_v1  ;;  %v600_v10 = vmul.f32 %v598_v6, %v1079_v4  ;;  %v601_v11 = vmul.f32 %v598_v6, %v1089_v23 }
 0x146   :  { %v602_v12 = vmul.f32 %v598_v6, %v1095_v27  ;;  %v603_v14 = vmul.f32 %v598_v6, %v1103_v47  ;;  %v604_v15 = vmul.f32 %v598_v6, %v1109_v51  ;;  %v605_v16 = vmul.f32 %v598_v6, %v1117_v9 }
 0x147   :  { %v606_v17 = vmul.f32 %v598_v6, %v517_v13  ;;  %v607_v18 = vmul.f32 %v598_v6, %v522_v34  ;;  %v611_v19 = vrot.slane %v594_v7, %v597_v63 }
 0x149   :  { %v612_v20 = vadd.f32 %v611_v19, %v599_v8  ;;  %v613_v21 = vadd.f32 %v611_v19, %v600_v10  ;;  %v614_v22 = vadd.f32 %v611_v19, %v601_v11  ;;  %v615_v1 = vadd.f32 %v611_v19, %v602_v12 }
 0x14a   :  { %v616_v24 = vadd.f32 %v611_v19, %v603_v14  ;;  %v617_v4 = vadd.f32 %v611_v19, %v604_v15  ;;  %v618_v25 = vadd.f32 %v611_v19, %v605_v16  ;;  %v619_v23 = vadd.f32 %v611_v19, %v606_v17 }
 0x14b   :  { %v620_v26 = vadd.f32 %v611_v19, %v607_v18  ;;  %v621_v27 = vmax.f32 %v612_v20, 0.0  ;;  %v622_v28 = vmax.f32 %v613_v21, 0.0  ;;  %v623_v47 = vmax.f32 %v614_v22, 0.0 }
 0x14c   :  { %v624_v29 = vmax.f32 %v615_v1, 0.0  ;;  %v625_v51 = vmax.f32 %v616_v24, 0.0  ;;  %v626_v30 = vmax.f32 %v617_v4, 0.0  ;;  %v627_v9 = vmax.f32 %v618_v25, 0.0 }
 0x14d   :  { %v628_v13 = vmax.f32 %v619_v23, 0.0  ;;  %v629_v31 = vmax.f32 %v620_v26, 0.0  ;;  %v742_v32 = vpack.c.bf16 %v621_v27, %v621_v27  ;;  %v743_v33 = vpack.c.bf16 %v622_v28, %v622_v28 }
 0x14e   :  { %v744_v34 = vpack.c.bf16 %v623_v47, %v623_v47  ;;  %v745_v35 = vpack.c.bf16 %v624_v29, %v624_v29  ;;  %v746_v36 = vpack.c.bf16 %v625_v51, %v625_v51  ;;  %v747_v37 = vpack.c.bf16 %v626_v30, %v626_v30 }
 0x14f   :  { %v748_v38 = vpack.c.bf16 %v627_v9, %v627_v9  ;;  %v749_v39 = vpack.c.bf16 %v628_v13, %v628_v13  ;;  %v750_v40 = vpack.c.bf16 %v629_v31, %v629_v31  ;;  %668 = vst.msk [vmem:[%s1180_s3] sm:$0xf] %vm667_vm1, %v742_v32  ;;  %669 = vst.msk [vmem:[%s1180_s3 + $0x4] sm:$0xf] %vm667_vm1, %v743_v33 }
 0x150   :  { %670 = vst.msk [vmem:[%s1180_s3 + $0x8] sm:$0xf] %vm667_vm1, %v744_v34  ;;  %671 = vst.msk [vmem:[%s1180_s3 + $0xc] sm:$0xf] %vm667_vm1, %v745_v35 }
 0x151   :  { %672 = vst.msk [vmem:[%s1180_s3 + $0x10] sm:$0xf] %vm667_vm1, %v746_v36  ;;  %673 = vst.msk [vmem:[%s1180_s3 + $0x14] sm:$0xf] %vm667_vm1, %v747_v37 }
 0x152   :  { %674 = vst.msk [vmem:[%s1180_s3 + $0x18] sm:$0xf] %vm667_vm1, %v748_v38  ;;  %675 = vst.msk [vmem:[%s1180_s3 + $0x1c] sm:$0xf] %vm667_vm1, %v749_v39 }
 0x153   :  { %676 = vst.msk [vmem:[%s1180_s3 + $0x20] sm:$0xf] %vm667_vm1, %v750_v40 }

// kernel: dqn_forward.5
= control target key start
LH: loop header
LB: loop body
LE: loop exit
PB: predicated region body
PF: predicated region fallthrough
CT: control target
= control target key end

     0   :  { %vm378_vm0 = vcmask 523264   ;;  %s6512_s0 = inlined_call_operand.vmem [shape: bf16[32,576], index: 0, kind: input, shape index: {}]   ;;  %s6513_s1 = inlined_call_operand.vmem [shape: bf16[576,64], index: 1, kind: input, shape index: {}]   ;;  %s6514_s2 = inlined_call_operand.vmem [shape: f32[2,64], index: 2, kind: input, shape index: {}]   ;;  %s6515_s3 = inlined_call_operand.vmem [shape: bf16[16,64,512], index: 3, kind: input, shape index: {}]   ;;  %s6516_s4 = inlined_call_operand.vmem [shape: f32[1,512], index: 4, kind: input, shape index: {}]   ;;  %s6517_s5 = inlined_call_operand.vmem [shape: bf16[512,128], index: 5, kind: input, shape index: {}]   ;;  %s6518_s6 = inlined_call_operand.vmem [shape: f32[1,128], index: 6, kind: input, shape index: {}]   ;;  %s6519_s7 = inlined_call_operand.hbm [shape: f32[2,128], index: 7, kind: output, shape index: {}]  }
   0x1   :  { %v4830_v0 = vld [vmem:[%s6513_s1 + $0x40] sm:$0xff]   ;;  %v4834_v4 = vld [vmem:[%s6513_s1 + $0x48] sm:$0xff]   ;;  %v4838_v8 = vld [vmem:[%s6513_s1 + $0x50] sm:$0xff]  }
   0x2   :  { %v4831_v1 = vld [vmem:[%s6513_s1 + $0xc0] sm:$0xff]   ;;  %4586 = vmatprep.subr.bf16.mxu0 %v4830_v0  ;;  %v4835_v5 = vld [vmem:[%s6513_s1 + $0xc8] sm:$0xff]   ;;  %v4839_v9 = vld [vmem:[%s6513_s1 + $0xd0] sm:$0xff]  }
   0x3   :  { %v4832_v2 = vld [vmem:[%s6513_s1] sm:$0xff]   ;;  %4614 = vmatprep.subr.bf16.mxu1 %v4831_v1  ;;  %v4836_v6 = vld [vmem:[%s6513_s1 + $0x8] sm:$0xff]   ;;  %v4840_v10 = vld [vmem:[%s6513_s1 + $0x10] sm:$0xff]  }
   0x4   :  { %v4833_v3 = vld [vmem:[%s6513_s1 + $0x80] sm:$0xff]   ;;  %4587 = vmatpush3.bf16.msra.mxu0 %v4832_v2  ;;  %v4837_v7 = vld [vmem:[%s6513_s1 + $0x88] sm:$0xff]   ;;  %v4841_v11 = vld [vmem:[%s6513_s1 + $0x90] sm:$0xff]  }
   0x5   :  { %4615 = vmatpush3.bf16.msra.mxu1 %v4833_v3  ;;  %4588 = vmatprep.subr.bf16.mxu0 %v4834_v4  ;;  %v4842_v12 = vld [vmem:[%s6513_s1 + $0x58] sm:$0xff]   ;;  %v4846_v16 = vld [vmem:[%s6513_s1 + $0x60] sm:$0xff]   ;;  %v4850_v20 = vld [vmem:[%s6513_s1 + $0x68] sm:$0xff]  }
   0x6   :  { %4616 = vmatprep.subr.bf16.mxu1 %v4835_v5  ;;  %v4843_v13 = vld [vmem:[%s6513_s1 + $0xd8] sm:$0xff]   ;;  %v4847_v17 = vld [vmem:[%s6513_s1 + $0xe0] sm:$0xff]   ;;  %v4851_v21 = vld [vmem:[%s6513_s1 + $0xe8] sm:$0xff]  }
   0x7   :  { %v4844_v14 = vld [vmem:[%s6513_s1 + $0x18] sm:$0xff]   ;;  %v4848_v18 = vld [vmem:[%s6513_s1 + $0x20] sm:$0xff]   ;;  %v4852_v22 = vld [vmem:[%s6513_s1 + $0x28] sm:$0xff]  }
   0x8   :  { %4589 = vmatpush3.bf16.msra.mxu0 %v4836_v6  ;;  %v4845_v15 = vld [vmem:[%s6513_s1 + $0x98] sm:$0xff]   ;;  %v4849_v19 = vld [vmem:[%s6513_s1 + $0xa0] sm:$0xff]   ;;  %v4853_v23 = vld [vmem:[%s6513_s1 + $0xa8] sm:$0xff]  }
   0x9   :  { %4617 = vmatpush3.bf16.msra.mxu1 %v4837_v7  ;;  %4590 = vmatprep.subr.bf16.mxu0 %v4838_v8  ;;  %v4854_v24 = vld [vmem:[%s6513_s1 + $0x70] sm:$0xff]   ;;  %v4858_v28 = vld [vmem:[%s6513_s1 + $0x78] sm:$0xff]   ;;  %v4867_v35 = vld [vmem:[%s6512_s0 + $0xc] ss:$20 sps:$4 sm:$0xff]  }
   0xa   :  { %4618 = vmatprep.subr.bf16.mxu1 %v4839_v9  ;;  %v4855_v25 = vld [vmem:[%s6513_s1 + $0xf0] sm:$0xff]   ;;  %v4859_v29 = vld [vmem:[%s6513_s1 + $0xf8] sm:$0xff]   ;;  %v4868_v36 = vld [vmem:[%s6513_s1 + $0x100] sm:$0xff]   ;;  %466 = vmatprep.mubr.bf16.mxu1 %v4867_v35 }
   0xb   :  { %v4856_v26 = vld [vmem:[%s6513_s1 + $0x30] sm:$0xff]   ;;  %v4860_v30 = vld [vmem:[%s6513_s1 + $0x38] sm:$0xff]   ;;  %v4869_v37 = vld [vmem:[%s6513_s1 + $0x108] sm:$0xff]  }
   0xc   :  { %4591 = vmatpush3.bf16.msra.mxu0 %v4840_v10  ;;  %v4857_v27 = vld [vmem:[%s6513_s1 + $0xb0] sm:$0xff]   ;;  %v4861_v31 = vld [vmem:[%s6513_s1 + $0xb8] sm:$0xff]   ;;  %v4870_v38 = vld [vmem:[%s6512_s0 + $0x2c] ss:$20 sps:$4 sm:$0xff]  }
   0xd   :  { %4619 = vmatpush3.bf16.msra.mxu1 %v4841_v11  ;;  %4592 = vmatprep.subr.bf16.mxu0 %v4842_v12  ;;  %v4862_v32 = vld [vmem:[%s6512_s0] ss:$20 sps:$4 sm:$0xff]   ;;  %v4864_v33 = vld [vmem:[%s6512_s0 + $0x4] ss:$20 sps:$4 sm:$0xff]   ;;  %v4865_v34 = vld [vmem:[%s6512_s0 + $0x8] ss:$20 sps:$4 sm:$0xff]  }
   0xe   :  { %4620 = vmatprep.subr.bf16.mxu1 %v4843_v13  ;;  %417 = vmatprep.mubr.bf16.mxu0 %v4864_v33  ;;  %v4872_v39 = vld [vmem:[%s6512_s0 + $0x34] ss:$20 sps:$4 sm:$0xff]   ;;  %v4875_v42 = vld [vmem:[%s6512_s0 + $0x30] ss:$20 sps:$4 sm:$0xff]   ;;  %v4877_v44 = vld [vmem:[%s6513_s1 + $0x118] sm:$0xff]  }
   0xf   :  { %v4874_v40 = vld [vmem:[%s6512_s0 + $0x28] ss:$20 sps:$4 sm:$0xff]   ;;  %v4876_v41 = vld [vmem:[%s6513_s1 + $0x110] sm:$0xff]   ;;  %v4879_v45 = vld [vmem:[%s6512_s0 + $0x38] ss:$20 sps:$4 sm:$0xff]  }
  0x10   :  { %4593 = vmatpush3.bf16.msra.mxu0 %v4844_v14  ;;  %v4878_v43 = vld [vmem:[%s6512_s0 + $0x10] ss:$20 sps:$4 sm:$0xff]  }
  0x11   :  { %4621 = vmatpush3.bf16.msra.mxu1 %v4845_v15  ;;  %4594 = vmatprep.subr.bf16.mxu0 %v4846_v16 }
  0x12   :  { %4622 = vmatprep.subr.bf16.mxu1 %v4847_v17 }
  0x14   :  { %4595 = vmatpush3.bf16.msra.mxu0 %v4848_v18 }
  0x15   :  { %4623 = vmatpush3.bf16.msra.mxu1 %v4849_v19  ;;  %4596 = vmatprep.subr.bf16.mxu0 %v4850_v20 }
  0x16   :  { %4624 = vmatprep.subr.bf16.mxu1 %v4851_v21 }
  0x18   :  { %4597 = vmatpush3.bf16.msra.mxu0 %v4852_v22 }
  0x19   :  { %4625 = vmatpush3.bf16.msra.mxu1 %v4853_v23  ;;  %4598 = vmatprep.subr.bf16.mxu0 %v4854_v24 }
  0x1a   :  { %4626 = vmatprep.subr.bf16.mxu1 %v4855_v25 }
  0x1c   :  { %4599 = vmatpush3.bf16.msra.mxu0 %v4856_v26 }
  0x1d   :  { %4627 = vmatpush3.bf16.msra.mxu1 %v4857_v27  ;;  %4600 = vmatprep.subr.bf16.mxu0 %v4858_v28 }
  0x1e   :  { %4628 = vmatprep.subr.bf16.mxu1 %v4859_v29 }
  0x20   :  { %4601 = vmatpush3.bf16.msra.mxu0 %v4860_v30 }
  0x21   :  { %4629 = vmatpush3.bf16.msra.mxu1 %v4861_v31  ;;  %4692 = vmatprep.subr.bf16.mxu0 %v4868_v36 }
  0x23   :  { %418 = vmatmul.mubr.bf16.vlgmr.msra.gmra.mrb[0].mxu0 %v4862_v32 }
  0x24   :  { %467 = vmatmul.mubr.bf16.vlgmr.msra.gmra.mrb[0].mxu1 %v4865_v34  ;;  %4693 = vmatpush3.bf16.msra.mxu0 %v4868_v36 }
  0x25   :  { %4694 = vmatprep.subr.bf16.mxu0 %v4869_v37  ;;  %425 = vmatprep.mubr.bf16.mxu0 %v4870_v38 }
  0x26   :  { %474 = vmatprep.mubr.bf16.mxu1 %v4872_v39 }
  0x28   :  { %4695 = vmatpush3.bf16.msra.mxu0 %v4869_v37 }
  0x29   :  { %4696 = vmatprep.subr.bf16.mxu0 %v4876_v41 }
  0x2b   :  { %426 = vmatmul.mubr.bf16.gmra.mrb[4].mxu0 %v4874_v40 }
  0x2c   :  { %475 = vmatmul.mubr.bf16.gmra.mrb[4].mxu1 %v4875_v42  ;;  %4700 = vmatprep.mubr.msk.bf16.mxu0 %vm378_vm0, %v4878_v43 }
  0x2d   :  { %4697 = vmatpush3.bf16.msra.mxu0 %v4876_v41 }
  0x2e   :  { %4698 = vmatprep.subr.bf16.mxu0 %v4877_v44 }
  0x31   :  { %4699 = vmatpush3.bf16.msra.mxu0 %v4877_v44 }
  0x34   :  { %4701 = vmatmul.mubr.msk.bf16.vlgmr.msra.gmra.mrb[8].mxu0 %vm378_vm0, %v4879_v45 }
  0x35   :  { %12 = vsyncpa [#allocation3], 0  ;;  %v4882_v46 = vld [vmem:[%s6515_s3 + $0x4] ss:$16 sps:$4 sm:$0xff]   ;;  %v4885_v47 = vld [vmem:[%s6515_s3 + $0xc] ss:$16 sps:$4 sm:$0xff]  }
  0x36   :  { %v4880_v48 = vld [vmem:[%s6515_s3] ss:$16 sps:$4 sm:$0xff]   ;;  %v4883_v49 = vld [vmem:[%s6515_s3 + $0x8] ss:$16 sps:$4 sm:$0xff]   ;;  %716 = vmatprep.subr.bf16.mxu1 %v4882_v46  ;;  %757 = vmatprep.subr.bf16.mxu0 %v4885_v47  ;;  %v4888_v50 = vld [vmem:[%s6515_s3 + $0x24] ss:$16 sps:$4 sm:$0xff]  }
  0x37   :  { %717 = vmatpush1.bf16.msra.mxu1 %v4880_v48  ;;  %758 = vmatpush1.bf16.msra.mxu0 %v4883_v49  ;;  %v4891_v51 = vld [vmem:[%s6515_s3 + $0x2c] ss:$16 sps:$4 sm:$0xff]   ;;  %v4886_v52 = vld [vmem:[%s6515_s3 + $0x20] ss:$16 sps:$4 sm:$0xff]   ;;  %v4889_v53 = vld [vmem:[%s6515_s3 + $0x28] ss:$16 sps:$4 sm:$0xff]  }
  0x38   :  { %718 = vmatprep.subr.bf16.mxu1 %v4888_v50  ;;  %759 = vmatprep.subr.bf16.mxu0 %v4891_v51  ;;  %v4894_v54 = vld [vmem:[%s6515_s3 + $0x44] ss:$16 sps:$4 sm:$0xff]   ;;  %v4897_v55 = vld [vmem:[%s6515_s3 + $0x4c] ss:$16 sps:$4 sm:$0xff]   ;;  %v4892_v56 = vld [vmem:[%s6515_s3 + $0x40] ss:$16 sps:$4 sm:$0xff]  }
  0x39   :  { %v4895_v57 = vld [vmem:[%s6515_s3 + $0x48] ss:$16 sps:$4 sm:$0xff]   ;;  %v4900_v58 = vld [vmem:[%s6515_s3 + $0x64] ss:$16 sps:$4 sm:$0xff]   ;;  %v4903_v59 = vld [vmem:[%s6515_s3 + $0x6c] ss:$16 sps:$4 sm:$0xff]  }
  0x3a   :  { %v4898_v60 = vld [vmem:[%s6515_s3 + $0x60] ss:$16 sps:$4 sm:$0xff]   ;;  %v4901_v61 = vld [vmem:[%s6515_s3 + $0x68] ss:$16 sps:$4 sm:$0xff]   ;;  %v4906_v62 = vld [vmem:[%s6515_s3 + $0x84] ss:$16 sps:$4 sm:$0xff]  }
  0x3b   :  { %719 = vmatpush1.bf16.msra.mxu1 %v4886_v52  ;;  %760 = vmatpush1.bf16.msra.mxu0 %v4889_v53  ;;  %v4909_v63 = vld [vmem:[%s6515_s3 + $0x8c] ss:$16 sps:$4 sm:$0xff]   ;;  %v5322_v0 = vmov 0   ;;  %s5323_s0 = smov [#allocation2]  }
  0x3c   :  { %720 = vmatprep.subr.bf16.mxu1 %v4894_v54  ;;  %761 = vmatprep.subr.bf16.mxu0 %v4897_v55  ;;  %s3969_s8 = sshll.u32 %s5323_s0, 4  ;;  %s3970_s8 = int_to_ptr.vmem [resolvable:$true] %s3969_s8 }
  0x3d   :  { %748 = vmatprep.mubr.bf16.mxu1 %v5322_v0  ;;  %789 = vmatprep.mubr.bf16.mxu0 %v5322_v0  ;;  %s5298_s9 = scalar_lea.vmem %s3970_s8, 32  ;;  %p5303_p1 = scmp.lt.s32.totalorder %s3970_s8, %s3970_s8 }
  0x3e   :  { %p5299_p0 = scmp.ne.s32.totalorder %s3970_s8, %s5298_s9  ;;  %p5304_p2 = scmp.lt.s32.totalorder %s5298_s9, %s5298_s9 }
  0x3f   :  { %721 = vmatpush1.bf16.msra.mxu1 %v4892_v56  ;;  %762 = vmatpush1.bf16.msra.mxu0 %v4895_v57 }
  0x40   :  { %722 = vmatprep.subr.bf16.mxu1 %v4900_v58  ;;  %763 = vmatprep.subr.bf16.mxu0 %v4903_v59  ;;  %p5305_p3 = por %p5304_p2, %p5303_p1 }
  0x42   :  { %p5306_p4 = pnand %p5305_p3, %p5299_p0 }
  0x43   :  { %723 = vmatpush1.bf16.msra.mxu1 %v4898_v60  ;;  %764 = vmatpush1.bf16.msra.mxu0 %v4901_v61 }
  0x44   :  { %904 = vmatprep.subr.bf16.mxu1 %v4906_v62  ;;  %945 = vmatprep.subr.bf16.mxu0 %v4909_v63 }
  0xf6   :  { %v4602_v1 = vpop.f32.mrb[0].mxu0 }
  0xf7   :  { %v4630_v2 = vpop.f32.mrb[0].mxu1  ;;  %v4603_v3 = vpop.f32.mrb[1].mxu0 }
  0xf8   :  { %v4604_v4 = vadd.f32 %v4603_v3, %v4602_v1  ;;  %v4631_v5 = vpop.f32.mrb[1].mxu1  ;;  %v4605_v6 = vpop.f32.mrb[2].mxu0 }
  0xf9   :  { %v4632_v7 = vadd.f32 %v4631_v5, %v4630_v2  ;;  %v4633_v8 = vpop.f32.mrb[2].mxu1  ;;  %v4606_v9 = vpop.f32.mrb[3].mxu0 }
  0xfa   :  { %v4607_v10 = vadd.f32 %v4606_v9, %v4605_v6  ;;  %v4634_v11 = vpop.f32.mrb[3].mxu1 }
  0xfb   :  { %v4635_v12 = vadd.f32 %v4634_v11, %v4633_v8  ;;  %v469_v13 = vadd.f32 %v4632_v7, %v4604_v4 }
  0xfd   :  { %v472_v14 = vadd.f32 %v4635_v12, %v4607_v10  ;;  %v574_v10 = vlaneseq  ;;  %v567_v12 = vld [vmem:[%s6514_s2] sm:$0x1] }
  0xfe   :  { %v4608_v15 = vpop.f32.mrb[4].mxu0 }
  0xff   :  { %v4636_v16 = vpop.f32.mrb[4].mxu1  ;;  %v4609_v17 = vpop.f32.mrb[5].mxu0  ;;  %v5568_v11 = vshrl.u32 %v574_v10, 7  ;;  %v4964_v10 = vld [vmem:[%s6515_s3 + $0x1c0] ss:$16 sps:$4 sm:$0xff]  }
 0x100   :  { %v4610_v18 = vadd.f32 %v4609_v17, %v4608_v15  ;;  %v4637_v19 = vpop.f32.mrb[5].mxu1  ;;  %v4611_v20 = vpop.f32.mrb[6].mxu0 }
 0x101   :  { %v4638_v21 = vadd.f32 %v4637_v19, %v4636_v16  ;;  %v4639_v22 = vpop.f32.mrb[6].mxu1  ;;  %v4612_v23 = vpop.f32.mrb[7].mxu0  ;;  %v571_v16 = vld [vmem:[%s6514_s2 + $0x1] sm:$0x1] }
 0x102   :  { %v4613_v24 = vadd.f32 %v4612_v23, %v4611_v20  ;;  %v4640_v25 = vpop.f32.mrb[7].mxu1 }
 0x103   :  { %v4641_v26 = vadd.f32 %v4640_v25, %v4639_v22  ;;  %v477_v27 = vadd.f32 %v4638_v21, %v4610_v18 }
 0x105   :  { %v480_v28 = vadd.f32 %v4641_v26, %v4613_v24 }
 0x107   :  { %v4702_v29 = vpop.f32.mrb[8].mxu0 }
 0x108   :  { %v526_v30 = vadd.f32 %v4702_v29, %v477_v27  ;;  %v517_v31 = vpop.f32.mrb[9].mxu0 }
 0x109   :  { %v518_v32 = vadd.f32 %v517_v31, %v469_v13  ;;  %v4703_v33 = vpop.f32.mrb[10].mxu0  ;;  %v5574_v13 = vsub.s32 0, %v5568_v11  ;;  %v4904_v31 = vld [vmem:[%s6515_s3 + $0x80] ss:$16 sps:$4 sm:$0xff]  }
 0x10a   :  { %v529_v34 = vadd.f32 %v4703_v33, %v480_v28  ;;  %v520_v35 = vpop.f32.mrb[11].mxu0  ;;  %v548_v38 = vmul.f32 %v526_v30, %v526_v30  ;;  %v535_v43 = vsel %vm378_vm0, %v526_v30, 0.0  ;;  %v4912_v33 = vld [vmem:[%s6515_s3 + $0xa4] ss:$16 sps:$4 sm:$0xff]  }
 0x10b   :  { %v546_v36 = vmul.f32 %v518_v32, %v518_v32  ;;  %v521_v37 = vadd.f32 %v520_v35, %v472_v14  ;;  %v532_v39 = vsel %vm378_vm0, %v518_v32, 0.0  ;;  %v4910_v35 = vld [vmem:[%s6515_s3 + $0xa0] ss:$16 sps:$4 sm:$0xff]  }
 0x10c   :  { %v549_v45 = vmul.f32 %v529_v34, %v529_v34  ;;  %v553_v49 = vsel %vm378_vm0, %v548_v38, 0.0  ;;  %v537_v50 = vsel %vm378_vm0, %v529_v34, 0.0  ;;  %v4921_v38 = vld [vmem:[%s6515_s3 + $0xcc] ss:$16 sps:$4 sm:$0xff]  }
 0x10d   :  { %v533_v40 = vsel %vm378_vm0, %v521_v37, 0.0  ;;  %v547_v41 = vmul.f32 %v521_v37, %v521_v37  ;;  %v550_v44 = vsel %vm378_vm0, %v546_v36, 0.0  ;;  %v4913_v36 = vld [vmem:[%s6515_s3 + $0xa8] ss:$16 sps:$4 sm:$0xff]  }
 0x10e   :  { %v534_v42 = vadd.f32 %v533_v40, %v532_v39  ;;  %v555_v53 = vsel %vm378_vm0, %v549_v45, 0.0  ;;  %v4916_v39 = vld [vmem:[%s6515_s3 + $0xc0] ss:$16 sps:$4 sm:$0xff]   ;;  %v4919_v40 = vld [vmem:[%s6515_s3 + $0xc8] ss:$16 sps:$4 sm:$0xff]  }
 0x10f   :  { %v551_v46 = vsel %vm378_vm0, %v547_v41, 0.0  ;;  %v4924_v41 = vld [vmem:[%s6515_s3 + $0xe4] ss:$16 sps:$4 sm:$0xff]  }
 0x110   :  { %v536_v47 = vadd.f32 %v535_v43, %v534_v42  ;;  %v552_v48 = vadd.f32 %v551_v46, %v550_v44  ;;  %v4927_v42 = vld [vmem:[%s6515_s3 + $0xec] ss:$16 sps:$4 sm:$0xff]   ;;  %v4922_v43 = vld [vmem:[%s6515_s3 + $0xe0] ss:$16 sps:$4 sm:$0xff]   ;;  %v4925_v44 = vld [vmem:[%s6515_s3 + $0xe8] ss:$16 sps:$4 sm:$0xff]  }
 0x111   :  { %v4930_v45 = vld [vmem:[%s6515_s3 + $0x104] ss:$16 sps:$4 sm:$0xff]   ;;  %v4933_v46 = vld [vmem:[%s6515_s3 + $0x10c] ss:$16 sps:$4 sm:$0xff]  }
 0x112   :  { %v538_v51 = vadd.f32 %v537_v50, %v536_v47  ;;  %v554_v52 = vadd.f32 %v553_v49, %v552_v48  ;;  %v4928_v47 = vld [vmem:[%s6515_s3 + $0x100] ss:$16 sps:$4 sm:$0xff]   ;;  %v4931_v48 = vld [vmem:[%s6515_s3 + $0x108] ss:$16 sps:$4 sm:$0xff]   ;;  %v4936_v50 = vld [vmem:[%s6515_s3 + $0x124] ss:$16 sps:$4 sm:$0xff]  }
 0x114   :  { %v539_v54 = vrot.slane %v538_v51, 4  ;;  %v556_v55 = vadd.f32 %v555_v53, %v554_v52  ;;  %v4934_v52 = vld [vmem:[%s6515_s3 + $0x120] ss:$16 sps:$4 sm:$0xff]   ;;  %v4937_v53 = vld [vmem:[%s6515_s3 + $0x128] ss:$16 sps:$4 sm:$0xff]  }
 0x116   :  { %v540_v56 = vadd.f32 %v539_v54, %v538_v51  ;;  %v557_v57 = vrot.slane %v556_v55, 4  ;;  %v4939_v51 = vld [vmem:[%s6515_s3 + $0x12c] ss:$16 sps:$4 sm:$0xff]   ;;  %v4942_v54 = vld [vmem:[%s6515_s3 + $0x144] ss:$16 sps:$4 sm:$0xff]  }
 0x118   :  { %v541_v58 = vrot.slane %v540_v56, 2  ;;  %v558_v59 = vadd.f32 %v557_v57, %v556_v55  ;;  %v4945_v55 = vld [vmem:[%s6515_s3 + $0x14c] ss:$16 sps:$4 sm:$0xff]   ;;  %v4943_v57 = vld [vmem:[%s6515_s3 + $0x148] ss:$16 sps:$4 sm:$0xff]  }
 0x11a   :  { %v542_v60 = vadd.f32 %v541_v58, %v540_v56  ;;  %v559_v61 = vrot.slane %v558_v59, 2  ;;  %v4940_v56 = vld [vmem:[%s6515_s3 + $0x140] ss:$16 sps:$4 sm:$0xff]   ;;  %v4948_v58 = vld [vmem:[%s6515_s3 + $0x164] ss:$16 sps:$4 sm:$0xff]  }
 0x11c   :  { %v543_v62 = vrot.slane %v542_v60, 1  ;;  %v560_v63 = vadd.f32 %v559_v61, %v558_v59  ;;  %v4951_v59 = vld [vmem:[%s6515_s3 + $0x16c] ss:$16 sps:$4 sm:$0xff]   ;;  %v4949_v61 = vld [vmem:[%s6515_s3 + $0x168] ss:$16 sps:$4 sm:$0xff]  }
 0x11e   :  { %v544_v1 = vadd.f32 %v543_v62, %v542_v60  ;;  %v561_v2 = vrot.slane %v560_v63, 1  ;;  %v4946_v60 = vld [vmem:[%s6515_s3 + $0x160] ss:$16 sps:$4 sm:$0xff]   ;;  %v4954_v62 = vld [vmem:[%s6515_s3 + $0x184] ss:$16 sps:$4 sm:$0xff]  }
 0x120   :  { %v545_v3 = vmul.f32 0.03125, %v544_v1  ;;  %v562_v4 = vadd.f32 %v561_v2, %v560_v63  ;;  %v4957_v63 = vld [vmem:[%s6515_s3 + $0x18c] ss:$16 sps:$4 sm:$0xff]   ;;  %v4952_v1 = vld [vmem:[%s6515_s3 + $0x180] ss:$16 sps:$4 sm:$0xff]  }
 0x121   :  { %v4955_v2 = vld [vmem:[%s6515_s3 + $0x188] ss:$16 sps:$4 sm:$0xff]  }
 0x122   :  { %v563_v5 = vmul.f32 0.03125, %v562_v4  ;;  %v564_v6 = vmul.f32 %v545_v3, %v545_v3  ;;  %v4960_v4 = vld [vmem:[%s6515_s3 + $0x1a4] ss:$16 sps:$4 sm:$0xff]  }
 0x124   :  { %v565_v7 = vsub.f32 %v563_v5, %v564_v6  ;;  %v4963_v5 = vld [vmem:[%s6515_s3 + $0x1ac] ss:$16 sps:$4 sm:$0xff]   ;;  %v4958_v6 = vld [vmem:[%s6515_s3 + $0x1a0] ss:$16 sps:$4 sm:$0xff]  }
 0x126   :  { %v566_v8 = vmax.f32 %v565_v7, 0.0  ;;  %v4961_v7 = vld [vmem:[%s6515_s3 + $0x1a8] ss:$16 sps:$4 sm:$0xff]  }
 0x128   :  { %v568_v9 = vadd.f32 1e-05, %v566_v8  ;;  %v4966_v8 = vld [vmem:[%s6515_s3 + $0x1c4] ss:$16 sps:$4 sm:$0xff]  }
 0x12a   :  { %5296 = vrsqrt.f32 %v568_v9  ;;  %v4969_v9 = vld [vmem:[%s6515_s3 + $0x1cc] ss:$16 sps:$4 sm:$0xff]  }
 0x134   :  { %v5297_v14 = vpop.eup %5296 }
 0x135   :  { %v570_v15 = vmul.f32 %v5297_v14, %v567_v12  ;;  %v4967_v12 = vld [vmem:[%s6515_s3 + $0x1c8] ss:$16 sps:$4 sm:$0xff]   ;;  %v4972_v14 = vld [vmem:[%s6515_s3 + $0x1e4] ss:$16 sps:$4 sm:$0xff]  }
 0x137   :  { %v572_v17 = vmul.f32 %v570_v15, %v545_v3  ;;  %v577_v18 = vrot.slane %v570_v15, %v5574_v13  ;;  %v4975_v15 = vld [vmem:[%s6515_s3 + $0x1ec] ss:$16 sps:$4 sm:$0xff]  }
 0x139   :  { %v573_v19 = vsub.f32 %v571_v16, %v572_v17  ;;  %v579_v20 = vmul.f32 %v577_v18, %v521_v37  ;;  %v578_v21 = vmul.f32 %v577_v18, %v518_v32  ;;  %v580_v22 = vmul.f32 %v577_v18, %v526_v30  ;;  %v4907_v32 = vld [vmem:[%s6515_s3 + $0x88] ss:$16 sps:$4 sm:$0xff]   ;;  %v4918_v37 = vld [vmem:[%s6515_s3 + $0xc4] ss:$16 sps:$4 sm:$0xff]   ;;  %v4970_v16 = vld [vmem:[%s6515_s3 + $0x1e0] ss:$16 sps:$4 sm:$0xff]  }
 0x13a   :  { %v581_v23 = vmul.f32 %v577_v18, %v529_v34  ;;  %v4915_v34 = vld [vmem:[%s6515_s3 + $0xac] ss:$16 sps:$4 sm:$0xff]   ;;  %v4973_v17 = vld [vmem:[%s6515_s3 + $0x1e8] ss:$16 sps:$4 sm:$0xff]   ;;  %v4978_v18 = vld [vmem:[%s6515_s3 + $0x204] ss:$16 sps:$4 sm:$0xff]  }
 0x13b   :  { %v585_v24 = vrot.slane %v573_v19, %v5574_v13  ;;  %v4981_v19 = vld [vmem:[%s6515_s3 + $0x20c] ss:$16 sps:$4 sm:$0xff]  }
 0x13d   :  { %v5581_v25 = vadd.f32 %v585_v24, %v579_v20  ;;  %v586_v26 = vadd.f32 %v585_v24, %v578_v21  ;;  %v5583_v27 = vadd.f32 %v585_v24, %v580_v22  ;;  %v5585_v28 = vadd.f32 %v585_v24, %v581_v23  ;;  %v4976_v20 = vld [vmem:[%s6515_s3 + $0x200] ss:$16 sps:$4 sm:$0xff]   ;;  %v4979_v21 = vld [vmem:[%s6515_s3 + $0x208] ss:$16 sps:$4 sm:$0xff]   ;;  %v4984_v23 = vld [vmem:[%s6515_s3 + $0x224] ss:$16 sps:$4 sm:$0xff]  }
 0x13e   :  { %v4987_v24 = vld [vmem:[%s6515_s3 + $0x22c] ss:$16 sps:$4 sm:$0xff]  }
 0x13f   :  { %v590_v29 = vmax.f32 %v586_v26, 0.0  ;;  %v4982_v26 = vld [vmem:[%s6515_s3 + $0x220] ss:$16 sps:$4 sm:$0xff]  }
 0x141   :  { %v5593_v30 = vpack.c.bf16 %v590_v29, %v590_v29  ;;  %v4985_v29 = vld [vmem:[%s6515_s3 + $0x228] ss:$16 sps:$4 sm:$0xff]  }
 0x143   :  { %4041 = vmatmul.mubr.msk.bf16.vlgmr.msra.gmra.mrb[8].mxu1 %vm378_vm0, %v5593_v30  ;;  %4042 = vmatmul.mubr.msk.bf16.vlgmr.msra.gmra.mrb[12].mxu0 %vm378_vm0, %v5593_v30  ;;  %v820_v49 = vrot.slane %v5593_v30, 1  ;;  %v1007_v3 = vrot.slane %v5593_v30, 2  ;;  %v1194_v22 = vrot.slane %v5593_v30, 3  ;;  %v4988_v30 = vld [vmem:[%s6515_s3 + $0x240] ss:$16 sps:$4 sm:$0xff]  }
 0x144   :  { %905 = vmatpush1.bf16.msra.mxu1 %v4904_v31  ;;  %946 = vmatpush1.bf16.msra.mxu0 %v4907_v32  ;;  %v4990_v31 = vld [vmem:[%s6515_s3 + $0x244] ss:$16 sps:$4 sm:$0xff]   ;;  %v4993_v32 = vld [vmem:[%s6515_s3 + $0x24c] ss:$16 sps:$4 sm:$0xff]  }
 0x145   :  { %906 = vmatprep.subr.bf16.mxu1 %v4912_v33  ;;  %947 = vmatprep.subr.bf16.mxu0 %v4915_v34  ;;  %v4991_v33 = vld [vmem:[%s6515_s3 + $0x248] ss:$16 sps:$4 sm:$0xff]   ;;  %v4996_v34 = vld [vmem:[%s6515_s3 + $0x264] ss:$16 sps:$4 sm:$0xff]  }
 0x146   :  { %936 = vmatprep.mubr.bf16.mxu1 %v5322_v0  ;;  %977 = vmatprep.mubr.bf16.mxu0 %v5322_v0 }
 0x148   :  { %907 = vmatpush1.bf16.msra.mxu1 %v4910_v35  ;;  %948 = vmatpush1.bf16.msra.mxu0 %v4913_v36  ;;  %v4999_v35 = vld [vmem:[%s6515_s3 + $0x26c] ss:$16 sps:$4 sm:$0xff]   ;;  %v4994_v36 = vld [vmem:[%s6515_s3 + $0x260] ss:$16 sps:$4 sm:$0xff]  }
 0x149   :  { %908 = vmatprep.subr.bf16.mxu1 %v4918_v37  ;;  %949 = vmatprep.subr.bf16.mxu0 %v4921_v38  ;;  %v4997_v37 = vld [vmem:[%s6515_s3 + $0x268] ss:$16 sps:$4 sm:$0xff]   ;;  %v591_v38 = vmax.f32 %v5581_v25, 0.0 }
 0x14a   :  { %v5003_v25 = vld [vmem:[%s6515_s3 + $0x288] ss:$16 sps:$4 sm:$0xff]  }
 0x14c   :  { %909 = vmatpush1.bf16.msra.mxu1 %v4916_v39  ;;  %950 = vmatpush1.bf16.msra.mxu0 %v4919_v40  ;;  %v5002_v39 = vld [vmem:[%s6515_s3 + $0x284] ss:$16 sps:$4 sm:$0xff]   ;;  %v5005_v40 = vld [vmem:[%s6515_s3 + $0x28c] ss:$16 sps:$4 sm:$0xff]  }
 0x14d   :  { %910 = vmatprep.subr.bf16.mxu1 %v4924_v41  ;;  %951 = vmatprep.subr.bf16.mxu0 %v4927_v42  ;;  %v5000_v41 = vld [vmem:[%s6515_s3 + $0x280] ss:$16 sps:$4 sm:$0xff]   ;;  %v5809_v42 = vpack.c.bf16 %v591_v38, %v591_v38 }
 0x14e   :  { %v5078_v38 = vld [vmem:[%s6515_s3 + $0x420] ss:$16 sps:$4 sm:$0xff]  }
 0x150   :  { %911 = vmatpush1.bf16.msra.mxu1 %v4922_v43  ;;  %952 = vmatpush1.bf16.msra.mxu0 %v4925_v44  ;;  %v5008_v43 = vld [vmem:[%s6515_s3 + $0x2a4] ss:$16 sps:$4 sm:$0xff]   ;;  %v5011_v44 = vld [vmem:[%s6515_s3 + $0x2ac] ss:$16 sps:$4 sm:$0xff]  }
 0x151   :  { %1091 = vmatprep.subr.bf16.mxu1 %v4930_v45  ;;  %1132 = vmatprep.subr.bf16.mxu0 %v4933_v46  ;;  %v5006_v45 = vld [vmem:[%s6515_s3 + $0x2a0] ss:$16 sps:$4 sm:$0xff]   ;;  %v5009_v46 = vld [vmem:[%s6515_s3 + $0x2a8] ss:$16 sps:$4 sm:$0xff]  }
 0x153   :  { %4075 = vmatmul.mubr.msk.bf16.vlgmr.msra.gmra.mrb[8].mxu1 %vm378_vm0, %v820_v49  ;;  %4076 = vmatmul.mubr.msk.bf16.vlgmr.msra.gmra.mrb[12].mxu0 %vm378_vm0, %v820_v49  ;;  %v5012_v49 = vld [vmem:[%s6515_s3 + $0x2c0] ss:$16 sps:$4 sm:$0xff]  }
 0x154   :  { %1092 = vmatpush1.bf16.msra.mxu1 %v4928_v47  ;;  %1133 = vmatpush1.bf16.msra.mxu0 %v4931_v48  ;;  %v5014_v47 = vld [vmem:[%s6515_s3 + $0x2c4] ss:$16 sps:$4 sm:$0xff]   ;;  %v5017_v48 = vld [vmem:[%s6515_s3 + $0x2cc] ss:$16 sps:$4 sm:$0xff]  }
 0x155   :  { %1093 = vmatprep.subr.bf16.mxu1 %v4936_v50  ;;  %1134 = vmatprep.subr.bf16.mxu0 %v4939_v51  ;;  %v5015_v50 = vld [vmem:[%s6515_s3 + $0x2c8] ss:$16 sps:$4 sm:$0xff]   ;;  %v5020_v51 = vld [vmem:[%s6515_s3 + $0x2e4] ss:$16 sps:$4 sm:$0xff]  }
 0x156   :  { %1123 = vmatprep.mubr.bf16.mxu1 %v5322_v0  ;;  %1164 = vmatprep.mubr.bf16.mxu0 %v5322_v0 }
 0x158   :  { %1094 = vmatpush1.bf16.msra.mxu1 %v4934_v52  ;;  %1135 = vmatpush1.bf16.msra.mxu0 %v4937_v53  ;;  %v5023_v52 = vld [vmem:[%s6515_s3 + $0x2ec] ss:$16 sps:$4 sm:$0xff]   ;;  %v5018_v53 = vld [vmem:[%s6515_s3 + $0x2e0] ss:$16 sps:$4 sm:$0xff]  }
 0x159   :  { %1095 = vmatprep.subr.bf16.mxu1 %v4942_v54  ;;  %1136 = vmatprep.subr.bf16.mxu0 %v4945_v55  ;;  %v5021_v54 = vld [vmem:[%s6515_s3 + $0x2e8] ss:$16 sps:$4 sm:$0xff]   ;;  %v5026_v55 = vld [vmem:[%s6515_s3 + $0x304] ss:$16 sps:$4 sm:$0xff]  }
 0x15c   :  { %1096 = vmatpush1.bf16.msra.mxu1 %v4940_v56  ;;  %1137 = vmatpush1.bf16.msra.mxu0 %v4943_v57  ;;  %v5029_v56 = vld [vmem:[%s6515_s3 + $0x30c] ss:$16 sps:$4 sm:$0xff]   ;;  %v5024_v57 = vld [vmem:[%s6515_s3 + $0x300] ss:$16 sps:$4 sm:$0xff]  }
 0x15d   :  { %1097 = vmatprep.subr.bf16.mxu1 %v4948_v58  ;;  %1138 = vmatprep.subr.bf16.mxu0 %v4951_v59  ;;  %v5027_v58 = vld [vmem:[%s6515_s3 + $0x308] ss:$16 sps:$4 sm:$0xff]   ;;  %v1569_v59 = vrot.slane %v5809_v42, 1 }
 0x160   :  { %1098 = vmatpush1.bf16.msra.mxu1 %v4946_v60  ;;  %1139 = vmatpush1.bf16.msra.mxu0 %v4949_v61  ;;  %v5032_v60 = vld [vmem:[%s6515_s3 + $0x324] ss:$16 sps:$4 sm:$0xff]   ;;  %v5035_v61 = vld [vmem:[%s6515_s3 + $0x32c] ss:$16 sps:$4 sm:$0xff]  }
 0x161   :  { %1278 = vmatprep.subr.bf16.mxu1 %v4954_v62  ;;  %1319 = vmatprep.subr.bf16.mxu0 %v4957_v63  ;;  %v5030_v62 = vld [vmem:[%s6515_s3 + $0x320] ss:$16 sps:$4 sm:$0xff]   ;;  %v5033_v63 = vld [vmem:[%s6515_s3 + $0x328] ss:$16 sps:$4 sm:$0xff]  }
 0x163   :  { %4109 = vmatmul.mubr.msk.bf16.vlgmr.msra.gmra.mrb[8].mxu1 %vm378_vm0, %v1007_v3  ;;  %4110 = vmatmul.mubr.msk.bf16.vlgmr.msra.gmra.mrb[12].mxu0 %vm378_vm0, %v1007_v3  ;;  %v5036_v3 = vld [vmem:[%s6515_s3 + $0x340] ss:$16 sps:$4 sm:$0xff]  }
 0x164   :  { %1279 = vmatpush1.bf16.msra.mxu1 %v4952_v1  ;;  %1320 = vmatpush1.bf16.msra.mxu0 %v4955_v2  ;;  %v5038_v1 = vld [vmem:[%s6515_s3 + $0x344] ss:$16 sps:$4 sm:$0xff]   ;;  %v5041_v2 = vld [vmem:[%s6515_s3 + $0x34c] ss:$16 sps:$4 sm:$0xff]  }
 0x165   :  { %1280 = vmatprep.subr.bf16.mxu1 %v4960_v4  ;;  %1321 = vmatprep.subr.bf16.mxu0 %v4963_v5  ;;  %v5039_v4 = vld [vmem:[%s6515_s3 + $0x348] ss:$16 sps:$4 sm:$0xff]   ;;  %v5044_v5 = vld [vmem:[%s6515_s3 + $0x364] ss:$16 sps:$4 sm:$0xff]  }
 0x166   :  { %1310 = vmatprep.mubr.bf16.mxu1 %v5322_v0  ;;  %1351 = vmatprep.mubr.bf16.mxu0 %v5322_v0 }
 0x168   :  { %1281 = vmatpush1.bf16.msra.mxu1 %v4958_v6  ;;  %1322 = vmatpush1.bf16.msra.mxu0 %v4961_v7  ;;  %v5047_v6 = vld [vmem:[%s6515_s3 + $0x36c] ss:$16 sps:$4 sm:$0xff]   ;;  %v5042_v7 = vld [vmem:[%s6515_s3 + $0x360] ss:$16 sps:$4 sm:$0xff]  }
 0x169   :  { %1282 = vmatprep.subr.bf16.mxu1 %v4966_v8  ;;  %1323 = vmatprep.subr.bf16.mxu0 %v4969_v9  ;;  %v5045_v8 = vld [vmem:[%s6515_s3 + $0x368] ss:$16 sps:$4 sm:$0xff]   ;;  %v5050_v9 = vld [vmem:[%s6515_s3 + $0x384] ss:$16 sps:$4 sm:$0xff]  }
 0x16c   :  { %1283 = vmatpush1.bf16.msra.mxu1 %v4964_v10  ;;  %1324 = vmatpush1.bf16.msra.mxu0 %v4967_v12  ;;  %v5053_v10 = vld [vmem:[%s6515_s3 + $0x38c] ss:$16 sps:$4 sm:$0xff]   ;;  %v5048_v12 = vld [vmem:[%s6515_s3 + $0x380] ss:$16 sps:$4 sm:$0xff]  }
 0x16d   :  { %1284 = vmatprep.subr.bf16.mxu1 %v4972_v14  ;;  %1325 = vmatprep.subr.bf16.mxu0 %v4975_v15  ;;  %v5051_v14 = vld [vmem:[%s6515_s3 + $0x388] ss:$16 sps:$4 sm:$0xff]   ;;  %v1756_v15 = vrot.slane %v5809_v42, 2 }
 0x170   :  { %1285 = vmatpush1.bf16.msra.mxu1 %v4970_v16  ;;  %1326 = vmatpush1.bf16.msra.mxu0 %v4973_v17  ;;  %v5056_v16 = vld [vmem:[%s6515_s3 + $0x3a4] ss:$16 sps:$4 sm:$0xff]   ;;  %v5059_v17 = vld [vmem:[%s6515_s3 + $0x3ac] ss:$16 sps:$4 sm:$0xff]  }
 0x171   :  { %1465 = vmatprep.subr.bf16.mxu1 %v4978_v18  ;;  %1506 = vmatprep.subr.bf16.mxu0 %v4981_v19  ;;  %v5054_v18 = vld [vmem:[%s6515_s3 + $0x3a0] ss:$16 sps:$4 sm:$0xff]   ;;  %v5057_v19 = vld [vmem:[%s6515_s3 + $0x3a8] ss:$16 sps:$4 sm:$0xff]  }
 0x173   :  { %4143 = vmatmul.mubr.msk.bf16.vlgmr.msra.gmra.mrb[8].mxu1 %vm378_vm0, %v1194_v22  ;;  %4144 = vmatmul.mubr.msk.bf16.vlgmr.msra.gmra.mrb[12].mxu0 %vm378_vm0, %v1194_v22  ;;  %v5060_v22 = vld [vmem:[%s6515_s3 + $0x3c0] ss:$16 sps:$4 sm:$0xff]  }
 0x174   :  { %1466 = vmatpush1.bf16.msra.mxu1 %v4976_v20  ;;  %1507 = vmatpush1.bf16.msra.mxu0 %v4979_v21  ;;  %v5062_v20 = vld [vmem:[%s6515_s3 + $0x3c4] ss:$16 sps:$4 sm:$0xff]   ;;  %v5065_v21 = vld [vmem:[%s6515_s3 + $0x3cc] ss:$16 sps:$4 sm:$0xff]  }
 0x175   :  { %1467 = vmatprep.subr.bf16.mxu1 %v4984_v23  ;;  %1508 = vmatprep.subr.bf16.mxu0 %v4987_v24  ;;  %v5063_v23 = vld [vmem:[%s6515_s3 + $0x3c8] ss:$16 sps:$4 sm:$0xff]   ;;  %v5068_v24 = vld [vmem:[%s6515_s3 + $0x3e4] ss:$16 sps:$4 sm:$0xff]  }
 0x176   :  { %1497 = vmatprep.mubr.bf16.mxu1 %v5322_v0  ;;  %1538 = vmatprep.mubr.bf16.mxu0 %v5322_v0 }
 0x178   :  { %1468 = vmatpush1.bf16.msra.mxu1 %v4982_v26  ;;  %1509 = vmatpush1.bf16.msra.mxu0 %v4985_v29  ;;  %v5071_v26 = vld [vmem:[%s6515_s3 + $0x3ec] ss:$16 sps:$4 sm:$0xff]   ;;  %v5066_v29 = vld [vmem:[%s6515_s3 + $0x3e0] ss:$16 sps:$4 sm:$0xff]  }
 0x179   :  { %1469 = vmatprep.subr.bf16.mxu1 %v4990_v31  ;;  %1510 = vmatprep.subr.bf16.mxu0 %v4993_v32  ;;  %v5069_v31 = vld [vmem:[%s6515_s3 + $0x3e8] ss:$16 sps:$4 sm:$0xff]   ;;  %v5074_v32 = vld [vmem:[%s6515_s3 + $0x404] ss:$16 sps:$4 sm:$0xff]  }
 0x17c   :  { %1470 = vmatpush1.bf16.msra.mxu1 %v4988_v30  ;;  %1511 = vmatpush1.bf16.msra.mxu0 %v4991_v33  ;;  %v5077_v30 = vld [vmem:[%s6515_s3 + $0x40c] ss:$16 sps:$4 sm:$0xff]   ;;  %v5072_v33 = vld [vmem:[%s6515_s3 + $0x400] ss:$16 sps:$4 sm:$0xff]  }
 0x17d   :  { %1471 = vmatprep.subr.bf16.mxu1 %v4996_v34  ;;  %1512 = vmatprep.subr.bf16.mxu0 %v4999_v35  ;;  %v5075_v34 = vld [vmem:[%s6515_s3 + $0x408] ss:$16 sps:$4 sm:$0xff]   ;;  %v1943_v35 = vrot.slane %v5809_v42, 3 }
 0x180   :  { %1472 = vmatpush1.bf16.msra.mxu1 %v4994_v36  ;;  %1513 = vmatpush1.bf16.msra.mxu0 %v4997_v37  ;;  %v5080_v36 = vld [vmem:[%s6515_s3 + $0x424] ss:$16 sps:$4 sm:$0xff]   ;;  %v5083_v37 = vld [vmem:[%s6515_s3 + $0x42c] ss:$16 sps:$4 sm:$0xff]  }
 0x181   :  { %1653 = vmatprep.subr.bf16.mxu1 %v5002_v39  ;;  %1694 = vmatprep.subr.bf16.mxu0 %v5005_v40  ;;  %v5081_v39 = vld [vmem:[%s6515_s3 + $0x428] ss:$16 sps:$4 sm:$0xff]   ;;  %v5086_v40 = vld [vmem:[%s6515_s3 + $0x444] ss:$16 sps:$4 sm:$0xff]  }
 0x183   :  { %4177 = vmatmul.mubr.msk.bf16.vlgmr.msra.gmra.mrb[8].mxu1 %vm378_vm0, %v5809_v42  ;;  %4178 = vmatmul.mubr.msk.bf16.vlgmr.msra.gmra.mrb[12].mxu0 %vm378_vm0, %v5809_v42  ;;  %v5087_v42 = vld [vmem:[%s6515_s3 + $0x448] ss:$16 sps:$4 sm:$0xff]  }
 0x184   :  { %1654 = vmatpush1.bf16.msra.mxu1 %v5000_v41  ;;  %1695 = vmatpush1.bf16.msra.mxu0 %v5003_v25  ;;  %v5089_v41 = vld [vmem:[%s6515_s3 + $0x44c] ss:$16 sps:$4 sm:$0xff]   ;;  %v5084_v25 = vld [vmem:[%s6515_s3 + $0x440] ss:$16 sps:$4 sm:$0xff]  }
 0x185   :  { %1655 = vmatprep.subr.bf16.mxu1 %v5008_v43  ;;  %1696 = vmatprep.subr.bf16.mxu0 %v5011_v44  ;;  %v5092_v43 = vld [vmem:[%s6515_s3 + $0x464] ss:$16 sps:$4 sm:$0xff]   ;;  %v5095_v44 = vld [vmem:[%s6515_s3 + $0x46c] ss:$16 sps:$4 sm:$0xff]  }
 0x186   :  { %1685 = vmatprep.mubr.bf16.mxu1 %v5322_v0  ;;  %1726 = vmatprep.mubr.bf16.mxu0 %v5322_v0 }
 0x188   :  { %1656 = vmatpush1.bf16.msra.mxu1 %v5006_v45  ;;  %1697 = vmatpush1.bf16.msra.mxu0 %v5009_v46  ;;  %v5090_v45 = vld [vmem:[%s6515_s3 + $0x460] ss:$16 sps:$4 sm:$0xff]   ;;  %v5093_v46 = vld [vmem:[%s6515_s3 + $0x468] ss:$16 sps:$4 sm:$0xff]  }
 0x189   :  { %1657 = vmatprep.subr.bf16.mxu1 %v5014_v47  ;;  %1698 = vmatprep.subr.bf16.mxu0 %v5017_v48  ;;  %v592_v47 = vmax.f32 %v5583_v27, 0.0  ;;  %v5098_v48 = vld [vmem:[%s6515_s3 + $0x484] ss:$16 sps:$4 sm:$0xff]  }
 0x18a   :  { %v5104_v27 = vld [vmem:[%s6515_s3 + $0x4a4] ss:$16 sps:$4 sm:$0xff]  }
 0x18c   :  { %1658 = vmatpush1.bf16.msra.mxu1 %v5012_v49  ;;  %1699 = vmatpush1.bf16.msra.mxu0 %v5015_v50  ;;  %v5101_v49 = vld [vmem:[%s6515_s3 + $0x48c] ss:$16 sps:$4 sm:$0xff]   ;;  %v5096_v50 = vld [vmem:[%s6515_s3 + $0x480] ss:$16 sps:$4 sm:$0xff]  }
 0x18d   :  { %1659 = vmatprep.subr.bf16.mxu1 %v5020_v51  ;;  %1700 = vmatprep.subr.bf16.mxu0 %v5023_v52  ;;  %v5099_v51 = vld [vmem:[%s6515_s3 + $0x488] ss:$16 sps:$4 sm:$0xff]   ;;  %v6025_v52 = vpack.c.bf16 %v592_v47, %v592_v47 }
 0x18e   :  { %v5177_v47 = vld [vmem:[%s6515_s3 + $0x628] ss:$16 sps:$4 sm:$0xff]  }
 0x190   :  { %1660 = vmatpush1.bf16.msra.mxu1 %v5018_v53  ;;  %1701 = vmatpush1.bf16.msra.mxu0 %v5021_v54  ;;  %v5107_v53 = vld [vmem:[%s6515_s3 + $0x4ac] ss:$16 sps:$4 sm:$0xff]   ;;  %v5102_v54 = vld [vmem:[%s6515_s3 + $0x4a0] ss:$16 sps:$4 sm:$0xff]  }
 0x191   :  { %1840 = vmatprep.subr.bf16.mxu1 %v5026_v55  ;;  %1881 = vmatprep.subr.bf16.mxu0 %v5029_v56  ;;  %v5105_v55 = vld [vmem:[%s6515_s3 + $0x4a8] ss:$16 sps:$4 sm:$0xff]   ;;  %v5110_v56 = vld [vmem:[%s6515_s3 + $0x4c4] ss:$16 sps:$4 sm:$0xff]  }
 0x193   :  { %4211 = vmatmul.mubr.msk.bf16.vlgmr.msra.gmra.mrb[8].mxu1 %vm378_vm0, %v1569_v59  ;;  %4212 = vmatmul.mubr.msk.bf16.vlgmr.msra.gmra.mrb[12].mxu0 %vm378_vm0, %v1569_v59  ;;  %v5111_v59 = vld [vmem:[%s6515_s3 + $0x4c8] ss:$16 sps:$4 sm:$0xff]  }
 0x194   :  { %1841 = vmatpush1.bf16.msra.mxu1 %v5024_v57  ;;  %1882 = vmatpush1.bf16.msra.mxu0 %v5027_v58  ;;  %v5113_v57 = vld [vmem:[%s6515_s3 + $0x4cc] ss:$16 sps:$4 sm:$0xff]   ;;  %v5108_v58 = vld [vmem:[%s6515_s3 + $0x4c0] ss:$16 sps:$4 sm:$0xff]  }
 0x195   :  { %1842 = vmatprep.subr.bf16.mxu1 %v5032_v60  ;;  %1883 = vmatprep.subr.bf16.mxu0 %v5035_v61  ;;  %v5116_v60 = vld [vmem:[%s6515_s3 + $0x4e4] ss:$16 sps:$4 sm:$0xff]   ;;  %v5119_v61 = vld [vmem:[%s6515_s3 + $0x4ec] ss:$16 sps:$4 sm:$0xff]  }
 0x196   :  { %1872 = vmatprep.mubr.bf16.mxu1 %v5322_v0  ;;  %1913 = vmatprep.mubr.bf16.mxu0 %v5322_v0 }
 0x198   :  { %1843 = vmatpush1.bf16.msra.mxu1 %v5030_v62  ;;  %1884 = vmatpush1.bf16.msra.mxu0 %v5033_v63  ;;  %v5114_v62 = vld [vmem:[%s6515_s3 + $0x4e0] ss:$16 sps:$4 sm:$0xff]   ;;  %v5117_v63 = vld [vmem:[%s6515_s3 + $0x4e8] ss:$16 sps:$4 sm:$0xff]  }
 0x199   :  { %1844 = vmatprep.subr.bf16.mxu1 %v5038_v1  ;;  %1885 = vmatprep.subr.bf16.mxu0 %v5041_v2  ;;  %v5122_v1 = vld [vmem:[%s6515_s3 + $0x504] ss:$16 sps:$4 sm:$0xff]   ;;  %v5125_v2 = vld [vmem:[%s6515_s3 + $0x50c] ss:$16 sps:$4 sm:$0xff]  }
 0x19c   :  { %1845 = vmatpush1.bf16.msra.mxu1 %v5036_v3  ;;  %1886 = vmatpush1.bf16.msra.mxu0 %v5039_v4  ;;  %v5120_v3 = vld [vmem:[%s6515_s3 + $0x500] ss:$16 sps:$4 sm:$0xff]   ;;  %v5123_v4 = vld [vmem:[%s6515_s3 + $0x508] ss:$16 sps:$4 sm:$0xff]  }
 0x19d   :  { %1846 = vmatprep.subr.bf16.mxu1 %v5044_v5  ;;  %1887 = vmatprep.subr.bf16.mxu0 %v5047_v6  ;;  %v2318_v5 = vrot.slane %v6025_v52, 1  ;;  %v5128_v6 = vld [vmem:[%s6515_s3 + $0x524] ss:$16 sps:$4 sm:$0xff]  }
 0x1a0   :  { %1847 = vmatpush1.bf16.msra.mxu1 %v5042_v7  ;;  %1888 = vmatpush1.bf16.msra.mxu0 %v5045_v8  ;;  %v5131_v7 = vld [vmem:[%s6515_s3 + $0x52c] ss:$16 sps:$4 sm:$0xff]   ;;  %v5126_v8 = vld [vmem:[%s6515_s3 + $0x520] ss:$16 sps:$4 sm:$0xff]  }
 0x1a1   :  { %2027 = vmatprep.subr.bf16.mxu1 %v5050_v9  ;;  %2068 = vmatprep.subr.bf16.mxu0 %v5053_v10  ;;  %v5129_v9 = vld [vmem:[%s6515_s3 + $0x528] ss:$16 sps:$4 sm:$0xff]   ;;  %v5134_v10 = vld [vmem:[%s6515_s3 + $0x544] ss:$16 sps:$4 sm:$0xff]  }
 0x1a3   :  { %4245 = vmatmul.mubr.msk.bf16.vlgmr.msra.gmra.mrb[8].mxu1 %vm378_vm0, %v1756_v15  ;;  %4246 = vmatmul.mubr.msk.bf16.vlgmr.msra.gmra.mrb[12].mxu0 %vm378_vm0, %v1756_v15  ;;  %v5135_v15 = vld [vmem:[%s6515_s3 + $0x548] ss:$16 sps:$4 sm:$0xff]  }
 0x1a4   :  { %2028 = vmatpush1.bf16.msra.mxu1 %v5048_v12  ;;  %2069 = vmatpush1.bf16.msra.mxu0 %v5051_v14  ;;  %v5137_v12 = vld [vmem:[%s6515_s3 + $0x54c] ss:$16 sps:$4 sm:$0xff]   ;;  %v5132_v14 = vld [vmem:[%s6515_s3 + $0x540] ss:$16 sps:$4 sm:$0xff]  }
 0x1a5   :  { %2029 = vmatprep.subr.bf16.mxu1 %v5056_v16  ;;  %2070 = vmatprep.subr.bf16.mxu0 %v5059_v17  ;;  %v5140_v16 = vld [vmem:[%s6515_s3 + $0x564] ss:$16 sps:$4 sm:$0xff]   ;;  %v5143_v17 = vld [vmem:[%s6515_s3 + $0x56c] ss:$16 sps:$4 sm:$0xff]  }
 0x1a6   :  { %2059 = vmatprep.mubr.bf16.mxu1 %v5322_v0  ;;  %2100 = vmatprep.mubr.bf16.mxu0 %v5322_v0 }
 0x1a8   :  { %2030 = vmatpush1.bf16.msra.mxu1 %v5054_v18  ;;  %2071 = vmatpush1.bf16.msra.mxu0 %v5057_v19  ;;  %v5138_v18 = vld [vmem:[%s6515_s3 + $0x560] ss:$16 sps:$4 sm:$0xff]   ;;  %v5141_v19 = vld [vmem:[%s6515_s3 + $0x568] ss:$16 sps:$4 sm:$0xff]  }
 0x1a9   :  { %2031 = vmatprep.subr.bf16.mxu1 %v5062_v20  ;;  %2072 = vmatprep.subr.bf16.mxu0 %v5065_v21  ;;  %v5146_v20 = vld [vmem:[%s6515_s3 + $0x584] ss:$16 sps:$4 sm:$0xff]   ;;  %v5149_v21 = vld [vmem:[%s6515_s3 + $0x58c] ss:$16 sps:$4 sm:$0xff]  }
 0x1ac   :  { %2032 = vmatpush1.bf16.msra.mxu1 %v5060_v22  ;;  %2073 = vmatpush1.bf16.msra.mxu0 %v5063_v23  ;;  %v5144_v22 = vld [vmem:[%s6515_s3 + $0x580] ss:$16 sps:$4 sm:$0xff]   ;;  %v5147_v23 = vld [vmem:[%s6515_s3 + $0x588] ss:$16 sps:$4 sm:$0xff]  }
 0x1ad   :  { %2033 = vmatprep.subr.bf16.mxu1 %v5068_v24  ;;  %2074 = vmatprep.subr.bf16.mxu0 %v5071_v26  ;;  %v2505_v24 = vrot.slane %v6025_v52, 2  ;;  %v5152_v26 = vld [vmem:[%s6515_s3 + $0x5a4] ss:$16 sps:$4 sm:$0xff]  }
 0x1b0   :  { %2034 = vmatpush1.bf16.msra.mxu1 %v5066_v29  ;;  %2075 = vmatpush1.bf16.msra.mxu0 %v5069_v31  ;;  %v5155_v29 = vld [vmem:[%s6515_s3 + $0x5ac] ss:$16 sps:$4 sm:$0xff]   ;;  %v5150_v31 = vld [vmem:[%s6515_s3 + $0x5a0] ss:$16 sps:$4 sm:$0xff]  }
 0x1b1   :  { %2214 = vmatprep.subr.bf16.mxu1 %v5074_v32  ;;  %2255 = vmatprep.subr.bf16.mxu0 %v5077_v30  ;;  %v5153_v32 = vld [vmem:[%s6515_s3 + $0x5a8] ss:$16 sps:$4 sm:$0xff]   ;;  %v5158_v30 = vld [vmem:[%s6515_s3 + $0x5c4] ss:$16 sps:$4 sm:$0xff]  }
 0x1b3   :  { %4279 = vmatmul.mubr.msk.bf16.vlgmr.msra.gmra.mrb[8].mxu1 %vm378_vm0, %v1943_v35  ;;  %4280 = vmatmul.mubr.msk.bf16.vlgmr.msra.gmra.mrb[12].mxu0 %vm378_vm0, %v1943_v35  ;;  %v5159_v35 = vld [vmem:[%s6515_s3 + $0x5c8] ss:$16 sps:$4 sm:$0xff]  }
 0x1b4   :  { %2215 = vmatpush1.bf16.msra.mxu1 %v5072_v33  ;;  %2256 = vmatpush1.bf16.msra.mxu0 %v5075_v34  ;;  %v5161_v33 = vld [vmem:[%s6515_s3 + $0x5cc] ss:$16 sps:$4 sm:$0xff]   ;;  %v5156_v34 = vld [vmem:[%s6515_s3 + $0x5c0] ss:$16 sps:$4 sm:$0xff]  }
 0x1b5   :  { %2216 = vmatprep.subr.bf16.mxu1 %v5080_v36  ;;  %2257 = vmatprep.subr.bf16.mxu0 %v5083_v37  ;;  %v5164_v36 = vld [vmem:[%s6515_s3 + $0x5e4] ss:$16 sps:$4 sm:$0xff]   ;;  %v5167_v37 = vld [vmem:[%s6515_s3 + $0x5ec] ss:$16 sps:$4 sm:$0xff]  }
 0x1b6   :  { %2246 = vmatprep.mubr.bf16.mxu1 %v5322_v0  ;;  %2287 = vmatprep.mubr.bf16.mxu0 %v5322_v0 }
 0x1b8   :  { %2217 = vmatpush1.bf16.msra.mxu1 %v5078_v38  ;;  %2258 = vmatpush1.bf16.msra.mxu0 %v5081_v39  ;;  %v5162_v38 = vld [vmem:[%s6515_s3 + $0x5e0] ss:$16 sps:$4 sm:$0xff]   ;;  %v5165_v39 = vld [vmem:[%s6515_s3 + $0x5e8] ss:$16 sps:$4 sm:$0xff]  }
 0x1b9   :  { %2218 = vmatprep.subr.bf16.mxu1 %v5086_v40  ;;  %2259 = vmatprep.subr.bf16.mxu0 %v5089_v41  ;;  %v5170_v40 = vld [vmem:[%s6515_s3 + $0x604] ss:$16 sps:$4 sm:$0xff]   ;;  %v5173_v41 = vld [vmem:[%s6515_s3 + $0x60c] ss:$16 sps:$4 sm:$0xff]  }
 0x1bc   :  { %2219 = vmatpush1.bf16.msra.mxu1 %v5084_v25  ;;  %2260 = vmatpush1.bf16.msra.mxu0 %v5087_v42  ;;  %v5168_v25 = vld [vmem:[%s6515_s3 + $0x600] ss:$16 sps:$4 sm:$0xff]   ;;  %v5171_v42 = vld [vmem:[%s6515_s3 + $0x608] ss:$16 sps:$4 sm:$0xff]  }
 0x1bd   :  { %2220 = vmatprep.subr.bf16.mxu1 %v5092_v43  ;;  %2261 = vmatprep.subr.bf16.mxu0 %v5095_v44  ;;  %v2692_v43 = vrot.slane %v6025_v52, 3  ;;  %v5176_v44 = vld [vmem:[%s6515_s3 + $0x624] ss:$16 sps:$4 sm:$0xff]  }
 0x1c0   :  { %2221 = vmatpush1.bf16.msra.mxu1 %v5090_v45  ;;  %2262 = vmatpush1.bf16.msra.mxu0 %v5093_v46  ;;  %v5179_v45 = vld [vmem:[%s6515_s3 + $0x62c] ss:$16 sps:$4 sm:$0xff]   ;;  %v5174_v46 = vld [vmem:[%s6515_s3 + $0x620] ss:$16 sps:$4 sm:$0xff]  }
 0x1c1   :  { %2402 = vmatprep.subr.bf16.mxu1 %v5098_v48  ;;  %2443 = vmatprep.subr.bf16.mxu0 %v5101_v49  ;;  %v5182_v48 = vld [vmem:[%s6515_s3 + $0x644] ss:$16 sps:$4 sm:$0xff]   ;;  %v5185_v49 = vld [vmem:[%s6515_s3 + $0x64c] ss:$16 sps:$4 sm:$0xff]  }
 0x1c3   :  { %4313 = vmatmul.mubr.msk.bf16.vlgmr.msra.gmra.mrb[8].mxu1 %vm378_vm0, %v6025_v52  ;;  %4314 = vmatmul.mubr.msk.bf16.vlgmr.msra.gmra.mrb[12].mxu0 %vm378_vm0, %v6025_v52  ;;  %v5188_v52 = vld [vmem:[%s6515_s3 + $0x664] ss:$16 sps:$4 sm:$0xff]  }
 0x1c4   :  { %2403 = vmatpush1.bf16.msra.mxu1 %v5096_v50  ;;  %2444 = vmatpush1.bf16.msra.mxu0 %v5099_v51  ;;  %v5180_v50 = vld [vmem:[%s6515_s3 + $0x640] ss:$16 sps:$4 sm:$0xff]   ;;  %v5183_v51 = vld [vmem:[%s6515_s3 + $0x648] ss:$16 sps:$4 sm:$0xff]  }
 0x1c5   :  { %2404 = vmatprep.subr.bf16.mxu1 %v5104_v27  ;;  %2445 = vmatprep.subr.bf16.mxu0 %v5107_v53  ;;  %v5191_v27 = vld [vmem:[%s6515_s3 + $0x66c] ss:$16 sps:$4 sm:$0xff]   ;;  %v5186_v53 = vld [vmem:[%s6515_s3 + $0x660] ss:$16 sps:$4 sm:$0xff]  }
 0x1c6   :  { %2434 = vmatprep.mubr.bf16.mxu1 %v5322_v0  ;;  %2475 = vmatprep.mubr.bf16.mxu0 %v5322_v0 }
 0x1c8   :  { %2405 = vmatpush1.bf16.msra.mxu1 %v5102_v54  ;;  %2446 = vmatpush1.bf16.msra.mxu0 %v5105_v55  ;;  %v5189_v54 = vld [vmem:[%s6515_s3 + $0x668] ss:$16 sps:$4 sm:$0xff]   ;;  %v593_v55 = vmax.f32 %v5585_v28, 0.0  ;;  %v5200_v28 = vld [vmem:[%s6515_s3 + $0x6a4] ss:$16 sps:$4 sm:$0xff]  }
 0x1c9   :  { %2406 = vmatprep.subr.bf16.mxu1 %v5110_v56  ;;  %2447 = vmatprep.subr.bf16.mxu0 %v5113_v57  ;;  %v5194_v56 = vld [vmem:[%s6515_s3 + $0x684] ss:$16 sps:$4 sm:$0xff]   ;;  %v5197_v57 = vld [vmem:[%s6515_s3 + $0x68c] ss:$16 sps:$4 sm:$0xff]  }
 0x1cc   :  { %2407 = vmatpush1.bf16.msra.mxu1 %v5108_v58  ;;  %2448 = vmatpush1.bf16.msra.mxu0 %v5111_v59  ;;  %v5192_v58 = vld [vmem:[%s6515_s3 + $0x680] ss:$16 sps:$4 sm:$0xff]   ;;  %v5195_v59 = vld [vmem:[%s6515_s3 + $0x688] ss:$16 sps:$4 sm:$0xff]  }
 0x1cd   :  { %2408 = vmatprep.subr.bf16.mxu1 %v5116_v60  ;;  %2449 = vmatprep.subr.bf16.mxu0 %v5119_v61  ;;  %v6241_v60 = vpack.c.bf16 %v593_v55, %v593_v55  ;;  %v5203_v61 = vld [vmem:[%s6515_s3 + $0x6ac] ss:$16 sps:$4 sm:$0xff]   ;;  %v5273_v55 = vld [vmem:[%s6517_s5 + $0xd0] sm:$0xff]  }
 0x1d0   :  { %2409 = vmatpush1.bf16.msra.mxu1 %v5114_v62  ;;  %2450 = vmatpush1.bf16.msra.mxu0 %v5117_v63  ;;  %v5198_v62 = vld [vmem:[%s6515_s3 + $0x6a0] ss:$16 sps:$4 sm:$0xff]   ;;  %v5201_v63 = vld [vmem:[%s6515_s3 + $0x6a8] ss:$16 sps:$4 sm:$0xff]  }
 0x1d1   :  { %2589 = vmatprep.subr.bf16.mxu1 %v5122_v1  ;;  %2630 = vmatprep.subr.bf16.mxu0 %v5125_v2  ;;  %v5206_v1 = vld [vmem:[%s6515_s3 + $0x6c4] ss:$16 sps:$4 sm:$0xff]   ;;  %v5209_v2 = vld [vmem:[%s6515_s3 + $0x6cc] ss:$16 sps:$4 sm:$0xff]  }
 0x1d3   :  { %4347 = vmatmul.mubr.msk.bf16.vlgmr.msra.gmra.mrb[8].mxu1 %vm378_vm0, %v2318_v5  ;;  %4348 = vmatmul.mubr.msk.bf16.vlgmr.msra.gmra.mrb[12].mxu0 %vm378_vm0, %v2318_v5  ;;  %v5212_v5 = vld [vmem:[%s6515_s3 + $0x6e4] ss:$16 sps:$4 sm:$0xff]  }
 0x1d4   :  { %2590 = vmatpush1.bf16.msra.mxu1 %v5120_v3  ;;  %2631 = vmatpush1.bf16.msra.mxu0 %v5123_v4  ;;  %v5204_v3 = vld [vmem:[%s6515_s3 + $0x6c0] ss:$16 sps:$4 sm:$0xff]   ;;  %v5207_v4 = vld [vmem:[%s6515_s3 + $0x6c8] ss:$16 sps:$4 sm:$0xff]  }
 0x1d5   :  { %2591 = vmatprep.subr.bf16.mxu1 %v5128_v6  ;;  %2632 = vmatprep.subr.bf16.mxu0 %v5131_v7  ;;  %v5215_v6 = vld [vmem:[%s6515_s3 + $0x6ec] ss:$16 sps:$4 sm:$0xff]   ;;  %v5210_v7 = vld [vmem:[%s6515_s3 + $0x6e0] ss:$16 sps:$4 sm:$0xff]  }
 0x1d6   :  { %2621 = vmatprep.mubr.bf16.mxu1 %v5322_v0  ;;  %2662 = vmatprep.mubr.bf16.mxu0 %v5322_v0 }
 0x1d8   :  { %2592 = vmatpush1.bf16.msra.mxu1 %v5126_v8  ;;  %2633 = vmatpush1.bf16.msra.mxu0 %v5129_v9  ;;  %v5213_v8 = vld [vmem:[%s6515_s3 + $0x6e8] ss:$16 sps:$4 sm:$0xff]   ;;  %v5218_v9 = vld [vmem:[%s6515_s3 + $0x704] ss:$16 sps:$4 sm:$0xff]  }
 0x1d9   :  { %2593 = vmatprep.subr.bf16.mxu1 %v5134_v10  ;;  %2634 = vmatprep.subr.bf16.mxu0 %v5137_v12  ;;  %v5221_v10 = vld [vmem:[%s6515_s3 + $0x70c] ss:$16 sps:$4 sm:$0xff]   ;;  %v5216_v12 = vld [vmem:[%s6515_s3 + $0x700] ss:$16 sps:$4 sm:$0xff]  }
 0x1dc   :  { %2594 = vmatpush1.bf16.msra.mxu1 %v5132_v14  ;;  %2635 = vmatpush1.bf16.msra.mxu0 %v5135_v15  ;;  %v5219_v14 = vld [vmem:[%s6515_s3 + $0x708] ss:$16 sps:$4 sm:$0xff]   ;;  %v3067_v15 = vrot.slane %v6241_v60, 1 }
 0x1dd   :  { %2595 = vmatprep.subr.bf16.mxu1 %v5140_v16  ;;  %2636 = vmatprep.subr.bf16.mxu0 %v5143_v17  ;;  %v5224_v16 = vld [vmem:[%s6515_s3 + $0x724] ss:$16 sps:$4 sm:$0xff]   ;;  %v5227_v17 = vld [vmem:[%s6515_s3 + $0x72c] ss:$16 sps:$4 sm:$0xff]  }
 0x1e0   :  { %2596 = vmatpush1.bf16.msra.mxu1 %v5138_v18  ;;  %2637 = vmatpush1.bf16.msra.mxu0 %v5141_v19  ;;  %v5222_v18 = vld [vmem:[%s6515_s3 + $0x720] ss:$16 sps:$4 sm:$0xff]   ;;  %v5225_v19 = vld [vmem:[%s6515_s3 + $0x728] ss:$16 sps:$4 sm:$0xff]  }
 0x1e1   :  { %2776 = vmatprep.subr.bf16.mxu1 %v5146_v20  ;;  %2817 = vmatprep.subr.bf16.mxu0 %v5149_v21  ;;  %v5230_v20 = vld [vmem:[%s6515_s3 + $0x744] ss:$16 sps:$4 sm:$0xff]   ;;  %v5233_v21 = vld [vmem:[%s6515_s3 + $0x74c] ss:$16 sps:$4 sm:$0xff]  }
 0x1e3   :  { %4381 = vmatmul.mubr.msk.bf16.vlgmr.msra.gmra.mrb[8].mxu1 %vm378_vm0, %v2505_v24  ;;  %4382 = vmatmul.mubr.msk.bf16.vlgmr.msra.gmra.mrb[12].mxu0 %vm378_vm0, %v2505_v24  ;;  %v5236_v24 = vld [vmem:[%s6515_s3 + $0x764] ss:$16 sps:$4 sm:$0xff]  }
 0x1e4   :  { %2777 = vmatpush1.bf16.msra.mxu1 %v5144_v22  ;;  %2818 = vmatpush1.bf16.msra.mxu0 %v5147_v23  ;;  %v5228_v22 = vld [vmem:[%s6515_s3 + $0x740] ss:$16 sps:$4 sm:$0xff]   ;;  %v5231_v23 = vld [vmem:[%s6515_s3 + $0x748] ss:$16 sps:$4 sm:$0xff]  }
 0x1e5   :  { %2778 = vmatprep.subr.bf16.mxu1 %v5152_v26  ;;  %2819 = vmatprep.subr.bf16.mxu0 %v5155_v29  ;;  %v5239_v26 = vld [vmem:[%s6515_s3 + $0x76c] ss:$16 sps:$4 sm:$0xff]   ;;  %v5234_v29 = vld [vmem:[%s6515_s3 + $0x760] ss:$16 sps:$4 sm:$0xff]  }
 0x1e6   :  { %2808 = vmatprep.mubr.bf16.mxu1 %v5322_v0  ;;  %2849 = vmatprep.mubr.bf16.mxu0 %v5322_v0 }
 0x1e8   :  { %2779 = vmatpush1.bf16.msra.mxu1 %v5150_v31  ;;  %2820 = vmatpush1.bf16.msra.mxu0 %v5153_v32  ;;  %v5237_v31 = vld [vmem:[%s6515_s3 + $0x768] ss:$16 sps:$4 sm:$0xff]   ;;  %v5242_v32 = vld [vmem:[%s6515_s3 + $0x784] ss:$16 sps:$4 sm:$0xff]  }
 0x1e9   :  { %2780 = vmatprep.subr.bf16.mxu1 %v5158_v30  ;;  %2821 = vmatprep.subr.bf16.mxu0 %v5161_v33  ;;  %v5245_v30 = vld [vmem:[%s6515_s3 + $0x78c] ss:$16 sps:$4 sm:$0xff]   ;;  %v5240_v33 = vld [vmem:[%s6515_s3 + $0x780] ss:$16 sps:$4 sm:$0xff]  }
 0x1ec   :  { %2781 = vmatpush1.bf16.msra.mxu1 %v5156_v34  ;;  %2822 = vmatpush1.bf16.msra.mxu0 %v5159_v35  ;;  %v5243_v34 = vld [vmem:[%s6515_s3 + $0x788] ss:$16 sps:$4 sm:$0xff]   ;;  %v3254_v35 = vrot.slane %v6241_v60, 2 }
 0x1ed   :  { %2782 = vmatprep.subr.bf16.mxu1 %v5164_v36  ;;  %2823 = vmatprep.subr.bf16.mxu0 %v5167_v37  ;;  %v5248_v36 = vld [vmem:[%s6515_s3 + $0x7a4] ss:$16 sps:$4 sm:$0xff]   ;;  %v5251_v37 = vld [vmem:[%s6515_s3 + $0x7ac] ss:$16 sps:$4 sm:$0xff]  }
 0x1f0   :  { %2783 = vmatpush1.bf16.msra.mxu1 %v5162_v38  ;;  %2824 = vmatpush1.bf16.msra.mxu0 %v5165_v39  ;;  %v5246_v38 = vld [vmem:[%s6515_s3 + $0x7a0] ss:$16 sps:$4 sm:$0xff]   ;;  %v5249_v39 = vld [vmem:[%s6515_s3 + $0x7a8] ss:$16 sps:$4 sm:$0xff]  }
 0x1f1   :  { %2963 = vmatprep.subr.bf16.mxu1 %v5170_v40  ;;  %3004 = vmatprep.subr.bf16.mxu0 %v5173_v41  ;;  %v5254_v40 = vld [vmem:[%s6515_s3 + $0x7c4] ss:$16 sps:$4 sm:$0xff]   ;;  %v5257_v41 = vld [vmem:[%s6515_s3 + $0x7cc] ss:$16 sps:$4 sm:$0xff]  }
 0x1f3   :  { %4415 = vmatmul.mubr.msk.bf16.vlgmr.msra.gmra.mrb[8].mxu1 %vm378_vm0, %v2692_v43  ;;  %4416 = vmatmul.mubr.msk.bf16.vlgmr.msra.gmra.mrb[12].mxu0 %vm378_vm0, %v2692_v43  ;;  %v5260_v43 = vld [vmem:[%s6515_s3 + $0x7e4] ss:$16 sps:$4 sm:$0xff]  }
 0x1f4   :  { %2964 = vmatpush1.bf16.msra.mxu1 %v5168_v25  ;;  %3005 = vmatpush1.bf16.msra.mxu0 %v5171_v42  ;;  %v5252_v25 = vld [vmem:[%s6515_s3 + $0x7c0] ss:$16 sps:$4 sm:$0xff]   ;;  %v5255_v42 = vld [vmem:[%s6515_s3 + $0x7c8] ss:$16 sps:$4 sm:$0xff]  }
 0x1f5   :  { %2965 = vmatprep.subr.bf16.mxu1 %v5176_v44  ;;  %3006 = vmatprep.subr.bf16.mxu0 %v5179_v45  ;;  %v5258_v44 = vld [vmem:[%s6515_s3 + $0x7e0] ss:$16 sps:$4 sm:$0xff]   ;;  %v5261_v45 = vld [vmem:[%s6515_s3 + $0x7e8] ss:$16 sps:$4 sm:$0xff]  }
 0x1f6   :  { %2995 = vmatprep.mubr.bf16.mxu1 %v5322_v0  ;;  %3036 = vmatprep.mubr.bf16.mxu0 %v5322_v0 }
 0x1f8   :  { %2966 = vmatpush1.bf16.msra.mxu1 %v5174_v46  ;;  %3007 = vmatpush1.bf16.msra.mxu0 %v5177_v47  ;;  %v5264_v46 = vld [vmem:[%s6517_s5 + $0x40] sm:$0xff]  }
 0x1f9   :  { %2967 = vmatprep.subr.bf16.mxu1 %v5182_v48  ;;  %3008 = vmatprep.subr.bf16.mxu0 %v5185_v49  ;;  %v5265_v47 = vld [vmem:[%s6517_s5 + $0xc0] sm:$0xff]  }
 0x1fa   :  { %v5266_v48 = vld [vmem:[%s6517_s5] sm:$0xff]  }
 0x1fb   :  { %v5267_v49 = vld [vmem:[%s6517_s5 + $0x80] sm:$0xff]  }
 0x1fc   :  { %2968 = vmatpush1.bf16.msra.mxu1 %v5180_v50  ;;  %3009 = vmatpush1.bf16.msra.mxu0 %v5183_v51  ;;  %v3441_v50 = vrot.slane %v6241_v60, 3  ;;  %v5268_v51 = vld [vmem:[%s6517_s5 + $0x48] sm:$0xff]  }
 0x1fd   :  { %2969 = vmatprep.subr.bf16.mxu1 %v5188_v52  ;;  %3010 = vmatprep.subr.bf16.mxu0 %v5191_v27  ;;  %v5269_v52 = vld [vmem:[%s6517_s5 + $0xc8] sm:$0xff]  }
 0x1fe   :  { %v5270_v27 = vld [vmem:[%s6517_s5 + $0x8] sm:$0xff]  }
 0x200   :  { %2970 = vmatpush1.bf16.msra.mxu1 %v5186_v53  ;;  %3011 = vmatpush1.bf16.msra.mxu0 %v5189_v54  ;;  %v5271_v53 = vld [vmem:[%s6517_s5 + $0x88] sm:$0xff]   ;;  %v5272_v54 = vld [vmem:[%s6517_s5 + $0x50] sm:$0xff]  }
 0x201   :  { %3151 = vmatprep.subr.bf16.mxu1 %v5194_v56  ;;  %3192 = vmatprep.subr.bf16.mxu0 %v5197_v57  ;;  %v5274_v56 = vld [vmem:[%s6517_s5 + $0x10] sm:$0xff]  }
 0x202   :  { %v5275_v57 = vld [vmem:[%s6517_s5 + $0x90] sm:$0xff]  }
 0x203   :  { %4449 = vmatmul.mubr.msk.bf16.vlgmr.msra.gmra.mrb[8].mxu1 %vm378_vm0, %v6241_v60  ;;  %4450 = vmatmul.mubr.msk.bf16.vlgmr.msra.gmra.mrb[12].mxu0 %vm378_vm0, %v6241_v60  ;;  %v5278_v60 = vld [vmem:[%s6517_s5 + $0x18] sm:$0xff]  }
 0x204   :  { %3152 = vmatpush1.bf16.msra.mxu1 %v5192_v58  ;;  %3193 = vmatpush1.bf16.msra.mxu0 %v5195_v59  ;;  %v5276_v58 = vld [vmem:[%s6517_s5 + $0x58] sm:$0xff]  }
 0x205   :  { %3153 = vmatprep.subr.bf16.mxu1 %v5200_v28  ;;  %3194 = vmatprep.subr.bf16.mxu0 %v5203_v61  ;;  %v5277_v59 = vld [vmem:[%s6517_s5 + $0xd8] sm:$0xff]   ;;  %v5280_v61 = vld [vmem:[%s6517_s5 + $0x60] sm:$0xff]  }
 0x206   :  { %3183 = vmatprep.mubr.bf16.mxu1 %v5322_v0  ;;  %3224 = vmatprep.mubr.bf16.mxu0 %v5322_v0  ;;  %v5279_v28 = vld [vmem:[%s6517_s5 + $0x98] sm:$0xff]  }
 0x208   :  { %3154 = vmatpush1.bf16.msra.mxu1 %v5198_v62  ;;  %3195 = vmatpush1.bf16.msra.mxu0 %v5201_v63  ;;  %v5281_v62 = vld [vmem:[%s6517_s5 + $0xe0] sm:$0xff]  }
 0x209   :  { %3155 = vmatprep.subr.bf16.mxu1 %v5206_v1  ;;  %3196 = vmatprep.subr.bf16.mxu0 %v5209_v2  ;;  %v5282_v63 = vld [vmem:[%s6517_s5 + $0x20] sm:$0xff]   ;;  %v5284_v2 = vld [vmem:[%s6517_s5 + $0x68] sm:$0xff]  }
 0x20a   :  { %v5283_v1 = vld [vmem:[%s6517_s5 + $0xa0] sm:$0xff]  }
 0x20c   :  { %3156 = vmatpush1.bf16.msra.mxu1 %v5204_v3  ;;  %3197 = vmatpush1.bf16.msra.mxu0 %v5207_v4  ;;  %v5285_v3 = vld [vmem:[%s6517_s5 + $0xe8] sm:$0xff]  }
 0x20d   :  { %3157 = vmatprep.subr.bf16.mxu1 %v5212_v5  ;;  %3198 = vmatprep.subr.bf16.mxu0 %v5215_v6  ;;  %v5286_v4 = vld [vmem:[%s6517_s5 + $0x28] sm:$0xff]   ;;  %v5288_v6 = vld [vmem:[%s6517_s5 + $0x70] sm:$0xff]  }
 0x20e   :  { %v5287_v5 = vld [vmem:[%s6517_s5 + $0xa8] sm:$0xff]  }
 0x210   :  { %3158 = vmatpush1.bf16.msra.mxu1 %v5210_v7  ;;  %3199 = vmatpush1.bf16.msra.mxu0 %v5213_v8  ;;  %v5289_v7 = vld [vmem:[%s6517_s5 + $0xf0] sm:$0xff]  }
 0x211   :  { %3338 = vmatprep.subr.bf16.mxu1 %v5218_v9  ;;  %3379 = vmatprep.subr.bf16.mxu0 %v5221_v10  ;;  %v5290_v8 = vld [vmem:[%s6517_s5 + $0x30] sm:$0xff]   ;;  %v5292_v10 = vld [vmem:[%s6517_s5 + $0x78] sm:$0xff]  }
 0x212   :  { %v5291_v9 = vld [vmem:[%s6517_s5 + $0xb0] sm:$0xff]  }
 0x213   :  { %4483 = vmatmul.mubr.msk.bf16.vlgmr.msra.gmra.mrb[8].mxu1 %vm378_vm0, %v3067_v15  ;;  %4484 = vmatmul.mubr.msk.bf16.vlgmr.msra.gmra.mrb[12].mxu0 %vm378_vm0, %v3067_v15  ;;  %v5295_v15 = vld [vmem:[%s6517_s5 + $0xb8] sm:$0xff]  }
 0x214   :  { %3339 = vmatpush1.bf16.msra.mxu1 %v5216_v12  ;;  %3380 = vmatpush1.bf16.msra.mxu0 %v5219_v14  ;;  %v5293_v12 = vld [vmem:[%s6517_s5 + $0xf8] sm:$0xff]  }
 0x215   :  { %3340 = vmatprep.subr.bf16.mxu1 %v5224_v16  ;;  %3381 = vmatprep.subr.bf16.mxu0 %v5227_v17  ;;  %v5294_v14 = vld [vmem:[%s6517_s5 + $0x38] sm:$0xff]   ;;  %v606_v16 = vsub.s32 2, %v5568_v11  ;;  %v594_v17 = vld [vmem:[%s6516_s4] sm:$0xf] }
 0x216   :  { %3370 = vmatprep.mubr.bf16.mxu1 %v5322_v0  ;;  %3411 = vmatprep.mubr.bf16.mxu0 %v5322_v0 }
 0x218   :  { %3341 = vmatpush1.bf16.msra.mxu1 %v5222_v18  ;;  %3382 = vmatpush1.bf16.msra.mxu0 %v5225_v19  ;;  %v602_v18 = vsub.s32 1, %v5568_v11  ;;  %v610_v19 = vsub.s32 3, %v5568_v11 }
 0x219   :  { %3342 = vmatprep.subr.bf16.mxu1 %v5230_v20  ;;  %3383 = vmatprep.subr.bf16.mxu0 %v5233_v21  ;;  %v599_v20 = vrot.slane %v594_v17, %v5574_v13  ;;  %v607_v21 = vrot.slane %v594_v17, %v606_v16 }
 0x21c   :  { %3343 = vmatpush1.bf16.msra.mxu1 %v5228_v22  ;;  %3384 = vmatpush1.bf16.msra.mxu0 %v5231_v23  ;;  %v603_v22 = vrot.slane %v594_v17, %v602_v18  ;;  %v611_v23 = vrot.slane %v594_v17, %v610_v19 }
 0x21d   :  { %3344 = vmatprep.subr.bf16.mxu1 %v5236_v24  ;;  %3385 = vmatprep.subr.bf16.mxu0 %v5239_v26 }
 0x220   :  { %3345 = vmatpush1.bf16.msra.mxu1 %v5234_v29  ;;  %3386 = vmatpush1.bf16.msra.mxu0 %v5237_v31 }
 0x221   :  { %3525 = vmatprep.subr.bf16.mxu1 %v5242_v32  ;;  %3566 = vmatprep.subr.bf16.mxu0 %v5245_v30 }
 0x223   :  { %4517 = vmatmul.mubr.msk.bf16.vlgmr.msra.gmra.mrb[8].mxu1 %vm378_vm0, %v3254_v35  ;;  %4518 = vmatmul.mubr.msk.bf16.vlgmr.msra.gmra.mrb[12].mxu0 %vm378_vm0, %v3254_v35 }
 0x224   :  { %3526 = vmatpush1.bf16.msra.mxu1 %v5240_v33  ;;  %3567 = vmatpush1.bf16.msra.mxu0 %v5243_v34 }
 0x225   :  { %3527 = vmatprep.subr.bf16.mxu1 %v5248_v36  ;;  %3568 = vmatprep.subr.bf16.mxu0 %v5251_v37 }
 0x226   :  { %3557 = vmatprep.mubr.bf16.mxu1 %v5322_v0  ;;  %3598 = vmatprep.mubr.bf16.mxu0 %v5322_v0  ;;  %v5263_v0 = vld [vmem:[%s6515_s3 + $0x7ec] ss:$16 sps:$4 sm:$0xff]  }
 0x228   :  { %3528 = vmatpush1.bf16.msra.mxu1 %v5246_v38  ;;  %3569 = vmatpush1.bf16.msra.mxu0 %v5249_v39 }
 0x229   :  { %3529 = vmatprep.subr.bf16.mxu1 %v5254_v40  ;;  %3570 = vmatprep.subr.bf16.mxu0 %v5257_v41 }
 0x22c   :  { %3530 = vmatpush1.bf16.msra.mxu1 %v5252_v25  ;;  %3571 = vmatpush1.bf16.msra.mxu0 %v5255_v42 }
 0x22d   :  { %3531 = vmatprep.subr.bf16.mxu1 %v5260_v43  ;;  %3572 = vmatprep.subr.bf16.mxu0 %v5263_v0 }
 0x230   :  { %3532 = vmatpush1.bf16.msra.mxu1 %v5258_v44  ;;  %3573 = vmatpush1.bf16.msra.mxu0 %v5261_v45  ;;  %v4553_v45 = vld [vmem:[%s6518_s6] ss:$0 sm:$0xff] }
 0x231   :  { %4648 = vmatprep.subr.bf16.mxu1 %v5264_v46  ;;  %4670 = vmatprep.subr.bf16.mxu0 %v5265_v47 }
 0x233   :  { %4551 = vmatmul.mubr.msk.bf16.vlgmr.msra.gmra.mrb[8].mxu1 %vm378_vm0, %v3441_v50  ;;  %4552 = vmatmul.mubr.msk.bf16.vlgmr.msra.gmra.mrb[12].mxu0 %vm378_vm0, %v3441_v50 }
 0x234   :  { %4649 = vmatpush3.bf16.msra.mxu1 %v5266_v48  ;;  %4671 = vmatpush3.bf16.msra.mxu0 %v5267_v49 }
 0x235   :  { %4650 = vmatprep.subr.bf16.mxu1 %v5268_v51  ;;  %4672 = vmatprep.subr.bf16.mxu0 %v5269_v52 }
 0x238   :  { %4651 = vmatpush3.bf16.msra.mxu1 %v5270_v27  ;;  %4673 = vmatpush3.bf16.msra.mxu0 %v5271_v53 }
 0x239   :  { %4652 = vmatprep.subr.bf16.mxu1 %v5272_v54  ;;  %4674 = vmatprep.subr.bf16.mxu0 %v5273_v55 }
 0x23c   :  { %4653 = vmatpush3.bf16.msra.mxu1 %v5274_v56  ;;  %4675 = vmatpush3.bf16.msra.mxu0 %v5275_v57 }
 0x23d   :  { %4654 = vmatprep.subr.bf16.mxu1 %v5276_v58  ;;  %4676 = vmatprep.subr.bf16.mxu0 %v5277_v59 }
 0x240   :  { %4655 = vmatpush3.bf16.msra.mxu1 %v5278_v60  ;;  %4677 = vmatpush3.bf16.msra.mxu0 %v5279_v28 }
 0x241   :  { %4656 = vmatprep.subr.bf16.mxu1 %v5280_v61  ;;  %4678 = vmatprep.subr.bf16.mxu0 %v5281_v62 }
 0x244   :  { %4657 = vmatpush3.bf16.msra.mxu1 %v5282_v63  ;;  %4679 = vmatpush3.bf16.msra.mxu0 %v5283_v1 }
 0x245   :  { %4658 = vmatprep.subr.bf16.mxu1 %v5284_v2  ;;  %4680 = vmatprep.subr.bf16.mxu0 %v5285_v3 }
 0x248   :  { %4659 = vmatpush3.bf16.msra.mxu1 %v5286_v4  ;;  %4681 = vmatpush3.bf16.msra.mxu0 %v5287_v5 }
 0x249   :  { %4660 = vmatprep.subr.bf16.mxu1 %v5288_v6  ;;  %4682 = vmatprep.subr.bf16.mxu0 %v5289_v7 }
 0x24c   :  { %4661 = vmatpush3.bf16.msra.mxu1 %v5290_v8  ;;  %4683 = vmatpush3.bf16.msra.mxu0 %v5291_v9 }
 0x24d   :  { %4662 = vmatprep.subr.bf16.mxu1 %v5292_v10  ;;  %4684 = vmatprep.subr.bf16.mxu0 %v5293_v12 }
 0x250   :  { %4663 = vmatpush3.bf16.msra.mxu1 %v5294_v14  ;;  %4685 = vmatpush3.bf16.msra.mxu0 %v5295_v15 }
 0x306   :  { %v3559_v24 = vpop.f32.mrb[8].mxu1  ;;  %v3600_v26 = vpop.f32.mrb[12].mxu0 }
 0x307   :  { %v4704_v29 = vadd.f32 %v3559_v24, %v599_v20  ;;  %v4706_v31 = vadd.f32 %v3600_v26, %v607_v21  ;;  %v3561_v32 = vpop.f32.mrb[9].mxu1  ;;  %v3602_v30 = vpop.f32.mrb[13].mxu0 }
 0x308   :  { %v4705_v33 = vadd.f32 %v3561_v32, %v603_v22  ;;  %v4707_v34 = vadd.f32 %v3602_v30, %v611_v23  ;;  %v3563_v35 = vpop.f32.mrb[10].mxu1  ;;  %v3604_v36 = vpop.f32.mrb[14].mxu0 }
 0x309   :  { %v3611_v37 = vmax.f32 %v4704_v29, 0.0  ;;  %v3613_v38 = vmax.f32 %v4706_v31, 0.0  ;;  %v3564_v39 = vpop.f32.mrb[11].mxu1  ;;  %v3605_v40 = vpop.f32.mrb[15].mxu0 }
 0x30a   :  { %v3612_v11 = vmax.f32 %v4705_v33, 0.0  ;;  %v3614_v41 = vmax.f32 %v4707_v34, 0.0 }
 0x30b   :  { %v3615_v42 = vpack.c.bf16 %v3611_v37, %v3611_v37  ;;  %v3617_v43 = vpack.c.bf16 %v3613_v38, %v3613_v38 }
 0x30c   :  { %v3616_v13 = vpack.c.bf16 %v3612_v11, %v3612_v11  ;;  %v3618_v25 = vpack.c.bf16 %v3614_v41, %v3614_v41 }
 0x30e   :  { %3914 = vmatprep.mubr.bf16.mxu1 %v3616_v13  ;;  %3954 = vmatprep.mubr.bf16.mxu0 %v3618_v25 }
 0x30f   :  { %3915 = vmatmul.mubr.bf16.vlgmr.msra.gmra.mrb[12].mxu1 %v3615_v42  ;;  %3955 = vmatmul.mubr.bf16.vlgmr.msra.gmra.mrb[16].mxu0 %v3617_v43 }
 0x3e2   :  { %v4664_v0 = vpop.f32.mrb[12].mxu1  ;;  %v4686_v44 = vpop.f32.mrb[16].mxu0 }
 0x3e3   :  { %v4665_v46 = vpop.f32.mrb[13].mxu1  ;;  %v4687_v47 = vpop.f32.mrb[17].mxu0 }
 0x3e4   :  { %v4666_v48 = vadd.f32 %v4665_v46, %v4664_v0  ;;  %v4688_v49 = vadd.f32 %v4687_v47, %v4686_v44  ;;  %v4667_v50 = vpop.f32.mrb[14].mxu1  ;;  %v4689_v51 = vpop.f32.mrb[18].mxu0 }
 0x3e5   :  { %v4668_v52 = vpop.f32.mrb[15].mxu1  ;;  %v4690_v27 = vpop.f32.mrb[19].mxu0 }
 0x3e6   :  { %v3917_v53 = vadd.f32 %v4666_v48, %v4553_v45 }
 0x3e8   :  { %v3957_v54 = vadd.f32 %v4688_v49, %v3917_v53 }
 0x3ea   :  { %3962 = vst [vmem:[#allocation2] sm:$0x3] %v3957_v54 }
 0x3eb   :  { %5309 = shalt.err (!%p5306_p4)
}
 0x3ec   :  { %s5310_s11 = scalar_lea.hbm %s6519_s7, 32 }
 0x3ed   :  { %p5311_p5 = scmp.ne.s32.totalorder %s6519_s7, %s5310_s11  ;;  %p5314_p6 = scmp.lt.u32.totalorder %s5310_s11, %s6519_s7 }
 0x3ef   :  { %p5316_p7 = pnand %p5314_p6, %p5311_p5 }
 0x3f1   :  { %5319 = shalt.err (!%p5316_p7)
}
 0x3f2   :  { %3972 = dma.vmem_to_hbm [thread:$0]  %s3970_s8, 32, %s6519_s7, [#allocation3]  }
 0x3f3   :  { %5320 = dma.done.wait [#allocation3], 32  }
 0x3f4   :  { %5321 = vsyncadd [#allocation3], 4294967264 }
 0x3f5   :  { %3976 = vsyncpa [#allocation3], 1 }

</bundles_post_ra>
